<compile_context>
chip_gen: v6e
topology: v6e:2x2x1
jax: 0.10.0
libtpu: 0.0.40
codegen_flags: <defaults>
</compile_context>

<pallas_src>
import jax
import jax.numpy as jnp
from jax import lax
from jax.experimental import pallas as pl
from jax.experimental.pallas import tpu as pltpu

HIDDEN = 32     # stands in for hidden_size=768 at small scale
VOCAB = 50      # stands in for the BERT vocab at small scale
SEQ_T = 8
BATCH = 2

H_PAD = 128     # lane-dim padding (multiple of 128)
B_PAD = 8       # sublane-dim padding (multiple of 8)


def bigru_kernel(emb_ref, mask_ref, win_ref, bin_ref, wh_ref, bhn_ref,
                 out_ref, hid_ref,
                 x_ref, ob_ref):
    """Bidirectional single-layer GRU over a padded, time-major batch.

    emb_ref : (T*B_PAD, H_PAD) bf16   embedded tokens, time-major, flattened
    mask_ref: (T*B_PAD, H_PAD) f32    1.0 where t < length(row) else 0.0
    win_ref : (H_PAD, 6*H_PAD) bf16   fused input weights [fwd r|z|n | bwd r|z|n]
    bin_ref : (1, 6*H_PAD) f32        fused biases (bi + commuting bh_r/bh_z)
    wh_ref  : (2*H_PAD, 6*H_PAD) bf16 block-diag recurrent weights
    bhn_ref : (1, 2*H_PAD) f32        n-gate hidden biases [fwd | bwd]
    out_ref : (T*B_PAD, H_PAD) f32    summed fwd+bwd outputs
    hid_ref : (2, B_PAD, H_PAD) f32   final hidden states [fwd, bwd]
    x_ref   : VMEM scratch (T*B_PAD, 6*H_PAD) f32  hoisted input projections
    ob_ref  : VMEM scratch (T*B_PAD, H_PAD) f32    backward-direction outputs
    """
    TB, HP = emb_ref.shape
    BP = hid_ref.shape[1]
    T = TB // BP
    G = 3 * HP                                   # per-direction gate width

    # ---- Hoisted fused input projection: ONE lane-dense MXU matmul covering
    # both directions, bf16 operands, f32 accumulation, biases folded once.
    x_ref[...] = jnp.dot(emb_ref[...], win_ref[...],
                         preferred_element_type=jnp.float32) + bin_ref[...]

    # ---- Packed-sequence mask: one compare outside the loop; per-step uses
    # are static bool slices (no broadcast/compare on the critical chain).
    mask_all = mask_ref[...] > 0.0                       # (TB, HP) bool

    # Hoisted n-gate hidden-bias broadcasts (JAX does not CSE these in loops).
    bhn_f = jnp.broadcast_to(bhn_ref[:, 0:HP], (BP, HP))
    bhn_b = jnp.broadcast_to(bhn_ref[:, HP:2 * HP], (BP, HP))

    wh = wh_ref[...]                                     # (2*HP, 6*HP) bf16

    def gates(xp, hp, h, bhn):
        # xp/hp: (BP, 3*HP) f32; 128-aligned static lane slices.
        r = jax.nn.sigmoid(xp[:, 0:HP] + hp[:, 0:HP])
        z = jax.nn.sigmoid(xp[:, HP:2 * HP] + hp[:, HP:2 * HP])
        n = jnp.tanh(xp[:, 2 * HP:3 * HP] + r * (hp[:, 2 * HP:3 * HP] + bhn))
        return n + z * (h - n)          # == (1-z)*n + z*h, one fewer VPU op

    # Concatenated hidden state: lanes [0:HP] = forward, [HP:2HP] = backward.
    h_cat = jnp.zeros((BP, 2 * HP), jnp.float32)

    # Fully unrolled (T small & static) recurrence.  ONE block-diagonal
    # (8,256)@(256,768) matmul per step serves BOTH directions; the zero
    # off-diagonal blocks guarantee no cross-direction leakage.
    for i in range(T):
        tf, tb = i, T - 1 - i

        hp = jnp.dot(h_cat.astype(jnp.bfloat16), wh,
                     preferred_element_type=jnp.float32)     # (BP, 6*HP) f32

        h_f = h_cat[:, 0:HP]
        h_b = h_cat[:, HP:2 * HP]

        # Forward direction at t = tf; backward direction at t = tb.
        # pack_padded semantics: steps past a sequence's length do not update
        # h and produce zero output (valid because initial hidden is zero).
        hf_new = gates(x_ref[pl.ds(tf * BP, BP), pl.ds(0, G)],
                       hp[:, 0:G], h_f, bhn_f)
        hb_new = gates(x_ref[pl.ds(tb * BP, BP), pl.ds(G, G)],
                       hp[:, G:2 * G], h_b, bhn_b)

        mf = mask_all[tf * BP:(tf + 1) * BP, :]
        mb = mask_all[tb * BP:(tb + 1) * BP, :]

        out_ref[pl.ds(tf * BP, BP), :] = jnp.where(mf, hf_new, 0.0)
        ob_ref[pl.ds(tb * BP, BP), :] = jnp.where(mb, hb_new, 0.0)

        h_cat = jnp.concatenate(
            [jnp.where(mf, hf_new, h_f), jnp.where(mb, hb_new, h_b)], axis=1)

    # Module sums the fwd and bwd halves of the bi-GRU output: one lane-dense
    # bulk add instead of T read-modify-write stores.
    out_ref[...] = out_ref[...] + ob_ref[...]
    hid_ref[0] = h_cat[:, 0:HP]
    hid_ref[1] = h_cat[:, HP:2 * HP]


def pack_params(raw_params):
    """Fuse per-gate (r,z,n) and per-direction weights into MXU-friendly
    padded layouts: one (HP,6HP) input weight, one block-diag (2HP,6HP)
    recurrent weight, one fused (1,6HP) bias, one (1,2HP) n-gate hidden bias."""
    wif, whf, bif, bhf, wib, whb, bib, bhb = raw_params
    H = wif.shape[-1]

    def fuse_w(w):  # (3, H, H) -> (H_PAD, 3*H_PAD) f32, gate blocks [r|z|n]
        blocks = [jnp.pad(w[g], ((0, H_PAD - H), (0, H_PAD - H)))
                  for g in range(3)]
        return jnp.concatenate(blocks, axis=1)

    def pad1(v):
        return jnp.pad(v, ((0, 0), (0, H_PAD - H)))

    def fuse_b(bi, bh):  # -> ((1, 3*H_PAD) fused bias, (1, H_PAD) bh_n)
        fused = jnp.concatenate([pad1(bi[0] + bh[0]),     # r: bi_r + bh_r
                                 pad1(bi[1] + bh[1]),     # z: bi_z + bh_z
                                 pad1(bi[2])],            # n: bi_n only
                                axis=1)
        return fused, pad1(bh[2])

    # Fused input weight / bias for both directions.
    win = jnp.concatenate([fuse_w(wif), fuse_w(wib)], axis=1).astype(jnp.bfloat16)
    bf, bhnf = fuse_b(bif, bhf)
    bb, bhnb = fuse_b(bib, bhb)
    bin_cat = jnp.concatenate([bf, bb], axis=1).astype(jnp.float32)     # (1, 6HP)
    bhn_cat = jnp.concatenate([bhnf, bhnb], axis=1).astype(jnp.float32)  # (1, 2HP)

    # Block-diagonal recurrent weight: [[whf, 0], [0, whb]].
    wh_cat = jnp.zeros((2 * H_PAD, 6 * H_PAD), jnp.float32)
    wh_cat = wh_cat.at[0:H_PAD, 0:3 * H_PAD].set(fuse_w(whf))
    wh_cat = wh_cat.at[H_PAD:, 3 * H_PAD:].set(fuse_w(whb))
    wh_cat = wh_cat.astype(jnp.bfloat16)

    return win, bin_cat, wh_cat, bhn_cat


def encoder_rnn_forward(input_seq, input_lengths, emb_table, packed_params):
    """input_seq: (T, B) int32, input_lengths: (B,) int32 (sorted descending)."""
    win, bin_cat, wh_cat, bhn_cat = packed_params
    T, B = input_seq.shape
    H = emb_table.shape[1]

    # Embedding gather kept in plain JAX (glue); the GRU recurrence is the
    # Pallas hot path.  TODO(synk): at real scale move the gather in-kernel
    # via scalar-prefetched token ids + data-dependent index_map.
    embedded = jnp.take(emb_table, input_seq, axis=0)            # (T, B, H) f32
    emb_pad = jnp.zeros((T, B_PAD, H_PAD), jnp.bfloat16)
    emb_pad = emb_pad.at[:, :B, :H].set(embedded.astype(jnp.bfloat16))
    emb2d = emb_pad.reshape(T * B_PAD, H_PAD)

    # Packed-sequence validity mask (padded batch rows get length 0 -> never
    # update and stay zero).
    len_pad = jnp.zeros((B_PAD,), jnp.int32).at[:B].set(
        input_lengths.astype(jnp.int32))
    t_idx = jnp.arange(T, dtype=jnp.int32).reshape(T, 1, 1)
    valid = (t_idx < len_pad.reshape(1, B_PAD, 1)).astype(jnp.float32)
    mask2d = jnp.broadcast_to(valid, (T, B_PAD, H_PAD)).reshape(T * B_PAD, H_PAD)

    vmem = pl.BlockSpec(memory_space=pltpu.MemorySpace.VMEM)
    out2d, hid = pl.pallas_call(
        bigru_kernel,
        out_shape=(
            jax.ShapeDtypeStruct((T * B_PAD, H_PAD), jnp.float32),  # outputs
            jax.ShapeDtypeStruct((2, B_PAD, H_PAD), jnp.float32),   # hidden
        ),
        in_specs=[vmem] * 6,
        out_specs=(vmem, vmem),
        scratch_shapes=[
            pltpu.VMEM((T * B_PAD, 6 * H_PAD), jnp.float32),  # fused x-proj
            pltpu.VMEM((T * B_PAD, H_PAD), jnp.float32),      # bwd outputs
        ],
        compiler_params=pltpu.CompilerParams(
            vmem_limit_bytes=16 * 1024 * 1024),   # toy footprint is ~1.5 MiB
    )(emb2d, mask2d, win, bin_cat, wh_cat, bhn_cat)

    outputs = out2d.reshape(T, B_PAD, H_PAD)[:, :B, :H]
    hidden = hid[:, :B, :H]
    return outputs, hidden


def ref_forward(input_seq, input_lengths, emb_table, raw_params):
    """Pure-JAX reference with the same bf16-operand / f32-accumulation
    numerics as the kernel (PyTorch GRU math up to bf16 operand rounding)."""
    wif, whf, bif, bhf, wib, whb, bib, bhb = raw_params
    embedded = jnp.take(emb_table, input_seq, axis=0).astype(jnp.float32)
    T, B, H = embedded.shape
    L = input_lengths.astype(jnp.int32).reshape(B, 1)
    x_bf = embedded.astype(jnp.bfloat16)

    def dot(a, b):
        return jnp.dot(a.astype(jnp.bfloat16), b.astype(jnp.bfloat16),
                       preferred_element_type=jnp.float32)

    def cell(x, h, wi, wh, bi, bh):
        r = jax.nn.sigmoid(dot(x, wi[0]) + bi[0] + dot(h, wh[0]) + bh[0])
        z = jax.nn.sigmoid(dot(x, wi[1]) + bi[1] + dot(h, wh[1]) + bh[1])
        n = jnp.tanh(dot(x, wi[2]) + bi[2] + r * (dot(h, wh[2]) + bh[2]))
        return (1.0 - z) * n + z * h

    out = jnp.zeros((T, B, H), jnp.float32)
    h = jnp.zeros((B, H), jnp.float32)
    for t in range(T):
        hn = cell(x_bf[t], h, wif, whf, bif, bhf)
        m = t < L
        out = out.at[t].set(jnp.where(m, hn, 0.0))
        h = jnp.where(m, hn, h)
    h_f = h

    h = jnp.zeros((B, H), jnp.float32)
    for t in range(T - 1, -1, -1):
        hn = cell(x_bf[t], h, wib, whb, bib, bhb)
        m = t < L
        out = out.at[t].add(jnp.where(m, hn, 0.0))
        h = jnp.where(m, hn, h)
    return out, jnp.stack([h_f, h])


def init_params(key, H, V):
    bound = 1.0 / float(H) ** 0.5   # PyTorch default uniform(-1/sqrt(H), 1/sqrt(H))
    ks = jax.random.split(key, 9)

    def u(k, shape):
        return jax.random.uniform(k, shape, jnp.float32, -bound, bound)

    emb = u(ks[0], (V, H))
    wif = u(ks[1], (3, H, H)); whf = u(ks[2], (3, H, H))
    bif = u(ks[3], (3, 1, H)); bhf = u(ks[4], (3, 1, H))
    wib = u(ks[5], (3, H, H)); whb = u(ks[6], (3, H, H))
    bib = u(ks[7], (3, 1, H)); bhb = u(ks[8], (3, 1, H))
    return emb, (wif, whf, bif, bhf, wib, whb, bib, bhb)


if __name__ == "__main__":
    key = jax.random.PRNGKey(0)
    k_param, k_seq = jax.random.split(key)

    emb_table, raw_params = init_params(k_param, HIDDEN, VOCAB)
    packed_params = pack_params(raw_params)

    # (T, B) token ids; lengths sorted descending (pack_padded enforce_sorted).
    input_seq = jax.random.randint(k_seq, (SEQ_T, BATCH), 0, VOCAB, dtype=jnp.int32)
    input_lengths = jnp.array([SEQ_T, 5], dtype=jnp.int32)

    outputs, hidden = encoder_rnn_forward(input_seq, input_lengths,
                                          emb_table, packed_params)
    outputs = jax.block_until_ready(outputs)
    hidden = jax.block_until_ready(hidden)

    ref_out, ref_hid = ref_forward(input_seq, input_lengths, emb_table, raw_params)

    assert outputs.shape == (SEQ_T, BATCH, HIDDEN)
    assert hidden.shape == (2, BATCH, HIDDEN)
    assert jnp.allclose(outputs, ref_out, atol=2e-3, rtol=2e-3), \
        float(jnp.max(jnp.abs(outputs - ref_out)))
    assert jnp.allclose(hidden, ref_hid, atol=2e-3, rtol=2e-3), \
        float(jnp.max(jnp.abs(hidden - ref_hid)))

    print("KERNEL_OK")
</pallas_src>

<mosaic_0001>
module attributes {stable_mosaic.version = 11 : i64} {
  func.func @bigru_kernel(%arg0: memref<64x128xbf16, #tpu.memory_space<vmem>>, %arg1: memref<64x128xf32, #tpu.memory_space<vmem>>, %arg2: memref<128x768xbf16, #tpu.memory_space<vmem>>, %arg3: memref<1x768xf32, #tpu.memory_space<vmem>>, %arg4: memref<256x768xbf16, #tpu.memory_space<vmem>>, %arg5: memref<1x256xf32, #tpu.memory_space<vmem>>, %arg6: memref<64x128xf32, #tpu.memory_space<vmem>>, %arg7: memref<2x8x128xf32, #tpu.memory_space<vmem>>, %arg8: memref<64x768xf32, #tpu.memory_space<vmem>>, %arg9: memref<64x128xf32, #tpu.memory_space<vmem>>) attributes {dimension_semantics = [], scalar_prefetch = 0 : i64, scratch_operands = 2 : i64, tpu.core_type = #tpu.core_type<tc>} {
    %c0 = arith.constant 0 : index
    %c0_0 = arith.constant 0 : index
    %0 = vector.load %arg0[%c0, %c0_0] : memref<64x128xbf16, #tpu.memory_space<vmem>>, vector<64x128xbf16>
    %c0_1 = arith.constant 0 : index
    %c0_2 = arith.constant 0 : index
    %1 = vector.load %arg2[%c0_1, %c0_2] : memref<128x768xbf16, #tpu.memory_space<vmem>>, vector<128x768xbf16>
    %cst = arith.constant dense<0.000000e+00> : vector<64x768xf32>
    %2 = tpu.matmul %0, %1, %cst {dimension_numbers = #tpu.dot_dimension_numbers<[1], [0], [0], [1], [0, 0, 1, 1], [], []>} : vector<64x128xbf16>, vector<128x768xbf16>, vector<64x768xf32> -> vector<64x768xf32>
    %c0_3 = arith.constant 0 : index
    %c0_4 = arith.constant 0 : index
    %3 = vector.load %arg3[%c0_3, %c0_4] : memref<1x768xf32, #tpu.memory_space<vmem>>, vector<1x768xf32>
    %4 = vector.broadcast %3 : vector<1x768xf32> to vector<64x768xf32>
    %5 = arith.addf %2, %4 : vector<64x768xf32>
    %c0_5 = arith.constant 0 : index
    %c0_6 = arith.constant 0 : index
    %6 = vector.load %arg8[%c0_5, %c0_6] : memref<64x768xf32, #tpu.memory_space<vmem>>, vector<64x768xf32>
    tpu.vector_store %arg8[%c0_5, %c0_6], %5 {strides = array<i32>} : memref<64x768xf32, #tpu.memory_space<vmem>>, vector<64x768xf32>,
    %c0_7 = arith.constant 0 : index
    %c0_8 = arith.constant 0 : index
    %7 = vector.load %arg1[%c0_7, %c0_8] : memref<64x128xf32, #tpu.memory_space<vmem>>, vector<64x128xf32>
    %cst_9 = arith.constant 0.000000e+00 : f32
    %8 = vector.broadcast %cst_9 : f32 to vector<64x128xf32>
    %9 = arith.cmpf ogt, %7, %8 : vector<64x128xf32>
    %c0_10 = arith.constant 0 : index
    %c0_11 = arith.constant 0 : index
    %10 = vector.load %arg5[%c0_10, %c0_11] : memref<1x256xf32, #tpu.memory_space<vmem>>, vector<1x128xf32>
    %11 = vector.shape_cast %10 : vector<1x128xf32> to vector<1x128xf32>
    %12 = vector.broadcast %11 : vector<1x128xf32> to vector<8x128xf32>
    %c0_12 = arith.constant 0 : index
    %c128 = arith.constant 128 : index
    %13 = vector.load %arg5[%c0_12, %c128] : memref<1x256xf32, #tpu.memory_space<vmem>>, vector<1x128xf32>
    %14 = vector.shape_cast %13 : vector<1x128xf32> to vector<1x128xf32>
    %15 = vector.broadcast %14 : vector<1x128xf32> to vector<8x128xf32>
    %c0_13 = arith.constant 0 : index
    %c0_14 = arith.constant 0 : index
    %16 = vector.load %arg4[%c0_13, %c0_14] : memref<256x768xbf16, #tpu.memory_space<vmem>>, vector<256x768xbf16>
    %cst_15 = arith.constant 0.000000e+00 : f32
    %17 = vector.broadcast %cst_15 : f32 to vector<8x256xf32>
    %18 = arith.truncf %17 : vector<8x256xf32> to vector<8x256xbf16>
    %cst_16 = arith.constant dense<0.000000e+00> : vector<8x768xf32>
    %19 = tpu.matmul %18, %16, %cst_16 {dimension_numbers = #tpu.dot_dimension_numbers<[1], [0], [0], [1], [0, 0, 1, 1], [], []>} : vector<8x256xbf16>, vector<256x768xbf16>, vector<8x768xf32> -> vector<8x768xf32>
    %20 = vector.extract_strided_slice %17 {offsets = [0, 0], sizes = [8, 128], strides = [1, 1]} : vector<8x256xf32> to vector<8x128xf32>
    %21 = vector.extract_strided_slice %17 {offsets = [0, 128], sizes = [8, 128], strides = [1, 1]} : vector<8x256xf32> to vector<8x128xf32>
    %c0_17 = arith.constant 0 : index
    %c0_18 = arith.constant 0 : index
    %22 = vector.load %arg8[%c0_17, %c0_18] : memref<64x768xf32, #tpu.memory_space<vmem>>, vector<8x384xf32>
    %23 = vector.extract_strided_slice %19 {offsets = [0, 0], sizes = [8, 384], strides = [1, 1]} : vector<8x768xf32> to vector<8x384xf32>
    %24 = vector.extract_strided_slice %22 {offsets = [0, 0], sizes = [8, 128], strides = [1, 1]} : vector<8x384xf32> to vector<8x128xf32>
    %25 = vector.extract_strided_slice %23 {offsets = [0, 0], sizes = [8, 128], strides = [1, 1]} : vector<8x384xf32> to vector<8x128xf32>
    %26 = arith.addf %24, %25 : vector<8x128xf32>
    %27 = arith.negf %26 : vector<8x128xf32>
    %28 = math.exp %27 : vector<8x128xf32>
    %cst_19 = arith.constant 1.000000e+00 : f32
    %29 = vector.broadcast %cst_19 : f32 to vector<8x128xf32>
    %30 = arith.addf %29, %28 : vector<8x128xf32>
    %31 = arith.divf %29, %30 : vector<8x128xf32>
    %32 = vector.extract_strided_slice %22 {offsets = [0, 128], sizes = [8, 128], strides = [1, 1]} : vector<8x384xf32> to vector<8x128xf32>
    %33 = vector.extract_strided_slice %23 {offsets = [0, 128], sizes = [8, 128], strides = [1, 1]} : vector<8x384xf32> to vector<8x128xf32>
    %34 = arith.addf %32, %33 : vector<8x128xf32>
    %35 = arith.negf %34 : vector<8x128xf32>
    %36 = math.exp %35 : vector<8x128xf32>
    %cst_20 = arith.constant 1.000000e+00 : f32
    %37 = vector.broadcast %cst_20 : f32 to vector<8x128xf32>
    %38 = arith.addf %37, %36 : vector<8x128xf32>
    %39 = arith.divf %37, %38 : vector<8x128xf32>
    %40 = vector.extract_strided_slice %22 {offsets = [0, 256], sizes = [8, 128], strides = [1, 1]} : vector<8x384xf32> to vector<8x128xf32>
    %41 = vector.extract_strided_slice %23 {offsets = [0, 256], sizes = [8, 128], strides = [1, 1]} : vector<8x384xf32> to vector<8x128xf32>
    %42 = arith.addf %41, %12 : vector<8x128xf32>
    %43 = arith.mulf %31, %42 : vector<8x128xf32>
    %44 = arith.addf %40, %43 : vector<8x128xf32>
    %45 = math.tanh %44 : vector<8x128xf32>
    %46 = arith.subf %20, %45 : vector<8x128xf32>
    %47 = arith.mulf %39, %46 : vector<8x128xf32>
    %48 = arith.addf %45, %47 : vector<8x128xf32>
    %c56 = arith.constant 56 : index
    %c384 = arith.constant 384 : index
    %49 = vector.load %arg8[%c56, %c384] : memref<64x768xf32, #tpu.memory_space<vmem>>, vector<8x384xf32>
    %50 = vector.extract_strided_slice %19 {offsets = [0, 384], sizes = [8, 384], strides = [1, 1]} : vector<8x768xf32> to vector<8x384xf32>
    %51 = vector.extract_strided_slice %49 {offsets = [0, 0], sizes = [8, 128], strides = [1, 1]} : vector<8x384xf32> to vector<8x128xf32>
    %52 = vector.extract_strided_slice %50 {offsets = [0, 0], sizes = [8, 128], strides = [1, 1]} : vector<8x384xf32> to vector<8x128xf32>
    %53 = arith.addf %51, %52 : vector<8x128xf32>
    %54 = arith.negf %53 : vector<8x128xf32>
    %55 = math.exp %54 : vector<8x128xf32>
    %cst_21 = arith.constant 1.000000e+00 : f32
    %56 = vector.broadcast %cst_21 : f32 to vector<8x128xf32>
    %57 = arith.addf %56, %55 : vector<8x128xf32>
    %58 = arith.divf %56, %57 : vector<8x128xf32>
    %59 = vector.extract_strided_slice %49 {offsets = [0, 128], sizes = [8, 128], strides = [1, 1]} : vector<8x384xf32> to vector<8x128xf32>
    %60 = vector.extract_strided_slice %50 {offsets = [0, 128], sizes = [8, 128], strides = [1, 1]} : vector<8x384xf32> to vector<8x128xf32>
    %61 = arith.addf %59, %60 : vector<8x128xf32>
    %62 = arith.negf %61 : vector<8x128xf32>
    %63 = math.exp %62 : vector<8x128xf32>
    %cst_22 = arith.constant 1.000000e+00 : f32
    %64 = vector.broadcast %cst_22 : f32 to vector<8x128xf32>
    %65 = arith.addf %64, %63 : vector<8x128xf32>
    %66 = arith.divf %64, %65 : vector<8x128xf32>
    %67 = vector.extract_strided_slice %49 {offsets = [0, 256], sizes = [8, 128], strides = [1, 1]} : vector<8x384xf32> to vector<8x128xf32>
    %68 = vector.extract_strided_slice %50 {offsets = [0, 256], sizes = [8, 128], strides = [1, 1]} : vector<8x384xf32> to vector<8x128xf32>
    %69 = arith.addf %68, %15 : vector<8x128xf32>
    %70 = arith.mulf %58, %69 : vector<8x128xf32>
    %71 = arith.addf %67, %70 : vector<8x128xf32>
    %72 = math.tanh %71 : vector<8x128xf32>
    %73 = arith.subf %21, %72 : vector<8x128xf32>
    %74 = arith.mulf %66, %73 : vector<8x128xf32>
    %75 = arith.addf %72, %74 : vector<8x128xf32>
    %76 = vector.extract_strided_slice %9 {offsets = [0, 0], sizes = [8, 128], strides = [1, 1]} : vector<64x128xi1> to vector<8x128xi1>
    %77 = vector.extract_strided_slice %9 {offsets = [56, 0], sizes = [8, 128], strides = [1, 1]} : vector<64x128xi1> to vector<8x128xi1>
    %cst_23 = arith.constant 0.000000e+00 : f32
    %78 = vector.broadcast %cst_23 : f32 to vector<8x128xf32>
    %79 = arith.select %76, %48, %78 : vector<8x128xi1>, vector<8x128xf32>
    %c0_24 = arith.constant 0 : index
    %c0_25 = arith.constant 0 : index
    %80 = vector.load %arg6[%c0_24, %c0_25] : memref<64x128xf32, #tpu.memory_space<vmem>>, vector<8x128xf32>
    tpu.vector_store %arg6[%c0_24, %c0_25], %79 {strides = array<i32>} : memref<64x128xf32, #tpu.memory_space<vmem>>, vector<8x128xf32>,
    %cst_26 = arith.constant 0.000000e+00 : f32
    %81 = vector.broadcast %cst_26 : f32 to vector<8x128xf32>
    %82 = arith.select %77, %75, %81 : vector<8x128xi1>, vector<8x128xf32>
    %c56_27 = arith.constant 56 : index
    %c0_28 = arith.constant 0 : index
    %83 = vector.load %arg9[%c56_27, %c0_28] : memref<64x128xf32, #tpu.memory_space<vmem>>, vector<8x128xf32>
    tpu.vector_store %arg9[%c56_27, %c0_28], %82 {strides = array<i32>} : memref<64x128xf32, #tpu.memory_space<vmem>>, vector<8x128xf32>,
    %84 = arith.select %76, %48, %20 : vector<8x128xi1>, vector<8x128xf32>
    %85 = arith.select %77, %75, %21 : vector<8x128xi1>, vector<8x128xf32>
    %86 = tpu.concatenate %84, %85 in 1 : vector<8x128xf32>, vector<8x128xf32> -> vector<8x256xf32>
    %87 = arith.truncf %86 : vector<8x256xf32> to vector<8x256xbf16>
    %cst_29 = arith.constant dense<0.000000e+00> : vector<8x768xf32>
    %88 = tpu.matmul %87, %16, %cst_29 {dimension_numbers = #tpu.dot_dimension_numbers<[1], [0], [0], [1], [0, 0, 1, 1], [], []>} : vector<8x256xbf16>, vector<256x768xbf16>, vector<8x768xf32> -> vector<8x768xf32>
    %89 = vector.extract_strided_slice %86 {offsets = [0, 0], sizes = [8, 128], strides = [1, 1]} : vector<8x256xf32> to vector<8x128xf32>
    %90 = vector.extract_strided_slice %86 {offsets = [0, 128], sizes = [8, 128], strides = [1, 1]} : vector<8x256xf32> to vector<8x128xf32>
    %c8 = arith.constant 8 : index
    %c0_30 = arith.constant 0 : index
    %91 = vector.load %arg8[%c8, %c0_30] : memref<64x768xf32, #tpu.memory_space<vmem>>, vector<8x384xf32>
    %92 = vector.extract_strided_slice %88 {offsets = [0, 0], sizes = [8, 384], strides = [1, 1]} : vector<8x768xf32> to vector<8x384xf32>
    %93 = vector.extract_strided_slice %91 {offsets = [0, 0], sizes = [8, 128], strides = [1, 1]} : vector<8x384xf32> to vector<8x128xf32>
    %94 = vector.extract_strided_slice %92 {offsets = [0, 0], sizes = [8, 128], strides = [1, 1]} : vector<8x384xf32> to vector<8x128xf32>
    %95 = arith.addf %93, %94 : vector<8x128xf32>
    %96 = arith.negf %95 : vector<8x128xf32>
    %97 = math.exp %96 : vector<8x128xf32>
    %cst_31 = arith.constant 1.000000e+00 : f32
    %98 = vector.broadcast %cst_31 : f32 to vector<8x128xf32>
    %99 = arith.addf %98, %97 : vector<8x128xf32>
    %100 = arith.divf %98, %99 : vector<8x128xf32>
    %101 = vector.extract_strided_slice %91 {offsets = [0, 128], sizes = [8, 128], strides = [1, 1]} : vector<8x384xf32> to vector<8x128xf32>
    %102 = vector.extract_strided_slice %92 {offsets = [0, 128], sizes = [8, 128], strides = [1, 1]} : vector<8x384xf32> to vector<8x128xf32>
    %103 = arith.addf %101, %102 : vector<8x128xf32>
    %104 = arith.negf %103 : vector<8x128xf32>
    %105 = math.exp %104 : vector<8x128xf32>
    %cst_32 = arith.constant 1.000000e+00 : f32
    %106 = vector.broadcast %cst_32 : f32 to vector<8x128xf32>
    %107 = arith.addf %106, %105 : vector<8x128xf32>
    %108 = arith.divf %106, %107 : vector<8x128xf32>
    %109 = vector.extract_strided_slice %91 {offsets = [0, 256], sizes = [8, 128], strides = [1, 1]} : vector<8x384xf32> to vector<8x128xf32>
    %110 = vector.extract_strided_slice %92 {offsets = [0, 256], sizes = [8, 128], strides = [1, 1]} : vector<8x384xf32> to vector<8x128xf32>
    %111 = arith.addf %110, %12 : vector<8x128xf32>
    %112 = arith.mulf %100, %111 : vector<8x128xf32>
    %113 = arith.addf %109, %112 : vector<8x128xf32>
    %114 = math.tanh %113 : vector<8x128xf32>
    %115 = arith.subf %89, %114 : vector<8x128xf32>
    %116 = arith.mulf %108, %115 : vector<8x128xf32>
    %117 = arith.addf %114, %116 : vector<8x128xf32>
    %c48 = arith.constant 48 : index
    %c384_33 = arith.constant 384 : index
    %118 = vector.load %arg8[%c48, %c384_33] : memref<64x768xf32, #tpu.memory_space<vmem>>, vector<8x384xf32>
    %119 = vector.extract_strided_slice %88 {offsets = [0, 384], sizes = [8, 384], strides = [1, 1]} : vector<8x768xf32> to vector<8x384xf32>
    %120 = vector.extract_strided_slice %118 {offsets = [0, 0], sizes = [8, 128], strides = [1, 1]} : vector<8x384xf32> to vector<8x128xf32>
    %121 = vector.extract_strided_slice %119 {offsets = [0, 0], sizes = [8, 128], strides = [1, 1]} : vector<8x384xf32> to vector<8x128xf32>
    %122 = arith.addf %120, %121 : vector<8x128xf32>
    %123 = arith.negf %122 : vector<8x128xf32>
    %124 = math.exp %123 : vector<8x128xf32>
    %cst_34 = arith.constant 1.000000e+00 : f32
    %125 = vector.broadcast %cst_34 : f32 to vector<8x128xf32>
    %126 = arith.addf %125, %124 : vector<8x128xf32>
    %127 = arith.divf %125, %126 : vector<8x128xf32>
    %128 = vector.extract_strided_slice %118 {offsets = [0, 128], sizes = [8, 128], strides = [1, 1]} : vector<8x384xf32> to vector<8x128xf32>
    %129 = vector.extract_strided_slice %119 {offsets = [0, 128], sizes = [8, 128], strides = [1, 1]} : vector<8x384xf32> to vector<8x128xf32>
    %130 = arith.addf %128, %129 : vector<8x128xf32>
    %131 = arith.negf %130 : vector<8x128xf32>
    %132 = math.exp %131 : vector<8x128xf32>
    %cst_35 = arith.constant 1.000000e+00 : f32
    %133 = vector.broadcast %cst_35 : f32 to vector<8x128xf32>
    %134 = arith.addf %133, %132 : vector<8x128xf32>
    %135 = arith.divf %133, %134 : vector<8x128xf32>
    %136 = vector.extract_strided_slice %118 {offsets = [0, 256], sizes = [8, 128], strides = [1, 1]} : vector<8x384xf32> to vector<8x128xf32>
    %137 = vector.extract_strided_slice %119 {offsets = [0, 256], sizes = [8, 128], strides = [1, 1]} : vector<8x384xf32> to vector<8x128xf32>
    %138 = arith.addf %137, %15 : vector<8x128xf32>
    %139 = arith.mulf %127, %138 : vector<8x128xf32>
    %140 = arith.addf %136, %139 : vector<8x128xf32>
    %141 = math.tanh %140 : vector<8x128xf32>
    %142 = arith.subf %90, %141 : vector<8x128xf32>
    %143 = arith.mulf %135, %142 : vector<8x128xf32>
    %144 = arith.addf %141, %143 : vector<8x128xf32>
    %145 = vector.extract_strided_slice %9 {offsets = [8, 0], sizes = [8, 128], strides = [1, 1]} : vector<64x128xi1> to vector<8x128xi1>
    %146 = vector.extract_strided_slice %9 {offsets = [48, 0], sizes = [8, 128], strides = [1, 1]} : vector<64x128xi1> to vector<8x128xi1>
    %cst_36 = arith.constant 0.000000e+00 : f32
    %147 = vector.broadcast %cst_36 : f32 to vector<8x128xf32>
    %148 = arith.select %145, %117, %147 : vector<8x128xi1>, vector<8x128xf32>
    %c8_37 = arith.constant 8 : index
    %c0_38 = arith.constant 0 : index
    %149 = vector.load %arg6[%c8_37, %c0_38] : memref<64x128xf32, #tpu.memory_space<vmem>>, vector<8x128xf32>
    tpu.vector_store %arg6[%c8_37, %c0_38], %148 {strides = array<i32>} : memref<64x128xf32, #tpu.memory_space<vmem>>, vector<8x128xf32>,
    %cst_39 = arith.constant 0.000000e+00 : f32
    %150 = vector.broadcast %cst_39 : f32 to vector<8x128xf32>
    %151 = arith.select %146, %144, %150 : vector<8x128xi1>, vector<8x128xf32>
    %c48_40 = arith.constant 48 : index
    %c0_41 = arith.constant 0 : index
    %152 = vector.load %arg9[%c48_40, %c0_41] : memref<64x128xf32, #tpu.memory_space<vmem>>, vector<8x128xf32>
    tpu.vector_store %arg9[%c48_40, %c0_41], %151 {strides = array<i32>} : memref<64x128xf32, #tpu.memory_space<vmem>>, vector<8x128xf32>,
    %153 = arith.select %145, %117, %89 : vector<8x128xi1>, vector<8x128xf32>
    %154 = arith.select %146, %144, %90 : vector<8x128xi1>, vector<8x128xf32>
    %155 = tpu.concatenate %153, %154 in 1 : vector<8x128xf32>, vector<8x128xf32> -> vector<8x256xf32>
    %156 = arith.truncf %155 : vector<8x256xf32> to vector<8x256xbf16>
    %cst_42 = arith.constant dense<0.000000e+00> : vector<8x768xf32>
    %157 = tpu.matmul %156, %16, %cst_42 {dimension_numbers = #tpu.dot_dimension_numbers<[1], [0], [0], [1], [0, 0, 1, 1], [], []>} : vector<8x256xbf16>, vector<256x768xbf16>, vector<8x768xf32> -> vector<8x768xf32>
    %158 = vector.extract_strided_slice %155 {offsets = [0, 0], sizes = [8, 128], strides = [1, 1]} : vector<8x256xf32> to vector<8x128xf32>
    %159 = vector.extract_strided_slice %155 {offsets = [0, 128], sizes = [8, 128], strides = [1, 1]} : vector<8x256xf32> to vector<8x128xf32>
    %c16 = arith.constant 16 : index
    %c0_43 = arith.constant 0 : index
    %160 = vector.load %arg8[%c16, %c0_43] : memref<64x768xf32, #tpu.memory_space<vmem>>, vector<8x384xf32>
    %161 = vector.extract_strided_slice %157 {offsets = [0, 0], sizes = [8, 384], strides = [1, 1]} : vector<8x768xf32> to vector<8x384xf32>
    %162 = vector.extract_strided_slice %160 {offsets = [0, 0], sizes = [8, 128], strides = [1, 1]} : vector<8x384xf32> to vector<8x128xf32>
    %163 = vector.extract_strided_slice %161 {offsets = [0, 0], sizes = [8, 128], strides = [1, 1]} : vector<8x384xf32> to vector<8x128xf32>
    %164 = arith.addf %162, %163 : vector<8x128xf32>
    %165 = arith.negf %164 : vector<8x128xf32>
    %166 = math.exp %165 : vector<8x128xf32>
    %cst_44 = arith.constant 1.000000e+00 : f32
    %167 = vector.broadcast %cst_44 : f32 to vector<8x128xf32>
    %168 = arith.addf %167, %166 : vector<8x128xf32>
    %169 = arith.divf %167, %168 : vector<8x128xf32>
    %170 = vector.extract_strided_slice %160 {offsets = [0, 128], sizes = [8, 128], strides = [1, 1]} : vector<8x384xf32> to vector<8x128xf32>
    %171 = vector.extract_strided_slice %161 {offsets = [0, 128], sizes = [8, 128], strides = [1, 1]} : vector<8x384xf32> to vector<8x128xf32>
    %172 = arith.addf %170, %171 : vector<8x128xf32>
    %173 = arith.negf %172 : vector<8x128xf32>
    %174 = math.exp %173 : vector<8x128xf32>
    %cst_45 = arith.constant 1.000000e+00 : f32
    %175 = vector.broadcast %cst_45 : f32 to vector<8x128xf32>
    %176 = arith.addf %175, %174 : vector<8x128xf32>
    %177 = arith.divf %175, %176 : vector<8x128xf32>
    %178 = vector.extract_strided_slice %160 {offsets = [0, 256], sizes = [8, 128], strides = [1, 1]} : vector<8x384xf32> to vector<8x128xf32>
    %179 = vector.extract_strided_slice %161 {offsets = [0, 256], sizes = [8, 128], strides = [1, 1]} : vector<8x384xf32> to vector<8x128xf32>
    %180 = arith.addf %179, %12 : vector<8x128xf32>
    %181 = arith.mulf %169, %180 : vector<8x128xf32>
    %182 = arith.addf %178, %181 : vector<8x128xf32>
    %183 = math.tanh %182 : vector<8x128xf32>
    %184 = arith.subf %158, %183 : vector<8x128xf32>
    %185 = arith.mulf %177, %184 : vector<8x128xf32>
    %186 = arith.addf %183, %185 : vector<8x128xf32>
    %c40 = arith.constant 40 : index
    %c384_46 = arith.constant 384 : index
    %187 = vector.load %arg8[%c40, %c384_46] : memref<64x768xf32, #tpu.memory_space<vmem>>, vector<8x384xf32>
    %188 = vector.extract_strided_slice %157 {offsets = [0, 384], sizes = [8, 384], strides = [1, 1]} : vector<8x768xf32> to vector<8x384xf32>
    %189 = vector.extract_strided_slice %187 {offsets = [0, 0], sizes = [8, 128], strides = [1, 1]} : vector<8x384xf32> to vector<8x128xf32>
    %190 = vector.extract_strided_slice %188 {offsets = [0, 0], sizes = [8, 128], strides = [1, 1]} : vector<8x384xf32> to vector<8x128xf32>
    %191 = arith.addf %189, %190 : vector<8x128xf32>
    %192 = arith.negf %191 : vector<8x128xf32>
    %193 = math.exp %192 : vector<8x128xf32>
    %cst_47 = arith.constant 1.000000e+00 : f32
    %194 = vector.broadcast %cst_47 : f32 to vector<8x128xf32>
    %195 = arith.addf %194, %193 : vector<8x128xf32>
    %196 = arith.divf %194, %195 : vector<8x128xf32>
    %197 = vector.extract_strided_slice %187 {offsets = [0, 128], sizes = [8, 128], strides = [1, 1]} : vector<8x384xf32> to vector<8x128xf32>
    %198 = vector.extract_strided_slice %188 {offsets = [0, 128], sizes = [8, 128], strides = [1, 1]} : vector<8x384xf32> to vector<8x128xf32>
    %199 = arith.addf %197, %198 : vector<8x128xf32>
    %200 = arith.negf %199 : vector<8x128xf32>
    %201 = math.exp %200 : vector<8x128xf32>
    %cst_48 = arith.constant 1.000000e+00 : f32
    %202 = vector.broadcast %cst_48 : f32 to vector<8x128xf32>
    %203 = arith.addf %202, %201 : vector<8x128xf32>
    %204 = arith.divf %202, %203 : vector<8x128xf32>
    %205 = vector.extract_strided_slice %187 {offsets = [0, 256], sizes = [8, 128], strides = [1, 1]} : vector<8x384xf32> to vector<8x128xf32>
    %206 = vector.extract_strided_slice %188 {offsets = [0, 256], sizes = [8, 128], strides = [1, 1]} : vector<8x384xf32> to vector<8x128xf32>
    %207 = arith.addf %206, %15 : vector<8x128xf32>
    %208 = arith.mulf %196, %207 : vector<8x128xf32>
    %209 = arith.addf %205, %208 : vector<8x128xf32>
    %210 = math.tanh %209 : vector<8x128xf32>
    %211 = arith.subf %159, %210 : vector<8x128xf32>
    %212 = arith.mulf %204, %211 : vector<8x128xf32>
    %213 = arith.addf %210, %212 : vector<8x128xf32>
    %214 = vector.extract_strided_slice %9 {offsets = [16, 0], sizes = [8, 128], strides = [1, 1]} : vector<64x128xi1> to vector<8x128xi1>
    %215 = vector.extract_strided_slice %9 {offsets = [40, 0], sizes = [8, 128], strides = [1, 1]} : vector<64x128xi1> to vector<8x128xi1>
    %cst_49 = arith.constant 0.000000e+00 : f32
    %216 = vector.broadcast %cst_49 : f32 to vector<8x128xf32>
    %217 = arith.select %214, %186, %216 : vector<8x128xi1>, vector<8x128xf32>
    %c16_50 = arith.constant 16 : index
    %c0_51 = arith.constant 0 : index
    %218 = vector.load %arg6[%c16_50, %c0_51] : memref<64x128xf32, #tpu.memory_space<vmem>>, vector<8x128xf32>
    tpu.vector_store %arg6[%c16_50, %c0_51], %217 {strides = array<i32>} : memref<64x128xf32, #tpu.memory_space<vmem>>, vector<8x128xf32>,
    %cst_52 = arith.constant 0.000000e+00 : f32
    %219 = vector.broadcast %cst_52 : f32 to vector<8x128xf32>
    %220 = arith.select %215, %213, %219 : vector<8x128xi1>, vector<8x128xf32>
    %c40_53 = arith.constant 40 : index
    %c0_54 = arith.constant 0 : index
    %221 = vector.load %arg9[%c40_53, %c0_54] : memref<64x128xf32, #tpu.memory_space<vmem>>, vector<8x128xf32>
    tpu.vector_store %arg9[%c40_53, %c0_54], %220 {strides = array<i32>} : memref<64x128xf32, #tpu.memory_space<vmem>>, vector<8x128xf32>,
    %222 = arith.select %214, %186, %158 : vector<8x128xi1>, vector<8x128xf32>
    %223 = arith.select %215, %213, %159 : vector<8x128xi1>, vector<8x128xf32>
    %224 = tpu.concatenate %222, %223 in 1 : vector<8x128xf32>, vector<8x128xf32> -> vector<8x256xf32>
    %225 = arith.truncf %224 : vector<8x256xf32> to vector<8x256xbf16>
    %cst_55 = arith.constant dense<0.000000e+00> : vector<8x768xf32>
    %226 = tpu.matmul %225, %16, %cst_55 {dimension_numbers = #tpu.dot_dimension_numbers<[1], [0], [0], [1], [0, 0, 1, 1], [], []>} : vector<8x256xbf16>, vector<256x768xbf16>, vector<8x768xf32> -> vector<8x768xf32>
    %227 = vector.extract_strided_slice %224 {offsets = [0, 0], sizes = [8, 128], strides = [1, 1]} : vector<8x256xf32> to vector<8x128xf32>
    %228 = vector.extract_strided_slice %224 {offsets = [0, 128], sizes = [8, 128], strides = [1, 1]} : vector<8x256xf32> to vector<8x128xf32>
    %c24 = arith.constant 24 : index
    %c0_56 = arith.constant 0 : index
    %229 = vector.load %arg8[%c24, %c0_56] : memref<64x768xf32, #tpu.memory_space<vmem>>, vector<8x384xf32>
    %230 = vector.extract_strided_slice %226 {offsets = [0, 0], sizes = [8, 384], strides = [1, 1]} : vector<8x768xf32> to vector<8x384xf32>
    %231 = vector.extract_strided_slice %229 {offsets = [0, 0], sizes = [8, 128], strides = [1, 1]} : vector<8x384xf32> to vector<8x128xf32>
    %232 = vector.extract_strided_slice %230 {offsets = [0, 0], sizes = [8, 128], strides = [1, 1]} : vector<8x384xf32> to vector<8x128xf32>
    %233 = arith.addf %231, %232 : vector<8x128xf32>
    %234 = arith.negf %233 : vector<8x128xf32>
    %235 = math.exp %234 : vector<8x128xf32>
    %cst_57 = arith.constant 1.000000e+00 : f32
    %236 = vector.broadcast %cst_57 : f32 to vector<8x128xf32>
    %237 = arith.addf %236, %235 : vector<8x128xf32>
    %238 = arith.divf %236, %237 : vector<8x128xf32>
    %239 = vector.extract_strided_slice %229 {offsets = [0, 128], sizes = [8, 128], strides = [1, 1]} : vector<8x384xf32> to vector<8x128xf32>
    %240 = vector.extract_strided_slice %230 {offsets = [0, 128], sizes = [8, 128], strides = [1, 1]} : vector<8x384xf32> to vector<8x128xf32>
    %241 = arith.addf %239, %240 : vector<8x128xf32>
    %242 = arith.negf %241 : vector<8x128xf32>
    %243 = math.exp %242 : vector<8x128xf32>
    %cst_58 = arith.constant 1.000000e+00 : f32
    %244 = vector.broadcast %cst_58 : f32 to vector<8x128xf32>
    %245 = arith.addf %244, %243 : vector<8x128xf32>
    %246 = arith.divf %244, %245 : vector<8x128xf32>
    %247 = vector.extract_strided_slice %229 {offsets = [0, 256], sizes = [8, 128], strides = [1, 1]} : vector<8x384xf32> to vector<8x128xf32>
    %248 = vector.extract_strided_slice %230 {offsets = [0, 256], sizes = [8, 128], strides = [1, 1]} : vector<8x384xf32> to vector<8x128xf32>
    %249 = arith.addf %248, %12 : vector<8x128xf32>
    %250 = arith.mulf %238, %249 : vector<8x128xf32>
    %251 = arith.addf %247, %250 : vector<8x128xf32>
    %252 = math.tanh %251 : vector<8x128xf32>
    %253 = arith.subf %227, %252 : vector<8x128xf32>
    %254 = arith.mulf %246, %253 : vector<8x128xf32>
    %255 = arith.addf %252, %254 : vector<8x128xf32>
    %c32 = arith.constant 32 : index
    %c384_59 = arith.constant 384 : index
    %256 = vector.load %arg8[%c32, %c384_59] : memref<64x768xf32, #tpu.memory_space<vmem>>, vector<8x384xf32>
    %257 = vector.extract_strided_slice %226 {offsets = [0, 384], sizes = [8, 384], strides = [1, 1]} : vector<8x768xf32> to vector<8x384xf32>
    %258 = vector.extract_strided_slice %256 {offsets = [0, 0], sizes = [8, 128], strides = [1, 1]} : vector<8x384xf32> to vector<8x128xf32>
    %259 = vector.extract_strided_slice %257 {offsets = [0, 0], sizes = [8, 128], strides = [1, 1]} : vector<8x384xf32> to vector<8x128xf32>
    %260 = arith.addf %258, %259 : vector<8x128xf32>
    %261 = arith.negf %260 : vector<8x128xf32>
    %262 = math.exp %261 : vector<8x128xf32>
    %cst_60 = arith.constant 1.000000e+00 : f32
    %263 = vector.broadcast %cst_60 : f32 to vector<8x128xf32>
    %264 = arith.addf %263, %262 : vector<8x128xf32>
    %265 = arith.divf %263, %264 : vector<8x128xf32>
    %266 = vector.extract_strided_slice %256 {offsets = [0, 128], sizes = [8, 128], strides = [1, 1]} : vector<8x384xf32> to vector<8x128xf32>
    %267 = vector.extract_strided_slice %257 {offsets = [0, 128], sizes = [8, 128], strides = [1, 1]} : vector<8x384xf32> to vector<8x128xf32>
    %268 = arith.addf %266, %267 : vector<8x128xf32>
    %269 = arith.negf %268 : vector<8x128xf32>
    %270 = math.exp %269 : vector<8x128xf32>
    %cst_61 = arith.constant 1.000000e+00 : f32
    %271 = vector.broadcast %cst_61 : f32 to vector<8x128xf32>
    %272 = arith.addf %271, %270 : vector<8x128xf32>
    %273 = arith.divf %271, %272 : vector<8x128xf32>
    %274 = vector.extract_strided_slice %256 {offsets = [0, 256], sizes = [8, 128], strides = [1, 1]} : vector<8x384xf32> to vector<8x128xf32>
    %275 = vector.extract_strided_slice %257 {offsets = [0, 256], sizes = [8, 128], strides = [1, 1]} : vector<8x384xf32> to vector<8x128xf32>
    %276 = arith.addf %275, %15 : vector<8x128xf32>
    %277 = arith.mulf %265, %276 : vector<8x128xf32>
    %278 = arith.addf %274, %277 : vector<8x128xf32>
    %279 = math.tanh %278 : vector<8x128xf32>
    %280 = arith.subf %228, %279 : vector<8x128xf32>
    %281 = arith.mulf %273, %280 : vector<8x128xf32>
    %282 = arith.addf %279, %281 : vector<8x128xf32>
    %283 = vector.extract_strided_slice %9 {offsets = [24, 0], sizes = [8, 128], strides = [1, 1]} : vector<64x128xi1> to vector<8x128xi1>
    %284 = vector.extract_strided_slice %9 {offsets = [32, 0], sizes = [8, 128], strides = [1, 1]} : vector<64x128xi1> to vector<8x128xi1>
    %cst_62 = arith.constant 0.000000e+00 : f32
    %285 = vector.broadcast %cst_62 : f32 to vector<8x128xf32>
    %286 = arith.select %283, %255, %285 : vector<8x128xi1>, vector<8x128xf32>
    %c24_63 = arith.constant 24 : index
    %c0_64 = arith.constant 0 : index
    %287 = vector.load %arg6[%c24_63, %c0_64] : memref<64x128xf32, #tpu.memory_space<vmem>>, vector<8x128xf32>
    tpu.vector_store %arg6[%c24_63, %c0_64], %286 {strides = array<i32>} : memref<64x128xf32, #tpu.memory_space<vmem>>, vector<8x128xf32>,
    %cst_65 = arith.constant 0.000000e+00 : f32
    %288 = vector.broadcast %cst_65 : f32 to vector<8x128xf32>
    %289 = arith.select %284, %282, %288 : vector<8x128xi1>, vector<8x128xf32>
    %c32_66 = arith.constant 32 : index
    %c0_67 = arith.constant 0 : index
    %290 = vector.load %arg9[%c32_66, %c0_67] : memref<64x128xf32, #tpu.memory_space<vmem>>, vector<8x128xf32>
    tpu.vector_store %arg9[%c32_66, %c0_67], %289 {strides = array<i32>} : memref<64x128xf32, #tpu.memory_space<vmem>>, vector<8x128xf32>,
    %291 = arith.select %283, %255, %227 : vector<8x128xi1>, vector<8x128xf32>
    %292 = arith.select %284, %282, %228 : vector<8x128xi1>, vector<8x128xf32>
    %293 = tpu.concatenate %291, %292 in 1 : vector<8x128xf32>, vector<8x128xf32> -> vector<8x256xf32>
    %294 = arith.truncf %293 : vector<8x256xf32> to vector<8x256xbf16>
    %cst_68 = arith.constant dense<0.000000e+00> : vector<8x768xf32>
    %295 = tpu.matmul %294, %16, %cst_68 {dimension_numbers = #tpu.dot_dimension_numbers<[1], [0], [0], [1], [0, 0, 1, 1], [], []>} : vector<8x256xbf16>, vector<256x768xbf16>, vector<8x768xf32> -> vector<8x768xf32>
    %296 = vector.extract_strided_slice %293 {offsets = [0, 0], sizes = [8, 128], strides = [1, 1]} : vector<8x256xf32> to vector<8x128xf32>
    %297 = vector.extract_strided_slice %293 {offsets = [0, 128], sizes = [8, 128], strides = [1, 1]} : vector<8x256xf32> to vector<8x128xf32>
    %c32_69 = arith.constant 32 : index
    %c0_70 = arith.constant 0 : index
    %298 = vector.load %arg8[%c32_69, %c0_70] : memref<64x768xf32, #tpu.memory_space<vmem>>, vector<8x384xf32>
    %299 = vector.extract_strided_slice %295 {offsets = [0, 0], sizes = [8, 384], strides = [1, 1]} : vector<8x768xf32> to vector<8x384xf32>
    %300 = vector.extract_strided_slice %298 {offsets = [0, 0], sizes = [8, 128], strides = [1, 1]} : vector<8x384xf32> to vector<8x128xf32>
    %301 = vector.extract_strided_slice %299 {offsets = [0, 0], sizes = [8, 128], strides = [1, 1]} : vector<8x384xf32> to vector<8x128xf32>
    %302 = arith.addf %300, %301 : vector<8x128xf32>
    %303 = arith.negf %302 : vector<8x128xf32>
    %304 = math.exp %303 : vector<8x128xf32>
    %cst_71 = arith.constant 1.000000e+00 : f32
    %305 = vector.broadcast %cst_71 : f32 to vector<8x128xf32>
    %306 = arith.addf %305, %304 : vector<8x128xf32>
    %307 = arith.divf %305, %306 : vector<8x128xf32>
    %308 = vector.extract_strided_slice %298 {offsets = [0, 128], sizes = [8, 128], strides = [1, 1]} : vector<8x384xf32> to vector<8x128xf32>
    %309 = vector.extract_strided_slice %299 {offsets = [0, 128], sizes = [8, 128], strides = [1, 1]} : vector<8x384xf32> to vector<8x128xf32>
    %310 = arith.addf %308, %309 : vector<8x128xf32>
    %311 = arith.negf %310 : vector<8x128xf32>
    %312 = math.exp %311 : vector<8x128xf32>
    %cst_72 = arith.constant 1.000000e+00 : f32
    %313 = vector.broadcast %cst_72 : f32 to vector<8x128xf32>
    %314 = arith.addf %313, %312 : vector<8x128xf32>
    %315 = arith.divf %313, %314 : vector<8x128xf32>
    %316 = vector.extract_strided_slice %298 {offsets = [0, 256], sizes = [8, 128], strides = [1, 1]} : vector<8x384xf32> to vector<8x128xf32>
    %317 = vector.extract_strided_slice %299 {offsets = [0, 256], sizes = [8, 128], strides = [1, 1]} : vector<8x384xf32> to vector<8x128xf32>
    %318 = arith.addf %317, %12 : vector<8x128xf32>
    %319 = arith.mulf %307, %318 : vector<8x128xf32>
    %320 = arith.addf %316, %319 : vector<8x128xf32>
    %321 = math.tanh %320 : vector<8x128xf32>
    %322 = arith.subf %296, %321 : vector<8x128xf32>
    %323 = arith.mulf %315, %322 : vector<8x128xf32>
    %324 = arith.addf %321, %323 : vector<8x128xf32>
    %c24_73 = arith.constant 24 : index
    %c384_74 = arith.constant 384 : index
    %325 = vector.load %arg8[%c24_73, %c384_74] : memref<64x768xf32, #tpu.memory_space<vmem>>, vector<8x384xf32>
    %326 = vector.extract_strided_slice %295 {offsets = [0, 384], sizes = [8, 384], strides = [1, 1]} : vector<8x768xf32> to vector<8x384xf32>
    %327 = vector.extract_strided_slice %325 {offsets = [0, 0], sizes = [8, 128], strides = [1, 1]} : vector<8x384xf32> to vector<8x128xf32>
    %328 = vector.extract_strided_slice %326 {offsets = [0, 0], sizes = [8, 128], strides = [1, 1]} : vector<8x384xf32> to vector<8x128xf32>
    %329 = arith.addf %327, %328 : vector<8x128xf32>
    %330 = arith.negf %329 : vector<8x128xf32>
    %331 = math.exp %330 : vector<8x128xf32>
    %cst_75 = arith.constant 1.000000e+00 : f32
    %332 = vector.broadcast %cst_75 : f32 to vector<8x128xf32>
    %333 = arith.addf %332, %331 : vector<8x128xf32>
    %334 = arith.divf %332, %333 : vector<8x128xf32>
    %335 = vector.extract_strided_slice %325 {offsets = [0, 128], sizes = [8, 128], strides = [1, 1]} : vector<8x384xf32> to vector<8x128xf32>
    %336 = vector.extract_strided_slice %326 {offsets = [0, 128], sizes = [8, 128], strides = [1, 1]} : vector<8x384xf32> to vector<8x128xf32>
    %337 = arith.addf %335, %336 : vector<8x128xf32>
    %338 = arith.negf %337 : vector<8x128xf32>
    %339 = math.exp %338 : vector<8x128xf32>
    %cst_76 = arith.constant 1.000000e+00 : f32
    %340 = vector.broadcast %cst_76 : f32 to vector<8x128xf32>
    %341 = arith.addf %340, %339 : vector<8x128xf32>
    %342 = arith.divf %340, %341 : vector<8x128xf32>
    %343 = vector.extract_strided_slice %325 {offsets = [0, 256], sizes = [8, 128], strides = [1, 1]} : vector<8x384xf32> to vector<8x128xf32>
    %344 = vector.extract_strided_slice %326 {offsets = [0, 256], sizes = [8, 128], strides = [1, 1]} : vector<8x384xf32> to vector<8x128xf32>
    %345 = arith.addf %344, %15 : vector<8x128xf32>
    %346 = arith.mulf %334, %345 : vector<8x128xf32>
    %347 = arith.addf %343, %346 : vector<8x128xf32>
    %348 = math.tanh %347 : vector<8x128xf32>
    %349 = arith.subf %297, %348 : vector<8x128xf32>
    %350 = arith.mulf %342, %349 : vector<8x128xf32>
    %351 = arith.addf %348, %350 : vector<8x128xf32>
    %352 = vector.extract_strided_slice %9 {offsets = [32, 0], sizes = [8, 128], strides = [1, 1]} : vector<64x128xi1> to vector<8x128xi1>
    %353 = vector.extract_strided_slice %9 {offsets = [24, 0], sizes = [8, 128], strides = [1, 1]} : vector<64x128xi1> to vector<8x128xi1>
    %cst_77 = arith.constant 0.000000e+00 : f32
    %354 = vector.broadcast %cst_77 : f32 to vector<8x128xf32>
    %355 = arith.select %352, %324, %354 : vector<8x128xi1>, vector<8x128xf32>
    %c32_78 = arith.constant 32 : index
    %c0_79 = arith.constant 0 : index
    %356 = vector.load %arg6[%c32_78, %c0_79] : memref<64x128xf32, #tpu.memory_space<vmem>>, vector<8x128xf32>
    tpu.vector_store %arg6[%c32_78, %c0_79], %355 {strides = array<i32>} : memref<64x128xf32, #tpu.memory_space<vmem>>, vector<8x128xf32>,
    %cst_80 = arith.constant 0.000000e+00 : f32
    %357 = vector.broadcast %cst_80 : f32 to vector<8x128xf32>
    %358 = arith.select %353, %351, %357 : vector<8x128xi1>, vector<8x128xf32>
    %c24_81 = arith.constant 24 : index
    %c0_82 = arith.constant 0 : index
    %359 = vector.load %arg9[%c24_81, %c0_82] : memref<64x128xf32, #tpu.memory_space<vmem>>, vector<8x128xf32>
    tpu.vector_store %arg9[%c24_81, %c0_82], %358 {strides = array<i32>} : memref<64x128xf32, #tpu.memory_space<vmem>>, vector<8x128xf32>,
    %360 = arith.select %352, %324, %296 : vector<8x128xi1>, vector<8x128xf32>
    %361 = arith.select %353, %351, %297 : vector<8x128xi1>, vector<8x128xf32>
    %362 = tpu.concatenate %360, %361 in 1 : vector<8x128xf32>, vector<8x128xf32> -> vector<8x256xf32>
    %363 = arith.truncf %362 : vector<8x256xf32> to vector<8x256xbf16>
    %cst_83 = arith.constant dense<0.000000e+00> : vector<8x768xf32>
    %364 = tpu.matmul %363, %16, %cst_83 {dimension_numbers = #tpu.dot_dimension_numbers<[1], [0], [0], [1], [0, 0, 1, 1], [], []>} : vector<8x256xbf16>, vector<256x768xbf16>, vector<8x768xf32> -> vector<8x768xf32>
    %365 = vector.extract_strided_slice %362 {offsets = [0, 0], sizes = [8, 128], strides = [1, 1]} : vector<8x256xf32> to vector<8x128xf32>
    %366 = vector.extract_strided_slice %362 {offsets = [0, 128], sizes = [8, 128], strides = [1, 1]} : vector<8x256xf32> to vector<8x128xf32>
    %c40_84 = arith.constant 40 : index
    %c0_85 = arith.constant 0 : index
    %367 = vector.load %arg8[%c40_84, %c0_85] : memref<64x768xf32, #tpu.memory_space<vmem>>, vector<8x384xf32>
    %368 = vector.extract_strided_slice %364 {offsets = [0, 0], sizes = [8, 384], strides = [1, 1]} : vector<8x768xf32> to vector<8x384xf32>
    %369 = vector.extract_strided_slice %367 {offsets = [0, 0], sizes = [8, 128], strides = [1, 1]} : vector<8x384xf32> to vector<8x128xf32>
    %370 = vector.extract_strided_slice %368 {offsets = [0, 0], sizes = [8, 128], strides = [1, 1]} : vector<8x384xf32> to vector<8x128xf32>
    %371 = arith.addf %369, %370 : vector<8x128xf32>
    %372 = arith.negf %371 : vector<8x128xf32>
    %373 = math.exp %372 : vector<8x128xf32>
    %cst_86 = arith.constant 1.000000e+00 : f32
    %374 = vector.broadcast %cst_86 : f32 to vector<8x128xf32>
    %375 = arith.addf %374, %373 : vector<8x128xf32>
    %376 = arith.divf %374, %375 : vector<8x128xf32>
    %377 = vector.extract_strided_slice %367 {offsets = [0, 128], sizes = [8, 128], strides = [1, 1]} : vector<8x384xf32> to vector<8x128xf32>
    %378 = vector.extract_strided_slice %368 {offsets = [0, 128], sizes = [8, 128], strides = [1, 1]} : vector<8x384xf32> to vector<8x128xf32>
    %379 = arith.addf %377, %378 : vector<8x128xf32>
    %380 = arith.negf %379 : vector<8x128xf32>
    %381 = math.exp %380 : vector<8x128xf32>
    %cst_87 = arith.constant 1.000000e+00 : f32
    %382 = vector.broadcast %cst_87 : f32 to vector<8x128xf32>
    %383 = arith.addf %382, %381 : vector<8x128xf32>
    %384 = arith.divf %382, %383 : vector<8x128xf32>
    %385 = vector.extract_strided_slice %367 {offsets = [0, 256], sizes = [8, 128], strides = [1, 1]} : vector<8x384xf32> to vector<8x128xf32>
    %386 = vector.extract_strided_slice %368 {offsets = [0, 256], sizes = [8, 128], strides = [1, 1]} : vector<8x384xf32> to vector<8x128xf32>
    %387 = arith.addf %386, %12 : vector<8x128xf32>
    %388 = arith.mulf %376, %387 : vector<8x128xf32>
    %389 = arith.addf %385, %388 : vector<8x128xf32>
    %390 = math.tanh %389 : vector<8x128xf32>
    %391 = arith.subf %365, %390 : vector<8x128xf32>
    %392 = arith.mulf %384, %391 : vector<8x128xf32>
    %393 = arith.addf %390, %392 : vector<8x128xf32>
    %c16_88 = arith.constant 16 : index
    %c384_89 = arith.constant 384 : index
    %394 = vector.load %arg8[%c16_88, %c384_89] : memref<64x768xf32, #tpu.memory_space<vmem>>, vector<8x384xf32>
    %395 = vector.extract_strided_slice %364 {offsets = [0, 384], sizes = [8, 384], strides = [1, 1]} : vector<8x768xf32> to vector<8x384xf32>
    %396 = vector.extract_strided_slice %394 {offsets = [0, 0], sizes = [8, 128], strides = [1, 1]} : vector<8x384xf32> to vector<8x128xf32>
    %397 = vector.extract_strided_slice %395 {offsets = [0, 0], sizes = [8, 128], strides = [1, 1]} : vector<8x384xf32> to vector<8x128xf32>
    %398 = arith.addf %396, %397 : vector<8x128xf32>
    %399 = arith.negf %398 : vector<8x128xf32>
    %400 = math.exp %399 : vector<8x128xf32>
    %cst_90 = arith.constant 1.000000e+00 : f32
    %401 = vector.broadcast %cst_90 : f32 to vector<8x128xf32>
    %402 = arith.addf %401, %400 : vector<8x128xf32>
    %403 = arith.divf %401, %402 : vector<8x128xf32>
    %404 = vector.extract_strided_slice %394 {offsets = [0, 128], sizes = [8, 128], strides = [1, 1]} : vector<8x384xf32> to vector<8x128xf32>
    %405 = vector.extract_strided_slice %395 {offsets = [0, 128], sizes = [8, 128], strides = [1, 1]} : vector<8x384xf32> to vector<8x128xf32>
    %406 = arith.addf %404, %405 : vector<8x128xf32>
    %407 = arith.negf %406 : vector<8x128xf32>
    %408 = math.exp %407 : vector<8x128xf32>
    %cst_91 = arith.constant 1.000000e+00 : f32
    %409 = vector.broadcast %cst_91 : f32 to vector<8x128xf32>
    %410 = arith.addf %409, %408 : vector<8x128xf32>
    %411 = arith.divf %409, %410 : vector<8x128xf32>
    %412 = vector.extract_strided_slice %394 {offsets = [0, 256], sizes = [8, 128], strides = [1, 1]} : vector<8x384xf32> to vector<8x128xf32>
    %413 = vector.extract_strided_slice %395 {offsets = [0, 256], sizes = [8, 128], strides = [1, 1]} : vector<8x384xf32> to vector<8x128xf32>
    %414 = arith.addf %413, %15 : vector<8x128xf32>
    %415 = arith.mulf %403, %414 : vector<8x128xf32>
    %416 = arith.addf %412, %415 : vector<8x128xf32>
    %417 = math.tanh %416 : vector<8x128xf32>
    %418 = arith.subf %366, %417 : vector<8x128xf32>
    %419 = arith.mulf %411, %418 : vector<8x128xf32>
    %420 = arith.addf %417, %419 : vector<8x128xf32>
    %421 = vector.extract_strided_slice %9 {offsets = [40, 0], sizes = [8, 128], strides = [1, 1]} : vector<64x128xi1> to vector<8x128xi1>
    %422 = vector.extract_strided_slice %9 {offsets = [16, 0], sizes = [8, 128], strides = [1, 1]} : vector<64x128xi1> to vector<8x128xi1>
    %cst_92 = arith.constant 0.000000e+00 : f32
    %423 = vector.broadcast %cst_92 : f32 to vector<8x128xf32>
    %424 = arith.select %421, %393, %423 : vector<8x128xi1>, vector<8x128xf32>
    %c40_93 = arith.constant 40 : index
    %c0_94 = arith.constant 0 : index
    %425 = vector.load %arg6[%c40_93, %c0_94] : memref<64x128xf32, #tpu.memory_space<vmem>>, vector<8x128xf32>
    tpu.vector_store %arg6[%c40_93, %c0_94], %424 {strides = array<i32>} : memref<64x128xf32, #tpu.memory_space<vmem>>, vector<8x128xf32>,
    %cst_95 = arith.constant 0.000000e+00 : f32
    %426 = vector.broadcast %cst_95 : f32 to vector<8x128xf32>
    %427 = arith.select %422, %420, %426 : vector<8x128xi1>, vector<8x128xf32>
    %c16_96 = arith.constant 16 : index
    %c0_97 = arith.constant 0 : index
    %428 = vector.load %arg9[%c16_96, %c0_97] : memref<64x128xf32, #tpu.memory_space<vmem>>, vector<8x128xf32>
    tpu.vector_store %arg9[%c16_96, %c0_97], %427 {strides = array<i32>} : memref<64x128xf32, #tpu.memory_space<vmem>>, vector<8x128xf32>,
    %429 = arith.select %421, %393, %365 : vector<8x128xi1>, vector<8x128xf32>
    %430 = arith.select %422, %420, %366 : vector<8x128xi1>, vector<8x128xf32>
    %431 = tpu.concatenate %429, %430 in 1 : vector<8x128xf32>, vector<8x128xf32> -> vector<8x256xf32>
    %432 = arith.truncf %431 : vector<8x256xf32> to vector<8x256xbf16>
    %cst_98 = arith.constant dense<0.000000e+00> : vector<8x768xf32>
    %433 = tpu.matmul %432, %16, %cst_98 {dimension_numbers = #tpu.dot_dimension_numbers<[1], [0], [0], [1], [0, 0, 1, 1], [], []>} : vector<8x256xbf16>, vector<256x768xbf16>, vector<8x768xf32> -> vector<8x768xf32>
    %434 = vector.extract_strided_slice %431 {offsets = [0, 0], sizes = [8, 128], strides = [1, 1]} : vector<8x256xf32> to vector<8x128xf32>
    %435 = vector.extract_strided_slice %431 {offsets = [0, 128], sizes = [8, 128], strides = [1, 1]} : vector<8x256xf32> to vector<8x128xf32>
    %c48_99 = arith.constant 48 : index
    %c0_100 = arith.constant 0 : index
    %436 = vector.load %arg8[%c48_99, %c0_100] : memref<64x768xf32, #tpu.memory_space<vmem>>, vector<8x384xf32>
    %437 = vector.extract_strided_slice %433 {offsets = [0, 0], sizes = [8, 384], strides = [1, 1]} : vector<8x768xf32> to vector<8x384xf32>
    %438 = vector.extract_strided_slice %436 {offsets = [0, 0], sizes = [8, 128], strides = [1, 1]} : vector<8x384xf32> to vector<8x128xf32>
    %439 = vector.extract_strided_slice %437 {offsets = [0, 0], sizes = [8, 128], strides = [1, 1]} : vector<8x384xf32> to vector<8x128xf32>
    %440 = arith.addf %438, %439 : vector<8x128xf32>
    %441 = arith.negf %440 : vector<8x128xf32>
    %442 = math.exp %441 : vector<8x128xf32>
    %cst_101 = arith.constant 1.000000e+00 : f32
    %443 = vector.broadcast %cst_101 : f32 to vector<8x128xf32>
    %444 = arith.addf %443, %442 : vector<8x128xf32>
    %445 = arith.divf %443, %444 : vector<8x128xf32>
    %446 = vector.extract_strided_slice %436 {offsets = [0, 128], sizes = [8, 128], strides = [1, 1]} : vector<8x384xf32> to vector<8x128xf32>
    %447 = vector.extract_strided_slice %437 {offsets = [0, 128], sizes = [8, 128], strides = [1, 1]} : vector<8x384xf32> to vector<8x128xf32>
    %448 = arith.addf %446, %447 : vector<8x128xf32>
    %449 = arith.negf %448 : vector<8x128xf32>
    %450 = math.exp %449 : vector<8x128xf32>
    %cst_102 = arith.constant 1.000000e+00 : f32
    %451 = vector.broadcast %cst_102 : f32 to vector<8x128xf32>
    %452 = arith.addf %451, %450 : vector<8x128xf32>
    %453 = arith.divf %451, %452 : vector<8x128xf32>
    %454 = vector.extract_strided_slice %436 {offsets = [0, 256], sizes = [8, 128], strides = [1, 1]} : vector<8x384xf32> to vector<8x128xf32>
    %455 = vector.extract_strided_slice %437 {offsets = [0, 256], sizes = [8, 128], strides = [1, 1]} : vector<8x384xf32> to vector<8x128xf32>
    %456 = arith.addf %455, %12 : vector<8x128xf32>
    %457 = arith.mulf %445, %456 : vector<8x128xf32>
    %458 = arith.addf %454, %457 : vector<8x128xf32>
    %459 = math.tanh %458 : vector<8x128xf32>
    %460 = arith.subf %434, %459 : vector<8x128xf32>
    %461 = arith.mulf %453, %460 : vector<8x128xf32>
    %462 = arith.addf %459, %461 : vector<8x128xf32>
    %c8_103 = arith.constant 8 : index
    %c384_104 = arith.constant 384 : index
    %463 = vector.load %arg8[%c8_103, %c384_104] : memref<64x768xf32, #tpu.memory_space<vmem>>, vector<8x384xf32>
    %464 = vector.extract_strided_slice %433 {offsets = [0, 384], sizes = [8, 384], strides = [1, 1]} : vector<8x768xf32> to vector<8x384xf32>
    %465 = vector.extract_strided_slice %463 {offsets = [0, 0], sizes = [8, 128], strides = [1, 1]} : vector<8x384xf32> to vector<8x128xf32>
    %466 = vector.extract_strided_slice %464 {offsets = [0, 0], sizes = [8, 128], strides = [1, 1]} : vector<8x384xf32> to vector<8x128xf32>
    %467 = arith.addf %465, %466 : vector<8x128xf32>
    %468 = arith.negf %467 : vector<8x128xf32>
    %469 = math.exp %468 : vector<8x128xf32>
    %cst_105 = arith.constant 1.000000e+00 : f32
    %470 = vector.broadcast %cst_105 : f32 to vector<8x128xf32>
    %471 = arith.addf %470, %469 : vector<8x128xf32>
    %472 = arith.divf %470, %471 : vector<8x128xf32>
    %473 = vector.extract_strided_slice %463 {offsets = [0, 128], sizes = [8, 128], strides = [1, 1]} : vector<8x384xf32> to vector<8x128xf32>
    %474 = vector.extract_strided_slice %464 {offsets = [0, 128], sizes = [8, 128], strides = [1, 1]} : vector<8x384xf32> to vector<8x128xf32>
    %475 = arith.addf %473, %474 : vector<8x128xf32>
    %476 = arith.negf %475 : vector<8x128xf32>
    %477 = math.exp %476 : vector<8x128xf32>
    %cst_106 = arith.constant 1.000000e+00 : f32
    %478 = vector.broadcast %cst_106 : f32 to vector<8x128xf32>
    %479 = arith.addf %478, %477 : vector<8x128xf32>
    %480 = arith.divf %478, %479 : vector<8x128xf32>
    %481 = vector.extract_strided_slice %463 {offsets = [0, 256], sizes = [8, 128], strides = [1, 1]} : vector<8x384xf32> to vector<8x128xf32>
    %482 = vector.extract_strided_slice %464 {offsets = [0, 256], sizes = [8, 128], strides = [1, 1]} : vector<8x384xf32> to vector<8x128xf32>
    %483 = arith.addf %482, %15 : vector<8x128xf32>
    %484 = arith.mulf %472, %483 : vector<8x128xf32>
    %485 = arith.addf %481, %484 : vector<8x128xf32>
    %486 = math.tanh %485 : vector<8x128xf32>
    %487 = arith.subf %435, %486 : vector<8x128xf32>
    %488 = arith.mulf %480, %487 : vector<8x128xf32>
    %489 = arith.addf %486, %488 : vector<8x128xf32>
    %490 = vector.extract_strided_slice %9 {offsets = [48, 0], sizes = [8, 128], strides = [1, 1]} : vector<64x128xi1> to vector<8x128xi1>
    %491 = vector.extract_strided_slice %9 {offsets = [8, 0], sizes = [8, 128], strides = [1, 1]} : vector<64x128xi1> to vector<8x128xi1>
    %cst_107 = arith.constant 0.000000e+00 : f32
    %492 = vector.broadcast %cst_107 : f32 to vector<8x128xf32>
    %493 = arith.select %490, %462, %492 : vector<8x128xi1>, vector<8x128xf32>
    %c48_108 = arith.constant 48 : index
    %c0_109 = arith.constant 0 : index
    %494 = vector.load %arg6[%c48_108, %c0_109] : memref<64x128xf32, #tpu.memory_space<vmem>>, vector<8x128xf32>
    tpu.vector_store %arg6[%c48_108, %c0_109], %493 {strides = array<i32>} : memref<64x128xf32, #tpu.memory_space<vmem>>, vector<8x128xf32>,
    %cst_110 = arith.constant 0.000000e+00 : f32
    %495 = vector.broadcast %cst_110 : f32 to vector<8x128xf32>
    %496 = arith.select %491, %489, %495 : vector<8x128xi1>, vector<8x128xf32>
    %c8_111 = arith.constant 8 : index
    %c0_112 = arith.constant 0 : index
    %497 = vector.load %arg9[%c8_111, %c0_112] : memref<64x128xf32, #tpu.memory_space<vmem>>, vector<8x128xf32>
    tpu.vector_store %arg9[%c8_111, %c0_112], %496 {strides = array<i32>} : memref<64x128xf32, #tpu.memory_space<vmem>>, vector<8x128xf32>,
    %498 = arith.select %490, %462, %434 : vector<8x128xi1>, vector<8x128xf32>
    %499 = arith.select %491, %489, %435 : vector<8x128xi1>, vector<8x128xf32>
    %500 = tpu.concatenate %498, %499 in 1 : vector<8x128xf32>, vector<8x128xf32> -> vector<8x256xf32>
    %501 = arith.truncf %500 : vector<8x256xf32> to vector<8x256xbf16>
    %cst_113 = arith.constant dense<0.000000e+00> : vector<8x768xf32>
    %502 = tpu.matmul %501, %16, %cst_113 {dimension_numbers = #tpu.dot_dimension_numbers<[1], [0], [0], [1], [0, 0, 1, 1], [], []>} : vector<8x256xbf16>, vector<256x768xbf16>, vector<8x768xf32> -> vector<8x768xf32>
    %503 = vector.extract_strided_slice %500 {offsets = [0, 0], sizes = [8, 128], strides = [1, 1]} : vector<8x256xf32> to vector<8x128xf32>
    %504 = vector.extract_strided_slice %500 {offsets = [0, 128], sizes = [8, 128], strides = [1, 1]} : vector<8x256xf32> to vector<8x128xf32>
    %c56_114 = arith.constant 56 : index
    %c0_115 = arith.constant 0 : index
    %505 = vector.load %arg8[%c56_114, %c0_115] : memref<64x768xf32, #tpu.memory_space<vmem>>, vector<8x384xf32>
    %506 = vector.extract_strided_slice %502 {offsets = [0, 0], sizes = [8, 384], strides = [1, 1]} : vector<8x768xf32> to vector<8x384xf32>
    %507 = vector.extract_strided_slice %505 {offsets = [0, 0], sizes = [8, 128], strides = [1, 1]} : vector<8x384xf32> to vector<8x128xf32>
    %508 = vector.extract_strided_slice %506 {offsets = [0, 0], sizes = [8, 128], strides = [1, 1]} : vector<8x384xf32> to vector<8x128xf32>
    %509 = arith.addf %507, %508 : vector<8x128xf32>
    %510 = arith.negf %509 : vector<8x128xf32>
    %511 = math.exp %510 : vector<8x128xf32>
    %cst_116 = arith.constant 1.000000e+00 : f32
    %512 = vector.broadcast %cst_116 : f32 to vector<8x128xf32>
    %513 = arith.addf %512, %511 : vector<8x128xf32>
    %514 = arith.divf %512, %513 : vector<8x128xf32>
    %515 = vector.extract_strided_slice %505 {offsets = [0, 128], sizes = [8, 128], strides = [1, 1]} : vector<8x384xf32> to vector<8x128xf32>
    %516 = vector.extract_strided_slice %506 {offsets = [0, 128], sizes = [8, 128], strides = [1, 1]} : vector<8x384xf32> to vector<8x128xf32>
    %517 = arith.addf %515, %516 : vector<8x128xf32>
    %518 = arith.negf %517 : vector<8x128xf32>
    %519 = math.exp %518 : vector<8x128xf32>
    %cst_117 = arith.constant 1.000000e+00 : f32
    %520 = vector.broadcast %cst_117 : f32 to vector<8x128xf32>
    %521 = arith.addf %520, %519 : vector<8x128xf32>
    %522 = arith.divf %520, %521 : vector<8x128xf32>
    %523 = vector.extract_strided_slice %505 {offsets = [0, 256], sizes = [8, 128], strides = [1, 1]} : vector<8x384xf32> to vector<8x128xf32>
    %524 = vector.extract_strided_slice %506 {offsets = [0, 256], sizes = [8, 128], strides = [1, 1]} : vector<8x384xf32> to vector<8x128xf32>
    %525 = arith.addf %524, %12 : vector<8x128xf32>
    %526 = arith.mulf %514, %525 : vector<8x128xf32>
    %527 = arith.addf %523, %526 : vector<8x128xf32>
    %528 = math.tanh %527 : vector<8x128xf32>
    %529 = arith.subf %503, %528 : vector<8x128xf32>
    %530 = arith.mulf %522, %529 : vector<8x128xf32>
    %531 = arith.addf %528, %530 : vector<8x128xf32>
    %c0_118 = arith.constant 0 : index
    %c384_119 = arith.constant 384 : index
    %532 = vector.load %arg8[%c0_118, %c384_119] : memref<64x768xf32, #tpu.memory_space<vmem>>, vector<8x384xf32>
    %533 = vector.extract_strided_slice %502 {offsets = [0, 384], sizes = [8, 384], strides = [1, 1]} : vector<8x768xf32> to vector<8x384xf32>
    %534 = vector.extract_strided_slice %532 {offsets = [0, 0], sizes = [8, 128], strides = [1, 1]} : vector<8x384xf32> to vector<8x128xf32>
    %535 = vector.extract_strided_slice %533 {offsets = [0, 0], sizes = [8, 128], strides = [1, 1]} : vector<8x384xf32> to vector<8x128xf32>
    %536 = arith.addf %534, %535 : vector<8x128xf32>
    %537 = arith.negf %536 : vector<8x128xf32>
    %538 = math.exp %537 : vector<8x128xf32>
    %cst_120 = arith.constant 1.000000e+00 : f32
    %539 = vector.broadcast %cst_120 : f32 to vector<8x128xf32>
    %540 = arith.addf %539, %538 : vector<8x128xf32>
    %541 = arith.divf %539, %540 : vector<8x128xf32>
    %542 = vector.extract_strided_slice %532 {offsets = [0, 128], sizes = [8, 128], strides = [1, 1]} : vector<8x384xf32> to vector<8x128xf32>
    %543 = vector.extract_strided_slice %533 {offsets = [0, 128], sizes = [8, 128], strides = [1, 1]} : vector<8x384xf32> to vector<8x128xf32>
    %544 = arith.addf %542, %543 : vector<8x128xf32>
    %545 = arith.negf %544 : vector<8x128xf32>
    %546 = math.exp %545 : vector<8x128xf32>
    %cst_121 = arith.constant 1.000000e+00 : f32
    %547 = vector.broadcast %cst_121 : f32 to vector<8x128xf32>
    %548 = arith.addf %547, %546 : vector<8x128xf32>
    %549 = arith.divf %547, %548 : vector<8x128xf32>
    %550 = vector.extract_strided_slice %532 {offsets = [0, 256], sizes = [8, 128], strides = [1, 1]} : vector<8x384xf32> to vector<8x128xf32>
    %551 = vector.extract_strided_slice %533 {offsets = [0, 256], sizes = [8, 128], strides = [1, 1]} : vector<8x384xf32> to vector<8x128xf32>
    %552 = arith.addf %551, %15 : vector<8x128xf32>
    %553 = arith.mulf %541, %552 : vector<8x128xf32>
    %554 = arith.addf %550, %553 : vector<8x128xf32>
    %555 = math.tanh %554 : vector<8x128xf32>
    %556 = arith.subf %504, %555 : vector<8x128xf32>
    %557 = arith.mulf %549, %556 : vector<8x128xf32>
    %558 = arith.addf %555, %557 : vector<8x128xf32>
    %559 = vector.extract_strided_slice %9 {offsets = [56, 0], sizes = [8, 128], strides = [1, 1]} : vector<64x128xi1> to vector<8x128xi1>
    %560 = vector.extract_strided_slice %9 {offsets = [0, 0], sizes = [8, 128], strides = [1, 1]} : vector<64x128xi1> to vector<8x128xi1>
    %cst_122 = arith.constant 0.000000e+00 : f32
    %561 = vector.broadcast %cst_122 : f32 to vector<8x128xf32>
    %562 = arith.select %559, %531, %561 : vector<8x128xi1>, vector<8x128xf32>
    %c56_123 = arith.constant 56 : index
    %c0_124 = arith.constant 0 : index
    %563 = vector.load %arg6[%c56_123, %c0_124] : memref<64x128xf32, #tpu.memory_space<vmem>>, vector<8x128xf32>
    tpu.vector_store %arg6[%c56_123, %c0_124], %562 {strides = array<i32>} : memref<64x128xf32, #tpu.memory_space<vmem>>, vector<8x128xf32>,
    %cst_125 = arith.constant 0.000000e+00 : f32
    %564 = vector.broadcast %cst_125 : f32 to vector<8x128xf32>
    %565 = arith.select %560, %558, %564 : vector<8x128xi1>, vector<8x128xf32>
    %c0_126 = arith.constant 0 : index
    %c0_127 = arith.constant 0 : index
    %566 = vector.load %arg9[%c0_126, %c0_127] : memref<64x128xf32, #tpu.memory_space<vmem>>, vector<8x128xf32>
    tpu.vector_store %arg9[%c0_126, %c0_127], %565 {strides = array<i32>} : memref<64x128xf32, #tpu.memory_space<vmem>>, vector<8x128xf32>,
    %567 = arith.select %559, %531, %503 : vector<8x128xi1>, vector<8x128xf32>
    %568 = arith.select %560, %558, %504 : vector<8x128xi1>, vector<8x128xf32>
    %569 = tpu.concatenate %567, %568 in 1 : vector<8x128xf32>, vector<8x128xf32> -> vector<8x256xf32>
    %c0_128 = arith.constant 0 : index
    %c0_129 = arith.constant 0 : index
    %570 = vector.load %arg6[%c0_128, %c0_129] : memref<64x128xf32, #tpu.memory_space<vmem>>, vector<64x128xf32>
    %c0_130 = arith.constant 0 : index
    %c0_131 = arith.constant 0 : index
    %571 = vector.load %arg9[%c0_130, %c0_131] : memref<64x128xf32, #tpu.memory_space<vmem>>, vector<64x128xf32>
    %572 = arith.addf %570, %571 : vector<64x128xf32>
    %c0_132 = arith.constant 0 : index
    %c0_133 = arith.constant 0 : index
    %573 = vector.load %arg6[%c0_132, %c0_133] : memref<64x128xf32, #tpu.memory_space<vmem>>, vector<64x128xf32>
    tpu.vector_store %arg6[%c0_132, %c0_133], %572 {strides = array<i32>} : memref<64x128xf32, #tpu.memory_space<vmem>>, vector<64x128xf32>,
    %574 = vector.extract_strided_slice %569 {offsets = [0, 0], sizes = [8, 128], strides = [1, 1]} : vector<8x256xf32> to vector<8x128xf32>
    %c0_134 = arith.constant 0 : index
    %c0_135 = arith.constant 0 : index
    %c0_136 = arith.constant 0 : index
    %575 = vector.load %arg7[%c0_134, %c0_135, %c0_136] : memref<2x8x128xf32, #tpu.memory_space<vmem>>, vector<1x8x128xf32>
    %576 = vector.shape_cast %575 : vector<1x8x128xf32> to vector<8x128xf32>
    %577 = vector.shape_cast %574 : vector<8x128xf32> to vector<1x8x128xf32>
    tpu.vector_store %arg7[%c0_134, %c0_135, %c0_136], %577 {strides = array<i32>} : memref<2x8x128xf32, #tpu.memory_space<vmem>>, vector<1x8x128xf32>,
    %578 = vector.extract_strided_slice %569 {offsets = [0, 128], sizes = [8, 128], strides = [1, 1]} : vector<8x256xf32> to vector<8x128xf32>
    %c1 = arith.constant 1 : index
    %c0_137 = arith.constant 0 : index
    %c0_138 = arith.constant 0 : index
    %579 = vector.load %arg7[%c1, %c0_137, %c0_138] : memref<2x8x128xf32, #tpu.memory_space<vmem>>, vector<1x8x128xf32>
    %580 = vector.shape_cast %579 : vector<1x8x128xf32> to vector<8x128xf32>
    %581 = vector.shape_cast %578 : vector<8x128xf32> to vector<1x8x128xf32>
    tpu.vector_store %arg7[%c1, %c0_137, %c0_138], %581 {strides = array<i32>} : memref<2x8x128xf32, #tpu.memory_space<vmem>>, vector<1x8x128xf32>,
    return
  }
}

</mosaic_0001>

<bundles_post_ra>
// kernel: tpu_custom_call.1
= control target key start
LH: loop header
LB: loop body
LE: loop exit
PB: predicated region body
PF: predicated region fallthrough
CT: control target
= control target key end

     0   :  { %13 = vsyncpa [#allocation5], 0  ;;  %s5494_s0 = inlined_call_operand.hbm [shape: bf16[64,128], index: 0, kind: input, shape index: {}]   ;;  %s5495_s1 = inlined_call_operand.hbm [shape: f32[64,128], index: 1, kind: input, shape index: {}]   ;;  %s5496_s2 = inlined_call_operand.hbm [shape: bf16[128,768], index: 2, kind: input, shape index: {}]   ;;  %s5497_s3 = inlined_call_operand.hbm [shape: f32[1,768], index: 3, kind: input, shape index: {}]   ;;  %s5498_s4 = inlined_call_operand.hbm [shape: bf16[256,768], index: 4, kind: input, shape index: {}]   ;;  %s5499_s5 = inlined_call_operand.vmem [shape: f32[1,256], index: 5, kind: input, shape index: {}]   ;;  %s5500_s6 = inlined_call_operand.hbm [shape: f32[64,128], index: 6, kind: output, shape index: {0}]   ;;  %s5501_s7 = inlined_call_operand.hbm [shape: f32[2,8,128], index: 7, kind: output, shape index: {1}]  }
   0x1   :  { %14 = vsyncpa [#allocation8], 0 }
   0x2   :  { %15 = vsyncpa [#allocation11], 0 }
   0x3   :  { %16 = vsyncpa [#allocation6], 0 }
   0x4   :  { %17 = vsyncpa [#allocation15], 0  ;;  %s3756_s24 = smov [#allocation7]  }
   0x5   :  { %s35_s25 = sshll.u32 %s3756_s24, 4  ;;  %s36_s25 = int_to_ptr.vmem [resolvable:$true] %s35_s25 }
   0x6   :  { %s3614_s26 = scalar_lea.vmem %s36_s25, 1024  ;;  %p3619_p1 = scmp.lt.s32.totalorder %s36_s25, %s36_s25 }
   0x7   :  { %p3615_p0 = scmp.ne.s32.totalorder %s36_s25, %s3614_s26  ;;  %p3620_p2 = scmp.lt.s32.totalorder %s3614_s26, %s3614_s26 }
   0x9   :  { %p3621_p3 = por %p3620_p2, %p3619_p1 }
   0xb   :  { %p3622_p4 = pnand %p3621_p3, %p3615_p0 }
   0xd   :  { %3625 = shalt.err (!%p3622_p4)
}
   0xe   :  { %s3757_s27 = smov 128   ;;  %s3758_s28 = smov 8  }
   0xf   :  { %41 = dma.hbm_to_vmem [thread:$0]  %s5495_s1, 1024, %s36_s25, [#allocation8], %s3757_s27, %s3757_s27, %s3758_s28  }
  0x10   :  { %s3759_s8 = smov [#allocation10]   ;;  %s3760_s10 = smov [#allocation4]  }
  0x11   :  { %s60_s9 = sshll.u32 %s3759_s8, 4  ;;  %s23_s11 = sshll.u32 %s3760_s10, 4  ;;  %s61_s9 = int_to_ptr.vmem [resolvable:$true] %s60_s9  ;;  %s24_s11 = int_to_ptr.vmem [resolvable:$true] %s23_s11 }
  0x12   :  { %s3634_s12 = scalar_lea.vmem %s61_s9, 96  ;;  %p3639_p6 = scmp.lt.s32.totalorder %s61_s9, %s61_s9 }
  0x13   :  { %p3635_p5 = scmp.ne.s32.totalorder %s61_s9, %s3634_s12  ;;  %p3640_p7 = scmp.lt.s32.totalorder %s3634_s12, %s3634_s12 }
  0x15   :  { %p3641_p8 = por %p3640_p7, %p3639_p6 }
  0x17   :  { %p3642_p9 = pnand %p3641_p8, %p3635_p5 }
  0x19   :  { %3645 = shalt.err (!%p3642_p9)
}
  0x1a   :  { %63 = dma.hbm_to_vmem [thread:$0]  %s5497_s3, 96, %s61_s9, [#allocation11]  }
  0x1b   :  { %s3654_s15 = scalar_lea.vmem %s24_s11, 512  ;;  %p3659_p11 = scmp.lt.s32.totalorder %s24_s11, %s24_s11 }
  0x1c   :  { %p3655_p10 = scmp.ne.s32.totalorder %s24_s11, %s3654_s15  ;;  %p3660_p12 = scmp.lt.s32.totalorder %s3654_s15, %s3654_s15 }
  0x1e   :  { %p3661_p13 = por %p3660_p12, %p3659_p11 }
  0x20   :  { %p3662_p0 = pnand %p3661_p13, %p3655_p10 }
  0x22   :  { %3665 = shalt.err (!%p3662_p0)
}
  0x23   :  { %s3761_s1 = smov 64   ;;  %s3762_s16 = smov 4  }
  0x24   :  { %29 = dma.hbm_to_vmem [thread:$0]  %s5494_s0, 512, %s24_s11, [#allocation5], %s3761_s1, %s3761_s1, %s3762_s16  }
  0x25   :  { %s3763_s19 = smov [#allocation9]  }
  0x26   :  { %s47_s20 = sshll.u32 %s3763_s19, 4  ;;  %s48_s20 = int_to_ptr.vmem [resolvable:$true] %s47_s20 }
  0x27   :  { %s3674_s21 = scalar_lea.vmem %s48_s20, 6144  ;;  %p3679_p2 = scmp.lt.s32.totalorder %s48_s20, %s48_s20 }
  0x28   :  { %p3675_p1 = scmp.ne.s32.totalorder %s48_s20, %s3674_s21  ;;  %p3680_p3 = scmp.lt.s32.totalorder %s3674_s21, %s3674_s21 }
  0x2a   :  { %p3681_p4 = por %p3680_p3, %p3679_p2 }
  0x2c   :  { %p3682_p5 = pnand %p3681_p4, %p3675_p1 }
  0x2e   :  { %3685 = shalt.err (!%p3682_p5)
}
  0x2f   :  { %s3764_s3 = smov 384   ;;  %s3765_s22 = smov 24  }
  0x30   :  { %53 = dma.hbm_to_vmem [thread:$0]  %s5496_s2, 6144, %s48_s20, [#allocation8], %s3764_s3, %s3764_s3, %s3765_s22  }
  0x31   :  { %s3766_s25 = smov [#allocation12]  }
  0x32   :  { %s69_s26 = sshll.u32 %s3766_s25, 4  ;;  %s70_s26 = int_to_ptr.vmem [resolvable:$true] %s69_s26 }
  0x33   :  { %s3694_s0 = scalar_lea.vmem %s70_s26, 12288  ;;  %p3699_p7 = scmp.lt.s32.totalorder %s70_s26, %s70_s26 }
  0x34   :  { %p3695_p6 = scmp.ne.s32.totalorder %s70_s26, %s3694_s0  ;;  %p3700_p8 = scmp.lt.s32.totalorder %s3694_s0, %s3694_s0 }
  0x36   :  { %p3701_p9 = por %p3700_p8, %p3699_p7 }
  0x38   :  { %p3702_p10 = pnand %p3701_p9, %p3695_p6 }
  0x3a   :  { %3705 = shalt.err (!%p3702_p10)
}
  0x3b   :  { %75 = dma.hbm_to_vmem [thread:$0]  %s5498_s4, 12288, %s70_s26, [#allocation11], %s3764_s3, %s3764_s3, %s3765_s22  }
  0x3c   :  { %3746 = dma.done.wait [#allocation5], 512  }
  0x3d   :  { %3747 = vsyncadd [#allocation5], 4294966784 }
  0x3e   :  { %3748 = dma.done.wait [#allocation8], 7168  }
  0x3f   :  { %3749 = vsyncadd [#allocation8], 4294960128 }
  0x40   :  { %3750 = dma.done.wait [#allocation11], 12384  }
  0x41   :  { %3751 = vsyncadd [#allocation11], 4294954912  ;;  %v5502_v0 = vmov 0   ;;  %v3031_v1 = vld [vmem:[#allocation9 + $0x154] ss:$24 sps:$4 sm:$0xff]   ;;  %v3832_v35 = vld [vmem:[#allocation4] sm:$0xff]  }
  0x42   :  { %551 = vmatprep.mubr.bf16.mxu1 %v5502_v0  ;;  %478 = vmatprep.mubr.bf16.mxu0 %v5502_v0  ;;  %v3033_v2 = vld [vmem:[#allocation9 + $0x15c] ss:$24 sps:$4 sm:$0xff]   ;;  %v3035_v3 = vld [vmem:[#allocation9 + $0x150] ss:$24 sps:$4 sm:$0xff]   ;;  %v3039_v6 = vld [vmem:[#allocation9 + $0x12c] ss:$24 sps:$4 sm:$0xff]  }
  0x43   :  { %446 = vmatprep.subr.bf16.mxu0 %v3031_v1  ;;  %v3036_v4 = vld [vmem:[#allocation9 + $0x158] ss:$24 sps:$4 sm:$0xff]   ;;  %519 = vmatprep.subr.bf16.mxu1 %v3033_v2  ;;  %v3037_v5 = vld [vmem:[#allocation9 + $0x124] ss:$24 sps:$4 sm:$0xff]   ;;  %v3042_v8 = vld [vmem:[#allocation9 + $0x128] ss:$24 sps:$4 sm:$0xff]  }
  0x44   :  { %447 = vmatpush1.bf16.msra.mxu0 %v3035_v3  ;;  %520 = vmatpush1.bf16.msra.mxu1 %v3036_v4  ;;  %v3041_v7 = vld [vmem:[#allocation9 + $0x120] ss:$24 sps:$4 sm:$0xff]   ;;  %v3043_v9 = vld [vmem:[#allocation9 + $0xf4] ss:$24 sps:$4 sm:$0xff]   ;;  %v3047_v11 = vld [vmem:[#allocation9 + $0xf0] ss:$24 sps:$4 sm:$0xff]  }
  0x45   :  { %448 = vmatprep.subr.bf16.mxu0 %v3037_v5  ;;  %521 = vmatprep.subr.bf16.mxu1 %v3039_v6  ;;  %v3045_v10 = vld [vmem:[#allocation9 + $0xfc] ss:$24 sps:$4 sm:$0xff]   ;;  %v3048_v12 = vld [vmem:[#allocation9 + $0xf8] ss:$24 sps:$4 sm:$0xff]   ;;  %v3051_v14 = vld [vmem:[#allocation9 + $0xcc] ss:$24 sps:$4 sm:$0xff]  }
  0x46   :  { %v3049_v13 = vld [vmem:[#allocation9 + $0xc4] ss:$24 sps:$4 sm:$0xff]   ;;  %v3053_v15 = vld [vmem:[#allocation9 + $0xc0] ss:$24 sps:$4 sm:$0xff]   ;;  %v3055_v17 = vld [vmem:[#allocation9 + $0x94] ss:$24 sps:$4 sm:$0xff]  }
  0x47   :  { %v3054_v16 = vld [vmem:[#allocation9 + $0xc8] ss:$24 sps:$4 sm:$0xff]   ;;  %v3057_v18 = vld [vmem:[#allocation9 + $0x9c] ss:$24 sps:$4 sm:$0xff]   ;;  %v3060_v20 = vld [vmem:[#allocation9 + $0x98] ss:$24 sps:$4 sm:$0xff]  }
  0x48   :  { %449 = vmatpush1.bf16.msra.mxu0 %v3041_v7  ;;  %522 = vmatpush1.bf16.msra.mxu1 %v3042_v8  ;;  %v3059_v19 = vld [vmem:[#allocation9 + $0x90] ss:$24 sps:$4 sm:$0xff]   ;;  %v3061_v21 = vld [vmem:[#allocation9 + $0x64] ss:$24 sps:$4 sm:$0xff]   ;;  %v3065_v23 = vld [vmem:[#allocation9 + $0x60] ss:$24 sps:$4 sm:$0xff]  }
  0x49   :  { %450 = vmatprep.subr.bf16.mxu0 %v3043_v9  ;;  %523 = vmatprep.subr.bf16.mxu1 %v3045_v10  ;;  %v3063_v22 = vld [vmem:[#allocation9 + $0x6c] ss:$24 sps:$4 sm:$0xff]   ;;  %v3066_v24 = vld [vmem:[#allocation9 + $0x68] ss:$24 sps:$4 sm:$0xff]   ;;  %v3069_v26 = vld [vmem:[#allocation9 + $0x3c] ss:$24 sps:$4 sm:$0xff]  }
  0x4a   :  { %v3067_v25 = vld [vmem:[#allocation9 + $0x34] ss:$24 sps:$4 sm:$0xff]   ;;  %v3071_v27 = vld [vmem:[#allocation9 + $0x30] ss:$24 sps:$4 sm:$0xff]   ;;  %v3073_v29 = vld [vmem:[#allocation9 + $0x4] ss:$24 sps:$4 sm:$0xff]  }
  0x4b   :  { %v3072_v28 = vld [vmem:[#allocation9 + $0x38] ss:$24 sps:$4 sm:$0xff]   ;;  %v3075_v30 = vld [vmem:[#allocation9 + $0xc] ss:$24 sps:$4 sm:$0xff]   ;;  %v3078_v32 = vld [vmem:[#allocation9 + $0x8] ss:$24 sps:$4 sm:$0xff]  }
  0x4c   :  { %451 = vmatpush1.bf16.msra.mxu0 %v3047_v11  ;;  %524 = vmatpush1.bf16.msra.mxu1 %v3048_v12  ;;  %v3077_v31 = vld [vmem:[#allocation9] ss:$24 sps:$4 sm:$0xff]   ;;  %v3082_v33 = vld [vmem:[#allocation9 + $0x164] ss:$24 sps:$4 sm:$0xff]   ;;  %v3088_v38 = vld [vmem:[#allocation9 + $0x134] ss:$24 sps:$4 sm:$0xff]  }
  0x4d   :  { %452 = vmatprep.subr.bf16.mxu0 %v3049_v13  ;;  %525 = vmatprep.subr.bf16.mxu1 %v3051_v14  ;;  %v3830_v34 = vld [vmem:[#allocation12 + $0x154] ss:$24 sps:$4 sm:$0xff]   ;;  %v3834_v37 = vld [vmem:[#allocation12 + $0x150] ss:$24 sps:$4 sm:$0xff]   ;;  %v3837_v39 = vld [vmem:[#allocation12 + $0x124] ss:$24 sps:$4 sm:$0xff]  }
  0x4e   :  { %v3080_v36 = vld [vmem:[#allocation9 + $0x160] ss:$24 sps:$4 sm:$0xff]   ;;  %v3086_v40 = vld [vmem:[#allocation9 + $0x130] ss:$24 sps:$4 sm:$0xff]   ;;  %v3094_v42 = vld [vmem:[#allocation9 + $0x104] ss:$24 sps:$4 sm:$0xff]  }
  0x4f   :  { %v3842_v41 = vld [vmem:[#allocation12 + $0x120] ss:$24 sps:$4 sm:$0xff]   ;;  %v3845_v43 = vld [vmem:[#allocation12 + $0xf4] ss:$24 sps:$4 sm:$0xff]   ;;  %v3852_v46 = vld [vmem:[#allocation12 + $0xf0] ss:$24 sps:$4 sm:$0xff]  }
  0x50   :  { %453 = vmatpush1.bf16.msra.mxu0 %v3053_v15  ;;  %526 = vmatpush1.bf16.msra.mxu1 %v3054_v16  ;;  %v3092_v44 = vld [vmem:[#allocation9 + $0x100] ss:$24 sps:$4 sm:$0xff]   ;;  %v3849_v45 = vld [vmem:[#allocation4 + $0x8] sm:$0xff]   ;;  %v3107_v51 = vld [vmem:[#allocation9 + $0xa4] ss:$24 sps:$4 sm:$0xff]   ;;  %s3769_s16 = smov [#allocation13]  }
  0x51   :  { %454 = vmatprep.subr.bf16.mxu0 %v3055_v17  ;;  %527 = vmatprep.subr.bf16.mxu1 %v3057_v18  ;;  %v3101_v47 = vld [vmem:[#allocation9 + $0xd4] ss:$24 sps:$4 sm:$0xff]   ;;  %v3099_v49 = vld [vmem:[#allocation9 + $0xd0] ss:$24 sps:$4 sm:$0xff]   ;;  %v3105_v53 = vld [vmem:[#allocation9 + $0xa0] ss:$24 sps:$4 sm:$0xff]  }
  0x52   :  { %v3855_v48 = vld [vmem:[#allocation12 + $0xc4] ss:$24 sps:$4 sm:$0xff]   ;;  %v3858_v50 = vld [vmem:[#allocation12 + $0xc0] ss:$24 sps:$4 sm:$0xff]   ;;  %v3863_v52 = vld [vmem:[#allocation12 + $0x94] ss:$24 sps:$4 sm:$0xff]  }
  0x53   :  { %v3867_v54 = vld [vmem:[#allocation4 + $0x10] sm:$0xff]   ;;  %v3873_v57 = vld [vmem:[#allocation12 + $0x64] ss:$24 sps:$4 sm:$0xff]   ;;  %v3876_v59 = vld [vmem:[#allocation12 + $0x60] ss:$24 sps:$4 sm:$0xff]   ;;  %s2787_s17 = sshll.u32 %s3769_s16, 4  ;;  %s2788_s17 = int_to_ptr.vmem [resolvable:$true] %s2787_s17 }
  0x54   :  { %455 = vmatpush1.bf16.msra.mxu0 %v3059_v19  ;;  %528 = vmatpush1.bf16.msra.mxu1 %v3060_v20  ;;  %v3870_v55 = vld [vmem:[#allocation12 + $0x90] ss:$24 sps:$4 sm:$0xff]   ;;  %v3120_v60 = vld [vmem:[#allocation9 + $0x44] ss:$24 sps:$4 sm:$0xff]   ;;  %v3914_v11 = vld [vmem:[#allocation12 + $0x12c] ss:$24 sps:$4 sm:$0xff]  }
  0x55   :  { %456 = vmatprep.subr.bf16.mxu0 %v3061_v21  ;;  %529 = vmatprep.subr.bf16.mxu1 %v3063_v22  ;;  %v3114_v56 = vld [vmem:[#allocation9 + $0x74] ss:$24 sps:$4 sm:$0xff]   ;;  %v3112_v58 = vld [vmem:[#allocation9 + $0x70] ss:$24 sps:$4 sm:$0xff]   ;;  %v3118_v62 = vld [vmem:[#allocation9 + $0x40] ss:$24 sps:$4 sm:$0xff]  }
  0x56   :  { %v3881_v61 = vld [vmem:[#allocation12 + $0x34] ss:$24 sps:$4 sm:$0xff]   ;;  %v3888_v1 = vld [vmem:[#allocation12 + $0x30] ss:$24 sps:$4 sm:$0xff]   ;;  %v3891_v3 = vld [vmem:[#allocation12 + $0x4] ss:$24 sps:$4 sm:$0xff]  }
  0x57   :  { %v3885_v63 = vld [vmem:[#allocation4 + $0x18] sm:$0xff]   ;;  %v3127_v2 = vld [vmem:[#allocation9 + $0x14] ss:$24 sps:$4 sm:$0xff]   ;;  %v3125_v4 = vld [vmem:[#allocation9 + $0x10] ss:$24 sps:$4 sm:$0xff]  }
  0x58   :  { %457 = vmatpush1.bf16.msra.mxu0 %v3065_v23  ;;  %530 = vmatpush1.bf16.msra.mxu1 %v3066_v24  ;;  %v3894_v5 = vld [vmem:[#allocation12] ss:$24 sps:$4 sm:$0xff]   ;;  %v3898_v6 = vld [vmem:[#allocation12 + $0x2d4] ss:$24 sps:$4 sm:$0xff]   ;;  %v3905_v8 = vld [vmem:[#allocation12 + $0x2d0] ss:$24 sps:$4 sm:$0xff]  }
  0x59   :  { %458 = vmatprep.subr.bf16.mxu0 %v3067_v25  ;;  %531 = vmatprep.subr.bf16.mxu1 %v3069_v26  ;;  %v3901_v7 = vld [vmem:[#allocation12 + $0x15c] ss:$24 sps:$4 sm:$0xff]   ;;  %v3908_v9 = vld [vmem:[#allocation12 + $0x158] ss:$24 sps:$4 sm:$0xff]   ;;  %v3919_v13 = vld [vmem:[#allocation12 + $0x128] ss:$24 sps:$4 sm:$0xff]  }
  0x5a   :  { %v3910_v10 = vld [vmem:[#allocation12 + $0x2a4] ss:$24 sps:$4 sm:$0xff]   ;;  %v3917_v12 = vld [vmem:[#allocation12 + $0x2a0] ss:$24 sps:$4 sm:$0xff]   ;;  %v3923_v14 = vld [vmem:[#allocation12 + $0x274] ss:$24 sps:$4 sm:$0xff]  }
  0x5b   :  { %v3927_v15 = vld [vmem:[#allocation12 + $0xfc] ss:$24 sps:$4 sm:$0xff]   ;;  %v3930_v16 = vld [vmem:[#allocation12 + $0x270] ss:$24 sps:$4 sm:$0xff]   ;;  %v3940_v19 = vld [vmem:[#allocation12 + $0xcc] ss:$24 sps:$4 sm:$0xff]  }
  0x5c   :  { %459 = vmatpush1.bf16.msra.mxu0 %v3071_v27  ;;  %532 = vmatpush1.bf16.msra.mxu1 %v3072_v28  ;;  %v3934_v17 = vld [vmem:[#allocation12 + $0xf8] ss:$24 sps:$4 sm:$0xff]   ;;  %v3936_v18 = vld [vmem:[#allocation12 + $0x244] ss:$24 sps:$4 sm:$0xff]   ;;  %v3944_v21 = vld [vmem:[#allocation12 + $0xc8] ss:$24 sps:$4 sm:$0xff]  }
  0x5d   :  { %460 = vmatprep.subr.bf16.mxu0 %v3073_v29  ;;  %533 = vmatprep.subr.bf16.mxu1 %v3075_v30  ;;  %v3942_v20 = vld [vmem:[#allocation12 + $0x240] ss:$24 sps:$4 sm:$0xff]   ;;  %v3949_v22 = vld [vmem:[#allocation12 + $0x214] ss:$24 sps:$4 sm:$0xff]   ;;  %v3956_v24 = vld [vmem:[#allocation12 + $0x210] ss:$24 sps:$4 sm:$0xff]  }
  0x5e   :  { %v3953_v23 = vld [vmem:[#allocation12 + $0x9c] ss:$24 sps:$4 sm:$0xff]   ;;  %v3960_v25 = vld [vmem:[#allocation12 + $0x98] ss:$24 sps:$4 sm:$0xff]   ;;  %v3966_v27 = vld [vmem:[#allocation12 + $0x6c] ss:$24 sps:$4 sm:$0xff]  }
  0x5f   :  { %v3962_v26 = vld [vmem:[#allocation12 + $0x1e4] ss:$24 sps:$4 sm:$0xff]   ;;  %v3968_v28 = vld [vmem:[#allocation12 + $0x1e0] ss:$24 sps:$4 sm:$0xff]   ;;  %v3975_v30 = vld [vmem:[#allocation12 + $0x1b4] ss:$24 sps:$4 sm:$0xff]  }
  0x60   :  { %461 = vmatpush1.bf16.msra.mxu0 %v3077_v31  ;;  %534 = vmatpush1.bf16.msra.mxu1 %v3078_v32  ;;  %v3970_v29 = vld [vmem:[#allocation12 + $0x68] ss:$24 sps:$4 sm:$0xff]   ;;  %v3979_v31 = vld [vmem:[#allocation12 + $0x3c] ss:$24 sps:$4 sm:$0xff]  }
  0x61   :  { %592 = vmatprep.subr.bf16.mxu0 %v3082_v33  ;;  %1319 = vmatprep.subr.bf16.mxu1 %v3830_v34  ;;  %5705 = vst [vmem:[#allocation21_spill] sm:$0xff] %v3979_v31  ;;  %v3982_v32 = vld [vmem:[#allocation12 + $0x1b0] ss:$24 sps:$4 sm:$0xff]  }
  0x62   :  { %v3986_v33 = vld [vmem:[#allocation12 + $0x38] ss:$24 sps:$4 sm:$0xff]  }
  0x63   :  { %552 = vmatmul.mubr.bf16.vlgmr.msra.gmra.mxu1 %v3832_v35  ;;  %479 = vmatmul.mubr.bf16.vlgmr.msra.gmra.mxu0 %v3832_v35  ;;  %5706 = vst [vmem:[#allocation22_spill] sm:$0xff] %v3986_v33 }
  0x64   :  { %593 = vmatpush1.bf16.msra.mxu0 %v3080_v36  ;;  %1320 = vmatpush1.bf16.msra.mxu1 %v3834_v37  ;;  %v3992_v36 = vld [vmem:[#allocation12 + $0xc] ss:$24 sps:$4 sm:$0xff]  }
  0x65   :  { %594 = vmatprep.subr.bf16.mxu0 %v3088_v38  ;;  %1321 = vmatprep.subr.bf16.mxu1 %v3837_v39  ;;  %5707 = vst [vmem:[#allocation23_spill] sm:$0xff] %v3992_v36  ;;  %v3994_v38 = vld [vmem:[#allocation12 + $0x180] ss:$24 sps:$4 sm:$0xff]  }
  0x66   :  { %488 = vmatprep.mubr.bf16.mxu0 %v5502_v0  ;;  %561 = vmatprep.mubr.bf16.mxu1 %v5502_v0 }
  0x68   :  { %595 = vmatpush1.bf16.msra.mxu0 %v3086_v40  ;;  %1322 = vmatpush1.bf16.msra.mxu1 %v3842_v41  ;;  %v3996_v40 = vld [vmem:[#allocation12 + $0x8] ss:$24 sps:$4 sm:$0xff]  }
  0x69   :  { %596 = vmatprep.subr.bf16.mxu0 %v3094_v42  ;;  %1323 = vmatprep.subr.bf16.mxu1 %v3845_v43  ;;  %5708 = vst [vmem:[#allocation24_spill] sm:$0xff] %v3996_v40  ;;  %v4001_v42 = vld [vmem:[#allocation12 + $0x2dc] ss:$24 sps:$4 sm:$0xff]  }
  0x6a   :  { %5709 = vst [vmem:[#allocation25_spill] sm:$0xff] %v4001_v42 }
  0x6b   :  { %489 = vmatmul.mubr.bf16.gmra.mxu0 %v3849_v45  ;;  %562 = vmatmul.mubr.bf16.gmra.mxu1 %v3849_v45 }
  0x6c   :  { %597 = vmatpush1.bf16.msra.mxu0 %v3092_v44  ;;  %1324 = vmatpush1.bf16.msra.mxu1 %v3852_v46  ;;  %v4005_v44 = vld [vmem:[#allocation12 + $0x164] ss:$24 sps:$4 sm:$0xff]  }
  0x6d   :  { %598 = vmatprep.subr.bf16.mxu0 %v3101_v47  ;;  %1325 = vmatprep.subr.bf16.mxu1 %v3855_v48  ;;  %v4010_v47 = vld [vmem:[#allocation12 + $0x160] ss:$24 sps:$4 sm:$0xff]  }
  0x6e   :  { %498 = vmatprep.mubr.bf16.mxu0 %v5502_v0  ;;  %571 = vmatprep.mubr.bf16.mxu1 %v5502_v0  ;;  %5711 = vst [vmem:[#allocation27_spill] sm:$0xff] %v4010_v47 }
  0x70   :  { %599 = vmatpush1.bf16.msra.mxu0 %v3099_v49  ;;  %1326 = vmatpush1.bf16.msra.mxu1 %v3858_v50  ;;  %v4014_v49 = vld [vmem:[#allocation12 + $0x2ac] ss:$24 sps:$4 sm:$0xff]  }
  0x71   :  { %600 = vmatprep.subr.bf16.mxu0 %v3107_v51  ;;  %1327 = vmatprep.subr.bf16.mxu1 %v3863_v52  ;;  %5712 = vst [vmem:[#allocation28_spill] sm:$0xff] %v4014_v49  ;;  %v4018_v51 = vld [vmem:[#allocation12 + $0x134] ss:$24 sps:$4 sm:$0xff]  }
  0x72   :  { %5713 = vst [vmem:[#allocation29_spill] sm:$0xff] %v4018_v51 }
  0x73   :  { %499 = vmatmul.mubr.bf16.gmra.mxu0 %v3867_v54  ;;  %572 = vmatmul.mubr.bf16.gmra.mxu1 %v3867_v54 }
  0x74   :  { %601 = vmatpush1.bf16.msra.mxu0 %v3105_v53  ;;  %1328 = vmatpush1.bf16.msra.mxu1 %v3870_v55  ;;  %v4023_v53 = vld [vmem:[#allocation12 + $0x2a8] ss:$24 sps:$4 sm:$0xff]  }
  0x75   :  { %602 = vmatprep.subr.bf16.mxu0 %v3114_v56  ;;  %1329 = vmatprep.subr.bf16.mxu1 %v3873_v57  ;;  %5714 = vst [vmem:[#allocation30_spill] sm:$0xff] %v4023_v53  ;;  %v4029_v56 = vld [vmem:[#allocation12 + $0x27c] ss:$24 sps:$4 sm:$0xff]  }
  0x76   :  { %508 = vmatprep.mubr.bf16.mxu0 %v5502_v0  ;;  %581 = vmatprep.mubr.bf16.mxu1 %v5502_v0  ;;  %5716 = vst [vmem:[#allocation32_spill] sm:$0xff] %v4029_v56 }
  0x78   :  { %603 = vmatpush1.bf16.msra.mxu0 %v3112_v58  ;;  %1330 = vmatpush1.bf16.msra.mxu1 %v3876_v59  ;;  %v4031_v58 = vld [vmem:[#allocation12 + $0x104] ss:$24 sps:$4 sm:$0xff]  }
  0x79   :  { %604 = vmatprep.subr.bf16.mxu0 %v3120_v60  ;;  %1331 = vmatprep.subr.bf16.mxu1 %v3881_v61  ;;  %5717 = vst [vmem:[#allocation33_spill] sm:$0xff] %v4031_v58  ;;  %v4036_v60 = vld [vmem:[#allocation12 + $0x278] ss:$24 sps:$4 sm:$0xff]  }
  0x7a   :  { %5718 = vst [vmem:[#allocation34_spill] sm:$0xff] %v4036_v60 }
  0x7b   :  { %509 = vmatmul.mubr.bf16.gmra.mxu0 %v3885_v63  ;;  %582 = vmatmul.mubr.bf16.gmra.mxu1 %v3885_v63 }
  0x7c   :  { %605 = vmatpush1.bf16.msra.mxu0 %v3118_v62  ;;  %1332 = vmatpush1.bf16.msra.mxu1 %v3888_v1  ;;  %v4038_v62 = vld [vmem:[#allocation12 + $0x100] ss:$24 sps:$4 sm:$0xff]  }
  0x7d   :  { %606 = vmatprep.subr.bf16.mxu0 %v3127_v2  ;;  %1333 = vmatprep.subr.bf16.mxu1 %v3891_v3  ;;  %5719 = vst [vmem:[#allocation35_spill] sm:$0xff] %v4038_v62  ;;  %v4044_v2 = vld [vmem:[#allocation12 + $0xd4] ss:$24 sps:$4 sm:$0xff]  }
  0x7e   :  { %624 = vmatprep.mubr.bf16.mxu0 %v5502_v0  ;;  %1351 = vmatprep.mubr.bf16.mxu1 %v5502_v0  ;;  %5721 = vst [vmem:[#allocation37_spill] sm:$0xff] %v4044_v2 }
  0x80   :  { %607 = vmatpush1.bf16.msra.mxu0 %v3125_v4  ;;  %1334 = vmatpush1.bf16.msra.mxu1 %v3894_v5  ;;  %v4048_v4 = vld [vmem:[#allocation12 + $0x248] ss:$24 sps:$4 sm:$0xff]  }
  0x81   :  { %1335 = vmatprep.subr.bf16.mxu1 %v3898_v6  ;;  %1360 = vmatprep.subr.bf16.mxu0 %v3901_v7  ;;  %5722 = vst [vmem:[#allocation38_spill] sm:$0xff] %v4048_v4 }
  0x83   :  { %625 = vmatmul.mubr.bf16.vlgmr.msra.gmra.mxu0 %v3832_v35  ;;  %v3988_v35 = vld [vmem:[#allocation12 + $0x184] ss:$24 sps:$4 sm:$0xff]  }
  0x84   :  { %1336 = vmatpush2.bf16.msra.mxu1 %v3905_v8  ;;  %1361 = vmatpush1.bf16.msra.mxu0 %v3908_v9 }
  0x85   :  { %1337 = vmatprep.subr.bf16.mxu1 %v3910_v10  ;;  %1362 = vmatprep.subr.bf16.mxu0 %v3914_v11 }
  0x86   :  { %634 = vmatprep.mubr.bf16.mxu0 %v5502_v0 }
  0x88   :  { %1338 = vmatpush2.bf16.msra.mxu1 %v3917_v12  ;;  %1363 = vmatpush1.bf16.msra.mxu0 %v3919_v13 }
  0x89   :  { %1339 = vmatprep.subr.bf16.mxu1 %v3923_v14  ;;  %1364 = vmatprep.subr.bf16.mxu0 %v3927_v15 }
  0x8b   :  { %635 = vmatmul.mubr.bf16.gmra.mxu0 %v3849_v45  ;;  %v4008_v45 = vld [vmem:[#allocation12 + $0x2d8] ss:$24 sps:$4 sm:$0xff]  }
  0x8c   :  { %1340 = vmatpush2.bf16.msra.mxu1 %v3930_v16  ;;  %1365 = vmatpush1.bf16.msra.mxu0 %v3934_v17  ;;  %5710 = vst [vmem:[#allocation26_spill] sm:$0xff] %v4008_v45 }
  0x8d   :  { %1341 = vmatprep.subr.bf16.mxu1 %v3936_v18  ;;  %1366 = vmatprep.subr.bf16.mxu0 %v3940_v19 }
  0x8e   :  { %644 = vmatprep.mubr.bf16.mxu0 %v5502_v0 }
  0x90   :  { %1342 = vmatpush2.bf16.msra.mxu1 %v3942_v20  ;;  %1367 = vmatpush1.bf16.msra.mxu0 %v3944_v21 }
  0x91   :  { %1343 = vmatprep.subr.bf16.mxu1 %v3949_v22  ;;  %1368 = vmatprep.subr.bf16.mxu0 %v3953_v23 }
  0x93   :  { %645 = vmatmul.mubr.bf16.gmra.mxu0 %v3867_v54  ;;  %v4025_v54 = vld [vmem:[#allocation12 + $0x130] ss:$24 sps:$4 sm:$0xff]  }
  0x94   :  { %1344 = vmatpush2.bf16.msra.mxu1 %v3956_v24  ;;  %1369 = vmatpush1.bf16.msra.mxu0 %v3960_v25  ;;  %5715 = vst [vmem:[#allocation31_spill] sm:$0xff] %v4025_v54 }
  0x95   :  { %1345 = vmatprep.subr.bf16.mxu1 %v3962_v26  ;;  %1370 = vmatprep.subr.bf16.mxu0 %v3966_v27 }
  0x96   :  { %654 = vmatprep.mubr.bf16.mxu0 %v5502_v0 }
  0x98   :  { %1346 = vmatpush2.bf16.msra.mxu1 %v3968_v28  ;;  %1371 = vmatpush1.bf16.msra.mxu0 %v3970_v29 }
  0x99   :  { %1347 = vmatprep.subr.bf16.mxu1 %v3975_v30  ;;  %1372 = vmatprep.subr.bf16.mxu0 %v3979_v31 }
  0x9b   :  { %655 = vmatmul.mubr.bf16.gmra.mxu0 %v3885_v63  ;;  %v4042_v63 = vld [vmem:[#allocation12 + $0x24c] ss:$24 sps:$4 sm:$0xff]  }
  0x9c   :  { %1348 = vmatpush2.bf16.msra.mxu1 %v3982_v32  ;;  %1373 = vmatpush1.bf16.msra.mxu0 %v3986_v33  ;;  %5720 = vst [vmem:[#allocation36_spill] sm:$0xff] %v4042_v63 }
  0x9d   :  { %1349 = vmatprep.subr.bf16.mxu1 %v3988_v35  ;;  %1374 = vmatprep.subr.bf16.mxu0 %v3992_v36 }
  0x9e   :  { %1392 = vmatprep.mubr.bf16.mxu0 %v5502_v0 }
  0xa0   :  { %1350 = vmatpush2.bf16.msra.mxu1 %v3994_v38  ;;  %1375 = vmatpush1.bf16.msra.mxu0 %v3996_v40 }
  0xa1   :  { %1376 = vmatprep.subr.bf16.mxu0 %v4001_v42  ;;  %1401 = vmatprep.subr.bf16.mxu1 %v4005_v44 }
  0xa3   :  { %1352 = vmatmul.mubr.bf16.vlgmr.msra.gmra.mxu1 %v5502_v0 }
  0xa4   :  { %1377 = vmatpush2.bf16.msra.mxu0 %v4008_v45  ;;  %1402 = vmatpush1.bf16.msra.mxu1 %v4010_v47  ;;  %v4062_v47 = vld [vmem:[#allocation12 + $0xa0] ss:$24 sps:$4 sm:$0xff]  }
  0xa5   :  { %1378 = vmatprep.subr.bf16.mxu0 %v4014_v49  ;;  %1403 = vmatprep.subr.bf16.mxu1 %v4018_v51  ;;  %v4056_v51 = vld [vmem:[#allocation12 + $0xa4] ss:$24 sps:$4 sm:$0xff]   ;;  %5727 = vst [vmem:[#allocation43_spill] sm:$0xff] %v4062_v47 }
  0xa6   :  { %1433 = vmatprep.mubr.bf16.mxu1 %v5502_v0  ;;  %v4050_v0 = vld [vmem:[#allocation12 + $0xd0] ss:$24 sps:$4 sm:$0xff]   ;;  %5725 = vst [vmem:[#allocation41_spill] sm:$0xff] %v4056_v51 }
  0xa7   :  { %5723 = vst [vmem:[#allocation39_spill] sm:$0xff] %v4050_v0 }
  0xa8   :  { %1379 = vmatpush2.bf16.msra.mxu0 %v4023_v53  ;;  %1404 = vmatpush1.bf16.msra.mxu1 %v4025_v54  ;;  %v4054_v54 = vld [vmem:[#allocation12 + $0x21c] ss:$24 sps:$4 sm:$0xff]  }
  0xa9   :  { %1380 = vmatprep.subr.bf16.mxu0 %v4029_v56  ;;  %1405 = vmatprep.subr.bf16.mxu1 %v4031_v58  ;;  %5724 = vst [vmem:[#allocation40_spill] sm:$0xff] %v4054_v54  ;;  %v4060_v58 = vld [vmem:[#allocation12 + $0x218] ss:$24 sps:$4 sm:$0xff]  }
  0xaa   :  { %5726 = vst [vmem:[#allocation42_spill] sm:$0xff] %v4060_v58 }
  0xac   :  { %1381 = vmatpush2.bf16.msra.mxu0 %v4036_v60  ;;  %1406 = vmatpush1.bf16.msra.mxu1 %v4038_v62  ;;  %v4066_v62 = vld [vmem:[#allocation12 + $0x1ec] ss:$24 sps:$4 sm:$0xff]  }
  0xad   :  { %1382 = vmatprep.subr.bf16.mxu0 %v4042_v63  ;;  %1407 = vmatprep.subr.bf16.mxu1 %v4044_v2  ;;  %5728 = vst [vmem:[#allocation44_spill] sm:$0xff] %v4066_v62  ;;  %v4068_v63 = vld [vmem:[#allocation12 + $0x74] ss:$24 sps:$4 sm:$0xff]   ;;  %v4072_v2 = vld [vmem:[#allocation12 + $0x1e8] ss:$24 sps:$4 sm:$0xff]  }
  0xae   :  { %5729 = vst [vmem:[#allocation45_spill] sm:$0xff] %v4068_v63  ;;  %5730 = vst [vmem:[#allocation46_spill] sm:$0xff] %v4072_v2 }
  0xb0   :  { %1383 = vmatpush2.bf16.msra.mxu0 %v4048_v4  ;;  %1408 = vmatpush1.bf16.msra.mxu1 %v4050_v0  ;;  %v4074_v4 = vld [vmem:[#allocation12 + $0x70] ss:$24 sps:$4 sm:$0xff]   ;;  %v4078_v0 = vld [vmem:[#allocation12 + $0x1bc] ss:$24 sps:$4 sm:$0xff]  }
  0xb1   :  { %1384 = vmatprep.subr.bf16.mxu0 %v4054_v54  ;;  %1409 = vmatprep.subr.bf16.mxu1 %v4056_v51  ;;  %5731 = vst [vmem:[#allocation47_spill] sm:$0xff] %v4074_v4  ;;  %5732 = vst [vmem:[#allocation48_spill] sm:$0xff] %v4078_v0  ;;  %v4080_v54 = vld [vmem:[#allocation12 + $0x44] ss:$24 sps:$4 sm:$0xff]   ;;  %v4084_v51 = vld [vmem:[#allocation12 + $0x1b8] ss:$24 sps:$4 sm:$0xff]  }
  0xb2   :  { %5733 = vst [vmem:[#allocation49_spill] sm:$0xff] %v4080_v54  ;;  %5734 = vst [vmem:[#allocation50_spill] sm:$0xff] %v4084_v51 }
  0xb4   :  { %1385 = vmatpush2.bf16.msra.mxu0 %v4060_v58  ;;  %1410 = vmatpush1.bf16.msra.mxu1 %v4062_v47  ;;  %v4086_v58 = vld [vmem:[#allocation12 + $0x40] ss:$24 sps:$4 sm:$0xff]   ;;  %v4090_v47 = vld [vmem:[#allocation12 + $0x18c] ss:$24 sps:$4 sm:$0xff]  }
  0xb5   :  { %1386 = vmatprep.subr.bf16.mxu0 %v4066_v62  ;;  %1411 = vmatprep.subr.bf16.mxu1 %v4068_v63  ;;  %5735 = vst [vmem:[#allocation51_spill] sm:$0xff] %v4086_v58  ;;  %5736 = vst [vmem:[#allocation52_spill] sm:$0xff] %v4090_v47  ;;  %v4092_v62 = vld [vmem:[#allocation12 + $0x14] ss:$24 sps:$4 sm:$0xff]   ;;  %v4096_v63 = vld [vmem:[#allocation12 + $0x188] ss:$24 sps:$4 sm:$0xff]  }
  0xb6   :  { %5737 = vst [vmem:[#allocation53_spill] sm:$0xff] %v4092_v62  ;;  %5738 = vst [vmem:[#allocation54_spill] sm:$0xff] %v4096_v63 }
  0xb8   :  { %1387 = vmatpush2.bf16.msra.mxu0 %v4072_v2  ;;  %1412 = vmatpush1.bf16.msra.mxu1 %v4074_v4  ;;  %v4098_v2 = vld [vmem:[#allocation12 + $0x10] ss:$24 sps:$4 sm:$0xff]   ;;  %v4102_v4 = vld [vmem:[#allocation12 + $0x2e4] ss:$24 sps:$4 sm:$0xff]  }
  0xb9   :  { %1388 = vmatprep.subr.bf16.mxu0 %v4078_v0  ;;  %1413 = vmatprep.subr.bf16.mxu1 %v4080_v54  ;;  %5739 = vst [vmem:[#allocation55_spill] sm:$0xff] %v4098_v2  ;;  %5740 = vst [vmem:[#allocation56_spill] sm:$0xff] %v4102_v4  ;;  %v4106_v54 = vld [vmem:[#allocation12 + $0x2e0] ss:$24 sps:$4 sm:$0xff]  }
  0xbc   :  { %1389 = vmatpush2.bf16.msra.mxu0 %v4084_v51  ;;  %1414 = vmatpush1.bf16.msra.mxu1 %v4086_v58  ;;  %v4109_v51 = vld [vmem:[#allocation12 + $0x2b4] ss:$24 sps:$4 sm:$0xff]   ;;  %v5741_v58 = vmov 0  }
  0xbd   :  { %1390 = vmatprep.subr.bf16.mxu0 %v4090_v47  ;;  %1415 = vmatprep.subr.bf16.mxu1 %v4092_v62  ;;  %v4114_v47 = vld [vmem:[#allocation12 + $0x2b0] ss:$24 sps:$4 sm:$0xff]   ;;  %v4118_v62 = vld [vmem:[#allocation12 + $0x284] ss:$24 sps:$4 sm:$0xff]  }
  0xc0   :  { %1391 = vmatpush2.bf16.msra.mxu0 %v4096_v63  ;;  %1416 = vmatpush1.bf16.msra.mxu1 %v4098_v2  ;;  %v4126_v2 = vld [vmem:[#allocation12 + $0x254] ss:$24 sps:$4 sm:$0xff]  }
  0xc1   :  { %1417 = vmatprep.subr.bf16.mxu1 %v4102_v4  ;;  %1496 = vmatprep.subr.bf16.mxu0 %v3830_v34  ;;  %v4122_v4 = vld [vmem:[#allocation12 + $0x280] ss:$24 sps:$4 sm:$0xff]  }
  0xc3   :  { %1393 = vmatmul.mubr.bf16.vlgmr.msra.gmra.mxu0 %v5741_v58 }
  0xc4   :  { %1418 = vmatpush2.bf16.msra.mxu1 %v4106_v54  ;;  %1497 = vmatpush1.bf16.msra.mxu0 %v3834_v37  ;;  %v4130_v37 = vld [vmem:[#allocation12 + $0x250] ss:$24 sps:$4 sm:$0xff]  }
  0xc5   :  { %1419 = vmatprep.subr.bf16.mxu1 %v4109_v51  ;;  %1498 = vmatprep.subr.bf16.mxu0 %v3837_v39  ;;  %v4134_v39 = vld [vmem:[#allocation12 + $0x224] ss:$24 sps:$4 sm:$0xff]  }
  0xc8   :  { %1420 = vmatpush2.bf16.msra.mxu1 %v4114_v47  ;;  %1499 = vmatpush1.bf16.msra.mxu0 %v3842_v41  ;;  %v4138_v41 = vld [vmem:[#allocation12 + $0x220] ss:$24 sps:$4 sm:$0xff]  }
  0xc9   :  { %1421 = vmatprep.subr.bf16.mxu1 %v4118_v62  ;;  %1500 = vmatprep.subr.bf16.mxu0 %v3845_v43  ;;  %v4142_v43 = vld [vmem:[#allocation12 + $0x1f4] ss:$24 sps:$4 sm:$0xff]  }
  0xcc   :  { %1422 = vmatpush2.bf16.msra.mxu1 %v4122_v4  ;;  %1501 = vmatpush1.bf16.msra.mxu0 %v3852_v46  ;;  %v4146_v46 = vld [vmem:[#allocation12 + $0x1f0] ss:$24 sps:$4 sm:$0xff]  }
  0xcd   :  { %1423 = vmatprep.subr.bf16.mxu1 %v4126_v2  ;;  %1502 = vmatprep.subr.bf16.mxu0 %v3855_v48  ;;  %v4150_v48 = vld [vmem:[#allocation12 + $0x1c4] ss:$24 sps:$4 sm:$0xff]  }
  0xd0   :  { %1424 = vmatpush2.bf16.msra.mxu1 %v4130_v37  ;;  %1503 = vmatpush1.bf16.msra.mxu0 %v3858_v50  ;;  %v4154_v50 = vld [vmem:[#allocation12 + $0x1c0] ss:$24 sps:$4 sm:$0xff]  }
  0xd1   :  { %1425 = vmatprep.subr.bf16.mxu1 %v4134_v39  ;;  %1504 = vmatprep.subr.bf16.mxu0 %v3863_v52  ;;  %v4158_v52 = vld [vmem:[#allocation12 + $0x194] ss:$24 sps:$4 sm:$0xff]  }
  0xd4   :  { %1426 = vmatpush2.bf16.msra.mxu1 %v4138_v41  ;;  %1505 = vmatpush1.bf16.msra.mxu0 %v3870_v55  ;;  %v4162_v55 = vld [vmem:[#allocation12 + $0x190] ss:$24 sps:$4 sm:$0xff]  }
  0xd5   :  { %1427 = vmatprep.subr.bf16.mxu1 %v4142_v43  ;;  %1506 = vmatprep.subr.bf16.mxu0 %v3873_v57  ;;  %v5742_v57 = vld [vmem:[#allocation36_spill] sm:$0xff] }
  0xd8   :  { %1428 = vmatpush2.bf16.msra.mxu1 %v4146_v46  ;;  %1507 = vmatpush1.bf16.msra.mxu0 %v3876_v59  ;;  %v5743_v59 = vld [vmem:[#allocation38_spill] sm:$0xff] }
  0xd9   :  { %1429 = vmatprep.subr.bf16.mxu1 %v4150_v48  ;;  %1508 = vmatprep.subr.bf16.mxu0 %v3881_v61  ;;  %v5744_v61 = vld [vmem:[#allocation40_spill] sm:$0xff] }
  0xdc   :  { %1430 = vmatpush2.bf16.msra.mxu1 %v4154_v50  ;;  %1509 = vmatpush1.bf16.msra.mxu0 %v3888_v1  ;;  %v5745_v1 = vld [vmem:[#allocation42_spill] sm:$0xff] }
  0xdd   :  { %1431 = vmatprep.subr.bf16.mxu1 %v4158_v52  ;;  %1510 = vmatprep.subr.bf16.mxu0 %v3891_v3  ;;  %v5746_v3 = vld [vmem:[#allocation44_spill] sm:$0xff] }
  0xe0   :  { %1432 = vmatpush2.bf16.msra.mxu1 %v4162_v55  ;;  %1511 = vmatpush1.bf16.msra.mxu0 %v3894_v5  ;;  %v152_v5 = vlaneseq }
  0xe1   :  { %1537 = vmatprep.subr.bf16.mxu1 %v3901_v7  ;;  %1512 = vmatprep.subr.bf16.mxu0 %v3898_v6  ;;  %v5747_v6 = vld [vmem:[#allocation46_spill] sm:$0xff] }
  0xe2   :  { %v4216_v7 = vshrl.u32 %v152_v5, 7 }
  0xe3   :  { %1434 = vmatmul.mubr.bf16.vlgmr.msra.gmra.mxu1 %v5741_v58 }
  0xe4   :  { %1538 = vmatpush1.bf16.msra.mxu1 %v3908_v9  ;;  %1513 = vmatpush2.bf16.msra.mxu0 %v3905_v8  ;;  %v5748_v9 = vld [vmem:[#allocation50_spill] sm:$0xff]  ;;  %v154_v58 = vsub.s32 0, %v4216_v7  ;;  %v158_v5 = vsub.s32 1, %v4216_v7 }
  0xe5   :  { %1539 = vmatprep.subr.bf16.mxu1 %v3914_v11  ;;  %1514 = vmatprep.subr.bf16.mxu0 %v3910_v10  ;;  %v5749_v11 = vld [vmem:[#allocation52_spill] sm:$0xff] }
  0xe8   :  { %1540 = vmatpush1.bf16.msra.mxu1 %v3919_v13  ;;  %1515 = vmatpush2.bf16.msra.mxu0 %v3917_v12  ;;  %v166_v13 = vsub.s32 3, %v4216_v7 }
  0xe9   :  { %1541 = vmatprep.subr.bf16.mxu1 %v3927_v15  ;;  %1516 = vmatprep.subr.bf16.mxu0 %v3923_v14  ;;  %v4221_v15 = vld [vmem:[#allocation10] sm:$0x3f] }
  0xec   :  { %1542 = vmatpush1.bf16.msra.mxu1 %v3934_v17  ;;  %1517 = vmatpush2.bf16.msra.mxu0 %v3930_v16 }
  0xed   :  { %1543 = vmatprep.subr.bf16.mxu1 %v3940_v19  ;;  %1518 = vmatprep.subr.bf16.mxu0 %v3936_v18 }
  0xf0   :  { %1544 = vmatpush1.bf16.msra.mxu1 %v3944_v21  ;;  %1519 = vmatpush2.bf16.msra.mxu0 %v3942_v20 }
  0xf1   :  { %1545 = vmatprep.subr.bf16.mxu1 %v3953_v23  ;;  %1520 = vmatprep.subr.bf16.mxu0 %v3949_v22 }
  0xf4   :  { %1546 = vmatpush1.bf16.msra.mxu1 %v3960_v25  ;;  %1521 = vmatpush2.bf16.msra.mxu0 %v3956_v24 }
  0xf5   :  { %1547 = vmatprep.subr.bf16.mxu1 %v3966_v27  ;;  %1522 = vmatprep.subr.bf16.mxu0 %v3962_v26 }
  0xf8   :  { %1548 = vmatpush1.bf16.msra.mxu1 %v3970_v29  ;;  %1523 = vmatpush2.bf16.msra.mxu0 %v3968_v28 }
  0xf9   :  { %1549 = vmatprep.subr.bf16.mxu1 %v3979_v31  ;;  %1524 = vmatprep.subr.bf16.mxu0 %v3975_v30 }
  0xfc   :  { %1550 = vmatpush1.bf16.msra.mxu1 %v3986_v33  ;;  %1525 = vmatpush2.bf16.msra.mxu0 %v3982_v32 }
  0xfd   :  { %1551 = vmatprep.subr.bf16.mxu1 %v3992_v36  ;;  %1526 = vmatprep.subr.bf16.mxu0 %v3988_v35 }
 0x100   :  { %1552 = vmatpush1.bf16.msra.mxu1 %v3996_v40  ;;  %1527 = vmatpush2.bf16.msra.mxu0 %v3994_v38 }
 0x101   :  { %1553 = vmatprep.subr.bf16.mxu1 %v4001_v42  ;;  %1578 = vmatprep.subr.bf16.mxu0 %v4005_v44 }
 0x104   :  { %1554 = vmatpush2.bf16.msra.mxu1 %v4008_v45 }
 0x105   :  { %1555 = vmatprep.subr.bf16.mxu1 %v4014_v49 }
 0x108   :  { %1556 = vmatpush2.bf16.msra.mxu1 %v4023_v53 }
 0x109   :  { %1557 = vmatprep.subr.bf16.mxu1 %v4029_v56 }
 0x10c   :  { %1558 = vmatpush2.bf16.msra.mxu1 %v4036_v60 }
 0x10d   :  { %1559 = vmatprep.subr.bf16.mxu1 %v5742_v57 }
 0x110   :  { %1560 = vmatpush2.bf16.msra.mxu1 %v5743_v59 }
 0x111   :  { %1561 = vmatprep.subr.bf16.mxu1 %v5744_v61 }
 0x114   :  { %1562 = vmatpush2.bf16.msra.mxu1 %v5745_v1 }
 0x115   :  { %1563 = vmatprep.subr.bf16.mxu1 %v5746_v3  ;;  %v4236_v3 = vrot.slane %v4221_v15, %v154_v58 }
 0x118   :  { %1564 = vmatpush2.bf16.msra.mxu1 %v5747_v6  ;;  %v162_v6 = vsub.s32 2, %v4216_v7 }
 0x119   :  { %1565 = vmatprep.subr.bf16.mxu1 %v4078_v0  ;;  %v4228_v0 = vrot.slane %v4221_v15, %v166_v13  ;;  %v4247_v13 = vrot.slane %v4221_v15, %v158_v5 }
 0x11c   :  { %1566 = vmatpush2.bf16.msra.mxu1 %v5748_v9 }
 0x11d   :  { %1567 = vmatprep.subr.bf16.mxu1 %v5749_v11 }
 0x120   :  { %1568 = vmatpush2.bf16.msra.mxu1 %v4096_v63  ;;  %v4241_v63 = vrot.slane %v4221_v15, %v162_v6 }
 0x121   :  { %1675 = vmatprep.subr.bf16.mxu1 %v3830_v34 }
 0x123   :  { %v4231_v9 = vpop.f32.mrf.mxu1  ;;  %v4233_v11 = vpop.f32.mrf.mxu0 }
 0x125   :  { %v555_v1 = vpop.f32.mrf.mxu1  ;;  %v4238_v61 = vpop.f32.mrf.mxu0 }
 0x126   :  { %v4244_v34 = vadd.f32 %v555_v1, %v4228_v0 }
 0x127   :  { %v557_v59 = vpop.f32.mrf.mxu1  ;;  %v484_v57 = vpop.f32.mrf.mxu0 }
 0x128   :  { %5750 = vst [vmem:[#allocation57_spill] sm:$0xff] %v4244_v34  ;;  %v4250_v60 = vadd.f32 %v557_v59, %v4241_v63  ;;  %v4253_v58 = vadd.f32 %v484_v57, %v4236_v3 }
 0x129   :  { %v559_v56 = vpop.f32.mrf.mxu1  ;;  %v486_v53 = vpop.f32.mrf.mxu0 }
 0x12a   :  { %5751 = vst [vmem:[#allocation58_spill] sm:$0xff] %v4250_v60  ;;  %5752 = vst [vmem:[#allocation59_spill] sm:$0xff] %v4253_v58  ;;  %v4256_v49 = vadd.f32 %v559_v56, %v4228_v0  ;;  %v4259_v6 = vadd.f32 %v486_v53, %v4247_v13 }
 0x12b   :  { %v490_v1 = vpop.f32.mrf.mxu0  ;;  %v563_v34 = vpop.f32.mrf.mxu1 }
 0x12c   :  { %5753 = vst [vmem:[#allocation60_spill] sm:$0xff] %v4256_v49  ;;  %5754 = vst [vmem:[#allocation61_spill] sm:$0xff] %v4259_v6  ;;  %v4262_v5 = vadd.f32 %v490_v1, %v4236_v3  ;;  %v4265_v45 = vadd.f32 %v563_v34, %v4241_v63 }
 0x12d   :  { %v492_v59 = vpop.f32.mrf.mxu0  ;;  %v565_v60 = vpop.f32.mrf.mxu1 }
 0x12e   :  { %5755 = vst [vmem:[#allocation62_spill] sm:$0xff] %v4262_v5  ;;  %5756 = vst [vmem:[#allocation63_spill] sm:$0xff] %v4265_v45  ;;  %v4268_v57 = vadd.f32 %v492_v59, %v4247_v13  ;;  %v4271_v58 = vadd.f32 %v565_v60, %v4228_v0 }
 0x12f   :  { %v494_v56 = vpop.f32.mrf.mxu0  ;;  %v567_v49 = vpop.f32.mrf.mxu1 }
 0x130   :  { %5757 = vst [vmem:[#allocation64_spill] sm:$0xff] %v4268_v57  ;;  %5758 = vst [vmem:[#allocation65_spill] sm:$0xff] %v4271_v58  ;;  %v4274_v53 = vadd.f32 %v494_v56, %v4236_v3  ;;  %v4277_v6 = vadd.f32 %v567_v49, %v4241_v63 }
 0x131   :  { %v496_v1 = vpop.f32.mrf.mxu0  ;;  %v569_v5 = vpop.f32.mrf.mxu1 }
 0x132   :  { %5759 = vst [vmem:[#allocation66_spill] sm:$0xff] %v4274_v53  ;;  %5760 = vst [vmem:[#allocation67_spill] sm:$0xff] %v4277_v6  ;;  %v4280_v34 = vadd.f32 %v496_v1, %v4247_v13  ;;  %v4283_v45 = vadd.f32 %v569_v5, %v4228_v0 }
 0x133   :  { %v500_v59 = vpop.f32.mrf.mxu0  ;;  %v573_v57 = vpop.f32.mrf.mxu1 }
 0x134   :  { %5761 = vst [vmem:[#allocation68_spill] sm:$0xff] %v4280_v34  ;;  %5762 = vst [vmem:[#allocation69_spill] sm:$0xff] %v4283_v45  ;;  %v4286_v60 = vadd.f32 %v500_v59, %v4236_v3  ;;  %v4289_v58 = vadd.f32 %v573_v57, %v4241_v63 }
 0x135   :  { %v502_v56 = vpop.f32.mrf.mxu0  ;;  %v575_v53 = vpop.f32.mrf.mxu1 }
 0x136   :  { %5763 = vst [vmem:[#allocation70_spill] sm:$0xff] %v4286_v60  ;;  %5764 = vst [vmem:[#allocation71_spill] sm:$0xff] %v4289_v58  ;;  %v4292_v49 = vadd.f32 %v502_v56, %v4247_v13  ;;  %v4295_v6 = vadd.f32 %v575_v53, %v4228_v0 }
 0x137   :  { %v504_v1 = vpop.f32.mrf.mxu0  ;;  %v577_v34 = vpop.f32.mrf.mxu1 }
 0x138   :  { %5765 = vst [vmem:[#allocation72_spill] sm:$0xff] %v4292_v49  ;;  %5766 = vst [vmem:[#allocation73_spill] sm:$0xff] %v4295_v6  ;;  %v4298_v5 = vadd.f32 %v504_v1, %v4236_v3  ;;  %v4301_v45 = vadd.f32 %v577_v34, %v4241_v63  ;;  %v170_v6 = vsub.s32 4, %v4216_v7 }
 0x139   :  { %v506_v59 = vpop.f32.mrf.mxu0  ;;  %v579_v60 = vpop.f32.mrf.mxu1 }
 0x13a   :  { %5767 = vst [vmem:[#allocation74_spill] sm:$0xff] %v4298_v5  ;;  %5768 = vst [vmem:[#allocation75_spill] sm:$0xff] %v4301_v45  ;;  %v4304_v57 = vadd.f32 %v506_v59, %v4247_v13  ;;  %v4307_v58 = vadd.f32 %v579_v60, %v4228_v0  ;;  %v174_v59 = vsub.s32 5, %v4216_v7 }
 0x13b   :  { %v510_v56 = vpop.f32.mrf.mxu0  ;;  %v583_v49 = vpop.f32.mrf.mxu1 }
 0x13c   :  { %5769 = vst [vmem:[#allocation76_spill] sm:$0xff] %v4304_v57  ;;  %5770 = vst [vmem:[#allocation77_spill] sm:$0xff] %v4307_v58  ;;  %v4310_v53 = vadd.f32 %v510_v56, %v4236_v3  ;;  %v4314_v1 = vadd.f32 %v583_v49, %v4241_v63  ;;  %v4336_v7 = vrot.slane %v4221_v15, %v174_v59 }
 0x13d   :  { %v512_v34 = vpop.f32.mrf.mxu0  ;;  %v585_v45 = vpop.f32.mrf.mxu1 }
 0x13e   :  { %5771 = vst [vmem:[#allocation78_spill] sm:$0xff] %v4310_v53  ;;  %5772 = vst [vmem:[#allocation79_spill] sm:$0xff] %v4314_v1  ;;  %v4317_v5 = vadd.f32 %v512_v34, %v4247_v13  ;;  %v4321_v60 = vadd.f32 %v585_v45, %v4228_v0  ;;  %v4327_v53 = vrot.slane %v4221_v15, %v170_v6 }
 0x13f   :  { %v514_v57 = vpop.f32.mrf.mxu0  ;;  %v587_v58 = vpop.f32.mrf.mxu1 }
 0x140   :  { %5773 = vst [vmem:[#allocation80_spill] sm:$0xff] %v4317_v5  ;;  %5774 = vst [vmem:[#allocation81_spill] sm:$0xff] %v4321_v60  ;;  %v4324_v56 = vadd.f32 %v514_v57, %v4236_v3  ;;  %v4330_v49 = vadd.f32 %v587_v58, %v4241_v63 }
 0x141   :  { %v516_v1 = vpop.f32.mrf.mxu0 }
 0x142   :  { %5775 = vst [vmem:[#allocation82_spill] sm:$0xff] %v4324_v56  ;;  %5776 = vst [vmem:[#allocation83_spill] sm:$0xff] %v4330_v49  ;;  %v4333_v34 = vadd.f32 %v516_v1, %v4247_v13 }
 0x143   :  { %v626_v45 = vpop.f32.mrf.mxu0 }
 0x144   :  { %5777 = vst [vmem:[#allocation84_spill] sm:$0xff] %v4333_v34  ;;  %v4339_v5 = vadd.f32 %v626_v45, %v4327_v53 }
 0x145   :  { %v628_v60 = vpop.f32.mrf.mxu0 }
 0x146   :  { %5778 = vst [vmem:[#allocation85_spill] sm:$0xff] %v4339_v5  ;;  %v4342_v57 = vadd.f32 %v628_v60, %v4336_v7 }
 0x147   :  { %v630_v6 = vpop.f32.mrf.mxu0 }
 0x148   :  { %5779 = vst [vmem:[#allocation86_spill] sm:$0xff] %v4342_v57  ;;  %v4345_v56 = vadd.f32 %v630_v6, %v4327_v53 }
 0x149   :  { %v632_v58 = vpop.f32.mrf.mxu0 }
 0x14a   :  { %5780 = vst [vmem:[#allocation87_spill] sm:$0xff] %v4345_v56  ;;  %v4348_v49 = vadd.f32 %v632_v58, %v4336_v7 }
 0x14b   :  { %v636_v1 = vpop.f32.mrf.mxu0 }
 0x14c   :  { %5781 = vst [vmem:[#allocation88_spill] sm:$0xff] %v4348_v49  ;;  %v4351_v15 = vadd.f32 %v636_v1, %v4327_v53 }
 0x14d   :  { %v638_v59 = vpop.f32.mrf.mxu0 }
 0x14e   :  { %5782 = vst [vmem:[#allocation89_spill] sm:$0xff] %v4351_v15  ;;  %v4354_v45 = vadd.f32 %v638_v59, %v4336_v7 }
 0x14f   :  { %v640_v5 = vpop.f32.mrf.mxu0 }
 0x150   :  { %5783 = vst [vmem:[#allocation90_spill] sm:$0xff] %v4354_v45  ;;  %v4357_v60 = vadd.f32 %v640_v5, %v4327_v53 }
 0x151   :  { %v642_v57 = vpop.f32.mrf.mxu0 }
 0x152   :  { %5784 = vst [vmem:[#allocation91_spill] sm:$0xff] %v4357_v60  ;;  %v4360_v6 = vadd.f32 %v642_v57, %v4336_v7  ;;  %v589_v60 = vpop.f32.mrf.mxu1 }
 0x153   :  { %v646_v34 = vpop.f32.mrf.mxu0 }
 0x154   :  { %5785 = vst [vmem:[#allocation92_spill] sm:$0xff] %v4360_v6  ;;  %v4363_v58 = vadd.f32 %v646_v34, %v4327_v53 }
 0x155   :  { %v648_v49 = vpop.f32.mrf.mxu0 }
 0x156   :  { %5786 = vst [vmem:[#allocation93_spill] sm:$0xff] %v4363_v58  ;;  %v4366_v1 = vadd.f32 %v648_v49, %v4336_v7  ;;  %v481_v49 = vadd.f32 %v4233_v11, %v4236_v3  ;;  %v4387_v3 = vld [vmem:[%s5499_s5] ss:$0 sm:$0xff] }
 0x157   :  { %v650_v56 = vpop.f32.mrf.mxu0  ;;  %5792 = vst [vmem:[#allocation99_spill] sm:$0xff] %v4387_v3 }
 0x158   :  { %5787 = vst [vmem:[#allocation94_spill] sm:$0xff] %v4366_v1  ;;  %v4369_v59 = vadd.f32 %v650_v56, %v4327_v53 }
 0x159   :  { %v652_v45 = vpop.f32.mrf.mxu0 }
 0x15a   :  { %5788 = vst [vmem:[#allocation95_spill] sm:$0xff] %v4369_v59  ;;  %v4372_v5 = vadd.f32 %v652_v45, %v4336_v7 }
 0x15b   :  { %v656_v15 = vpop.f32.mrf.mxu0 }
 0x15c   :  { %5789 = vst [vmem:[#allocation96_spill] sm:$0xff] %v4372_v5  ;;  %v4375_v57 = vadd.f32 %v656_v15, %v4327_v53  ;;  %v483_v5 = vadd.f32 %v4238_v61, %v4247_v13 }
 0x15d   :  { %v658_v6 = vpop.f32.mrf.mxu0 }
 0x15e   :  { %5790 = vst [vmem:[#allocation97_spill] sm:$0xff] %v4375_v57  ;;  %v4378_v34 = vadd.f32 %v658_v6, %v4336_v7 }
 0x15f   :  { %v660_v6 = vpop.f32.mrf.mxu0 }
 0x160   :  { %5791 = vst [vmem:[#allocation98_spill] sm:$0xff] %v4378_v34 }
 0x161   :  { %v662_v34 = vpop.f32.mrf.mxu0 }
 0x163   :  { %v1353_v1 = vpop.f32.mrf.mxu1 }
 0x164   :  { %v1445_v58 = vadd.f32 %v1353_v1, %v481_v49 }
 0x165   :  { %v1355_v56 = vpop.f32.mrf.mxu1 }
 0x166   :  { %v2967_v59 = vmul.f32 -1.442695, %v1445_v58  ;;  %v1452_v15 = vadd.f32 %v1355_v56, %v483_v5  ;;  %v590_v58 = vadd.f32 %v589_v60, %v4228_v0  ;;  %v4393_v0 = vld [vmem:[#allocation7] sm:$0xff] }
 0x167   :  { %v1357_v42 = vpop.f32.mrf.mxu1  ;;  %5793 = vst [vmem:[#allocation100_spill] sm:$0xff] %v4393_v0  ;;  %vm721_vm0 = vcmp.gt.f32.partialorder %v4393_v0, 0.0  ;;  %v5812_v0 = vld [vmem:[#allocation49_spill] sm:$0xff] }
 0x168   :  { %3251 = vpow2.f32 %v2967_v59  ;;  %v2968_v57 = vmul.f32 -1.442695, %v1452_v15  ;;  %vm4422_vm3 = vmpackc.low %vm721_vm0, %vm721_vm0 }
 0x169   :  { %v1358_v45 = vpop.f32.mrf.mxu1 }
 0x16a   :  { %3253 = vpow2.f32 %v2968_v57 }
 0x175   :  { %v3252_v40 = vpop.eup %3251 }
 0x176   :  { %v1449_v36 = vadd.f32 1.0, %v3252_v40  ;;  %v554_v40 = vadd.f32 %v4231_v9, %v4241_v63 }
 0x177   :  { %v3254_v42 = vpop.eup %3253 }
 0x178   :  { %3255 = vrcp.f32 %v1449_v36  ;;  %v1456_v57 = vadd.f32 1.0, %v3254_v42  ;;  %v661_v42 = vadd.f32 %v660_v6, %v4327_v53 }
 0x183   :  { %v1394_v11 = vpop.f32.mrf.mxu0 }
 0x184   :  { %v1459_v1 = vadd.f32 %v4387_v3, %v1394_v11 }
 0x185   :  { %v3256_v61 = vpop.eup %3255  ;;  %v1396_v13 = vpop.f32.mrf.mxu0 }
 0x186   :  { %v1460_v59 = vmul.f32 %v3256_v61, %v1459_v1  ;;  %v1469_v36 = vadd.f32 %v1396_v13, %v590_v58  ;;  %v4405_v61 = vld [vmem:[%s5499_s5 + $0x1] ss:$0 sm:$0xff] }
 0x187   :  { %v1398_v5 = vpop.f32.mrf.mxu0 }
 0x188   :  { %v1461_v49 = vadd.f32 %v1460_v59, %v554_v40  ;;  %v2969_v56 = vmul.f32 -1.442695, %v1469_v36  ;;  %v663_v5 = vadd.f32 %v662_v34, %v4336_v7  ;;  %v5842_v34 = vld [vmem:[#allocation52_spill] sm:$0xff] }
 0x189   :  { %v1399_v45 = vpop.f32.mrf.mxu0 }
 0x18a   :  { %3257 = vtanh.f32 %v1461_v49 }
 0x18b   :  { %3259 = vpow2.f32 %v2969_v56  ;;  %v4409_v56 = vld [vmem:[#allocation7 + $0x38] sm:$0xff] }
 0x18c   :  { %3261 = vrcp.f32 %v1456_v57  ;;  %5794 = vst [vmem:[#allocation101_spill] sm:$0xff] %v4409_v56  ;;  %vm728_vm1 = vcmp.gt.f32.partialorder %v4409_v56, 0.0  ;;  %v4777_v56 = vld [vmem:[#allocation12 + $0x24c] ss:$24 sps:$4 sm:$0xff]  }
 0x18d   :  { %vm2971_vm2 = vmpackc.low %vm728_vm1, %vm728_vm1 }
 0x197   :  { %v3258_v15 = vpop.eup %3257 }
 0x198   :  { %v3260_v33 = vpop.eup %3259  ;;  %v1463_v60 = vsub.f32 0.0, %v3258_v15 }
 0x199   :  { %v3262_v11 = vpop.eup %3261  ;;  %v1473_v3 = vadd.f32 1.0, %v3260_v33 }
 0x19a   :  { %v1464_v31 = vmul.f32 %v3262_v11, %v1463_v60 }
 0x19b   :  { %3263 = vrcp.f32 %v1473_v3 }
 0x19c   :  { %v1465_v63 = vadd.f32 %v3258_v15, %v1464_v31 }
 0x19e   :  { %v4398_v9 = vsel %vm721_vm0, %v1465_v63, 0.0 }
 0x19f   :  { %1491 = vst [vmem:[#allocation13] sm:$0xff] %v4398_v9 }
 0x1a3   :  { %v1435_v58 = vpop.f32.mrf.mxu1 }
 0x1a4   :  { %v1476_v1 = vadd.f32 %v1435_v58, %v661_v42  ;;  %v4426_v42 = vpack.c.bf16 %v1465_v63, %v1465_v63  ;;  %v5797_v58 = vld [vmem:[#allocation27_spill] sm:$0xff] }
 0x1a5   :  { %v1437_v33 = vpop.f32.mrf.mxu1  ;;  %v4439_v63 = vld [vmem:[#allocation12 + $0x124] ss:$24 sps:$4 sm:$0xff]  }
 0x1a6   :  { %v2970_v13 = vmul.f32 -1.442695, %v1476_v1  ;;  %v1483_v31 = vadd.f32 %v4405_v61, %v1437_v33  ;;  %v5798_v1 = vld [vmem:[#allocation29_spill] sm:$0xff] }
 0x1a7   :  { %v1439_v40 = vpop.f32.mrf.mxu1  ;;  %v4436_v33 = vld [vmem:[#allocation12 + $0x150] ss:$24 sps:$4 sm:$0xff]  }
 0x1a8   :  { %3265 = vpow2.f32 %v2970_v13  ;;  %v3264_v3 = vpop.eup %3263  ;;  %v5799_v13 = vld [vmem:[#allocation31_spill] sm:$0xff]  ;;  %v5800_v40 = vld [vmem:[#allocation33_spill] sm:$0xff] }
 0x1a9   :  { %v1440_v59 = vpop.f32.mrf.mxu1  ;;  %v1484_v36 = vmul.f32 %v3264_v3, %v1483_v31  ;;  %v4444_v31 = vld [vmem:[#allocation12 + $0x120] ss:$24 sps:$4 sm:$0xff]   ;;  %v4447_v3 = vld [vmem:[#allocation12 + $0xf4] ss:$24 sps:$4 sm:$0xff]  }
 0x1aa   :  { %v5801_v59 = vld [vmem:[#allocation35_spill] sm:$0xff] }
 0x1ab   :  { %v1485_v57 = vadd.f32 %v1484_v36, %v663_v5  ;;  %v5802_v36 = vld [vmem:[#allocation37_spill] sm:$0xff] }
 0x1ac   :  { %v4452_v5 = vld [vmem:[#allocation12 + $0xf0] ss:$24 sps:$4 sm:$0xff]  }
 0x1ad   :  { %3267 = vtanh.f32 %v1485_v57  ;;  %v4455_v57 = vld [vmem:[#allocation12 + $0xc4] ss:$24 sps:$4 sm:$0xff]  }
 0x1b5   :  { %v3266_v53 = vpop.eup %3265 }
 0x1b6   :  { %v1480_v6 = vadd.f32 1.0, %v3266_v53  ;;  %v5803_v53 = vld [vmem:[#allocation39_spill] sm:$0xff] }
 0x1b8   :  { %3269 = vrcp.f32 %v1480_v6  ;;  %v5804_v6 = vld [vmem:[#allocation41_spill] sm:$0xff] }
 0x1ba   :  { %v3268_v49 = vpop.eup %3267 }
 0x1bb   :  { %v1487_v45 = vsub.f32 0.0, %v3268_v49 }
 0x1c5   :  { %v3270_v15 = vpop.eup %3269 }
 0x1c6   :  { %v1488_v60 = vmul.f32 %v3270_v15, %v1487_v45  ;;  %v4463_v45 = vld [vmem:[#allocation12 + $0x94] ss:$24 sps:$4 sm:$0xff]   ;;  %v5807_v15 = vld [vmem:[#allocation43_spill] sm:$0xff] }
 0x1c7   :  { %5806 = vst [vmem:[#allocation29_spill] sm:$0xff] %v4463_v45 }
 0x1c8   :  { %v4412_v11 = vadd.f32 %v3268_v49, %v1488_v60  ;;  %v4460_v49 = vld [vmem:[#allocation12 + $0xc0] ss:$24 sps:$4 sm:$0xff]   ;;  %v5808_v60 = vld [vmem:[#allocation45_spill] sm:$0xff] }
 0x1c9   :  { %5805 = vst [vmem:[#allocation27_spill] sm:$0xff] %v4460_v49 }
 0x1ca   :  { %v2972_v7 = vpack.c.bf16 %v4412_v11, %v4412_v11 }
 0x1cc   :  { %2973 = vmatprep.mubr.msk.bf16.mxu0 %vm2971_vm2, %v2972_v7  ;;  %2979 = vmatprep.mubr.msk.bf16.mxu1 %vm2971_vm2, %v2972_v7 }
 0x1cd   :  { %2976 = vmatmul.mubr.msk.bf16.vlgmr.msra.gmra.mxu0 %vm4422_vm3, %v4426_v42  ;;  %2982 = vmatmul.mubr.msk.bf16.vlgmr.msra.gmra.mxu1 %vm4422_vm3, %v4426_v42 }
 0x1ce   :  { %1579 = vmatpush1.bf16.msra.mxu0 %v5797_v58  ;;  %2985 = vmatprep.mubr.msk.bf16.mxu0 %vm2971_vm2, %v2972_v7  ;;  %v4468_v7 = vld [vmem:[#allocation12 + $0x90] ss:$24 sps:$4 sm:$0xff]   ;;  %v4471_v58 = vld [vmem:[#allocation12 + $0x64] ss:$24 sps:$4 sm:$0xff]  }
 0x1cf   :  { %1580 = vmatprep.subr.bf16.mxu0 %v5798_v1  ;;  %1676 = vmatpush1.bf16.msra.mxu1 %v4436_v33  ;;  %5809 = vst [vmem:[#allocation31_spill] sm:$0xff] %v4468_v7  ;;  %5810 = vst [vmem:[#allocation33_spill] sm:$0xff] %v4471_v58  ;;  %v5811_v1 = vld [vmem:[#allocation47_spill] sm:$0xff] }
 0x1d0   :  { %1677 = vmatprep.subr.bf16.mxu1 %v4439_v63 }
 0x1d2   :  { %1581 = vmatpush1.bf16.msra.mxu0 %v5799_v13 }
 0x1d3   :  { %1582 = vmatprep.subr.bf16.mxu0 %v5800_v40  ;;  %1678 = vmatpush1.bf16.msra.mxu1 %v4444_v31 }
 0x1d4   :  { %1679 = vmatprep.subr.bf16.mxu1 %v4447_v3 }
 0x1d6   :  { %1583 = vmatpush1.bf16.msra.mxu0 %v5801_v59 }
 0x1d7   :  { %1584 = vmatprep.subr.bf16.mxu0 %v5802_v36  ;;  %1680 = vmatpush1.bf16.msra.mxu1 %v4452_v5 }
 0x1d8   :  { %1681 = vmatprep.subr.bf16.mxu1 %v4455_v57 }
 0x1da   :  { %1585 = vmatpush1.bf16.msra.mxu0 %v5803_v53 }
 0x1db   :  { %1586 = vmatprep.subr.bf16.mxu0 %v5804_v6  ;;  %1682 = vmatpush1.bf16.msra.mxu1 %v4460_v49  ;;  %v4476_v49 = vld [vmem:[#allocation12 + $0x60] ss:$24 sps:$4 sm:$0xff]  }
 0x1dc   :  { %1683 = vmatprep.subr.bf16.mxu1 %v4463_v45  ;;  %5813 = vst [vmem:[#allocation35_spill] sm:$0xff] %v4476_v49  ;;  %v4479_v45 = vld [vmem:[#allocation12 + $0x34] ss:$24 sps:$4 sm:$0xff]  }
 0x1dd   :  { %5814 = vst [vmem:[#allocation37_spill] sm:$0xff] %v4479_v45 }
 0x1de   :  { %1587 = vmatpush1.bf16.msra.mxu0 %v5807_v15  ;;  %v5816_v15 = vld [vmem:[#allocation53_spill] sm:$0xff] }
 0x1df   :  { %1588 = vmatprep.subr.bf16.mxu0 %v5808_v60  ;;  %1684 = vmatpush1.bf16.msra.mxu1 %v4468_v7  ;;  %v5815_v60 = vld [vmem:[#allocation51_spill] sm:$0xff]  ;;  %v4484_v7 = vld [vmem:[#allocation12 + $0x30] ss:$24 sps:$4 sm:$0xff]  }
 0x1e0   :  { %1685 = vmatprep.subr.bf16.mxu1 %v4471_v58  ;;  %v4487_v58 = vld [vmem:[#allocation12 + $0x4] ss:$24 sps:$4 sm:$0xff]  }
 0x1e2   :  { %1589 = vmatpush1.bf16.msra.mxu0 %v5811_v1  ;;  %v5818_v1 = vld [vmem:[#allocation56_spill] sm:$0xff] }
 0x1e3   :  { %1590 = vmatprep.subr.bf16.mxu0 %v5812_v0  ;;  %1686 = vmatpush1.bf16.msra.mxu1 %v4476_v49  ;;  %v5817_v0 = vld [vmem:[#allocation55_spill] sm:$0xff] }
 0x1e4   :  { %1687 = vmatprep.subr.bf16.mxu1 %v4479_v45  ;;  %v4492_v49 = vld [vmem:[#allocation12] ss:$24 sps:$4 sm:$0xff]   ;;  %v4495_v45 = vld [vmem:[#allocation12 + $0x2d4] ss:$24 sps:$4 sm:$0xff]  }
 0x1e6   :  { %1591 = vmatpush1.bf16.msra.mxu0 %v5815_v60 }
 0x1e7   :  { %1592 = vmatprep.subr.bf16.mxu0 %v5816_v15  ;;  %1688 = vmatpush1.bf16.msra.mxu1 %v4484_v7 }
 0x1e8   :  { %1689 = vmatprep.subr.bf16.mxu1 %v4487_v58 }
 0x1ea   :  { %1593 = vmatpush1.bf16.msra.mxu0 %v5817_v0 }
 0x1eb   :  { %1594 = vmatprep.subr.bf16.mxu0 %v5818_v1  ;;  %1690 = vmatpush1.bf16.msra.mxu1 %v4492_v49 }
 0x1ec   :  { %1691 = vmatprep.subr.bf16.mxu1 %v4495_v45 }
 0x1ee   :  { %1595 = vmatpush2.bf16.msra.mxu0 %v4106_v54 }
 0x1ef   :  { %1596 = vmatprep.subr.bf16.mxu0 %v4109_v51  ;;  %1692 = vmatpush2.bf16.msra.mxu1 %v3905_v8  ;;  %v4527_v8 = vld [vmem:[#allocation12 + $0x15c] ss:$24 sps:$4 sm:$0xff]  }
 0x1f0   :  { %1693 = vmatprep.subr.bf16.mxu1 %v3910_v10  ;;  %5819 = vst [vmem:[#allocation39_spill] sm:$0xff] %v4527_v8  ;;  %v4535_v10 = vld [vmem:[#allocation12 + $0x158] ss:$24 sps:$4 sm:$0xff]  }
 0x1f1   :  { %5820 = vst [vmem:[#allocation41_spill] sm:$0xff] %v4535_v10 }
 0x1f2   :  { %1597 = vmatpush2.bf16.msra.mxu0 %v4114_v47 }
 0x1f3   :  { %1598 = vmatprep.subr.bf16.mxu0 %v4118_v62  ;;  %1694 = vmatpush2.bf16.msra.mxu1 %v3917_v12  ;;  %v4538_v12 = vld [vmem:[#allocation12 + $0x12c] ss:$24 sps:$4 sm:$0xff]  }
 0x1f4   :  { %1695 = vmatprep.subr.bf16.mxu1 %v3923_v14  ;;  %5821 = vst [vmem:[#allocation51_spill] sm:$0xff] %v4538_v12  ;;  %v4541_v14 = vld [vmem:[#allocation12 + $0x128] ss:$24 sps:$4 sm:$0xff]  }
 0x1f5   :  { %5822 = vst [vmem:[#allocation53_spill] sm:$0xff] %v4541_v14 }
 0x1f6   :  { %1599 = vmatpush2.bf16.msra.mxu0 %v4122_v4 }
 0x1f7   :  { %1600 = vmatprep.subr.bf16.mxu0 %v4126_v2  ;;  %1696 = vmatpush2.bf16.msra.mxu1 %v3930_v16  ;;  %v4544_v16 = vld [vmem:[#allocation12 + $0xfc] ss:$24 sps:$4 sm:$0xff]  }
 0x1f8   :  { %1697 = vmatprep.subr.bf16.mxu1 %v3936_v18  ;;  %5823 = vst [vmem:[#allocation55_spill] sm:$0xff] %v4544_v16  ;;  %v5824_v18 = vld [vmem:[#allocation21_spill] sm:$0xff] }
 0x1fa   :  { %1601 = vmatpush2.bf16.msra.mxu0 %v4130_v37 }
 0x1fb   :  { %1602 = vmatprep.subr.bf16.mxu0 %v4134_v39  ;;  %1698 = vmatpush2.bf16.msra.mxu1 %v3942_v20  ;;  %v5825_v20 = vld [vmem:[#allocation22_spill] sm:$0xff] }
 0x1fc   :  { %1699 = vmatprep.subr.bf16.mxu1 %v3949_v22  ;;  %v5826_v22 = vld [vmem:[#allocation23_spill] sm:$0xff] }
 0x1fe   :  { %1603 = vmatpush2.bf16.msra.mxu0 %v4138_v41 }
 0x1ff   :  { %1604 = vmatprep.subr.bf16.mxu0 %v4142_v43  ;;  %1700 = vmatpush2.bf16.msra.mxu1 %v3956_v24  ;;  %v5827_v24 = vld [vmem:[#allocation24_spill] sm:$0xff] }
 0x200   :  { %1701 = vmatprep.subr.bf16.mxu1 %v3962_v26  ;;  %v5833_v26 = vld [vmem:[#allocation34_spill] sm:$0xff] }
 0x202   :  { %1605 = vmatpush2.bf16.msra.mxu0 %v4146_v46 }
 0x203   :  { %1606 = vmatprep.subr.bf16.mxu0 %v4150_v48  ;;  %1702 = vmatpush2.bf16.msra.mxu1 %v3968_v28  ;;  %v5835_v28 = vld [vmem:[#allocation38_spill] sm:$0xff] }
 0x204   :  { %1703 = vmatprep.subr.bf16.mxu1 %v3975_v30  ;;  %v5837_v30 = vld [vmem:[#allocation42_spill] sm:$0xff] }
 0x206   :  { %1607 = vmatpush2.bf16.msra.mxu0 %v4154_v50 }
 0x207   :  { %1608 = vmatprep.subr.bf16.mxu0 %v4158_v52  ;;  %1704 = vmatpush2.bf16.msra.mxu1 %v3982_v32  ;;  %v5838_v32 = vld [vmem:[#allocation44_spill] sm:$0xff] }
 0x208   :  { %1705 = vmatprep.subr.bf16.mxu1 %v3988_v35  ;;  %v5839_v35 = vld [vmem:[#allocation46_spill] sm:$0xff] }
 0x20a   :  { %1609 = vmatpush2.bf16.msra.mxu0 %v4162_v55 }
 0x20b   :  { %1716 = vmatprep.subr.bf16.mxu0 %v4527_v8  ;;  %1706 = vmatpush2.bf16.msra.mxu1 %v3994_v38  ;;  %v5840_v38 = vld [vmem:[#allocation48_spill] sm:$0xff] }
 0x20c   :  { %1757 = vmatprep.subr.bf16.mxu1 %v4005_v44  ;;  %v5841_v44 = vld [vmem:[#allocation50_spill] sm:$0xff] }
 0x20d   :  { %2988 = vmatmul.mubr.msk.bf16.vlgmr.msra.gmra.mxu0 %vm4422_vm3, %v4426_v42  ;;  %v5843_v42 = vld [vmem:[#allocation54_spill] sm:$0xff] }
 0x20e   :  { %1717 = vmatpush1.bf16.msra.mxu0 %v4535_v10 }
 0x20f   :  { %1718 = vmatprep.subr.bf16.mxu0 %v4538_v12 }
 0x212   :  { %1719 = vmatpush1.bf16.msra.mxu0 %v4541_v14 }
 0x213   :  { %1720 = vmatprep.subr.bf16.mxu0 %v4544_v16 }
 0x216   :  { %1721 = vmatpush1.bf16.msra.mxu0 %v3934_v17  ;;  %v5828_v17 = vld [vmem:[#allocation25_spill] sm:$0xff] }
 0x217   :  { %1722 = vmatprep.subr.bf16.mxu0 %v3940_v19  ;;  %v5829_v19 = vld [vmem:[#allocation26_spill] sm:$0xff] }
 0x21a   :  { %1723 = vmatpush1.bf16.msra.mxu0 %v3944_v21  ;;  %v5830_v21 = vld [vmem:[#allocation28_spill] sm:$0xff] }
 0x21b   :  { %1724 = vmatprep.subr.bf16.mxu0 %v3953_v23  ;;  %v5831_v23 = vld [vmem:[#allocation30_spill] sm:$0xff] }
 0x21e   :  { %1725 = vmatpush1.bf16.msra.mxu0 %v3960_v25  ;;  %v5832_v25 = vld [vmem:[#allocation32_spill] sm:$0xff] }
 0x21f   :  { %1726 = vmatprep.subr.bf16.mxu0 %v3966_v27  ;;  %v5834_v27 = vld [vmem:[#allocation36_spill] sm:$0xff] }
 0x222   :  { %1727 = vmatpush1.bf16.msra.mxu0 %v3970_v29  ;;  %v5836_v29 = vld [vmem:[#allocation40_spill] sm:$0xff] }
 0x223   :  { %1728 = vmatprep.subr.bf16.mxu0 %v5824_v18  ;;  %v4574_v18 = vld [vmem:[#allocation12 + $0x154] ss:$24 sps:$4 sm:$0xff]  }
 0x224   :  { %5844 = vst [vmem:[#allocation56_spill] sm:$0xff] %v4574_v18 }
 0x226   :  { %1729 = vmatpush1.bf16.msra.mxu0 %v5825_v20 }
 0x227   :  { %1730 = vmatprep.subr.bf16.mxu0 %v5826_v22 }
 0x22a   :  { %1731 = vmatpush1.bf16.msra.mxu0 %v5827_v24  ;;  %v5845_v24 = vld [vmem:[#allocation59_spill] sm:$0xff] }
 0x22b   :  { %1732 = vmatprep.subr.bf16.mxu0 %v5828_v17 }
 0x22e   :  { %1733 = vmatpush2.bf16.msra.mxu0 %v5829_v19 }
 0x22f   :  { %1734 = vmatprep.subr.bf16.mxu0 %v5830_v21 }
 0x232   :  { %1735 = vmatpush2.bf16.msra.mxu0 %v5831_v23 }
 0x233   :  { %1736 = vmatprep.subr.bf16.mxu0 %v5832_v25 }
 0x236   :  { %1737 = vmatpush2.bf16.msra.mxu0 %v5833_v26 }
 0x237   :  { %1738 = vmatprep.subr.bf16.mxu0 %v5834_v27 }
 0x23a   :  { %1739 = vmatpush2.bf16.msra.mxu0 %v5835_v28 }
 0x23b   :  { %1740 = vmatprep.subr.bf16.mxu0 %v5836_v29  ;;  %v5846_v29 = vld [vmem:[#allocation61_spill] sm:$0xff] }
 0x23e   :  { %1741 = vmatpush2.bf16.msra.mxu0 %v5837_v30 }
 0x23f   :  { %1742 = vmatprep.subr.bf16.mxu0 %v5838_v32 }
 0x242   :  { %1743 = vmatpush2.bf16.msra.mxu0 %v5839_v35 }
 0x243   :  { %1744 = vmatprep.subr.bf16.mxu0 %v5840_v38 }
 0x246   :  { %1745 = vmatpush2.bf16.msra.mxu0 %v5841_v44  ;;  %v5847_v44 = vld [vmem:[#allocation81_spill] sm:$0xff] }
 0x247   :  { %1746 = vmatprep.subr.bf16.mxu0 %v5842_v34 }
 0x24a   :  { %1747 = vmatpush2.bf16.msra.mxu0 %v5843_v42 }
 0x24b   :  { %1854 = vmatprep.subr.bf16.mxu0 %v4574_v18 }
 0x28d   :  { %v1530_v20 = vpop.f32.mrf.mxu0  ;;  %v1571_v22 = vpop.f32.mrf.mxu1 }
 0x28e   :  { %v1622_v17 = vadd.f32 %v1530_v20, %v5845_v24  ;;  %v5848_v20 = vld [vmem:[#allocation99_spill] sm:$0xff] }
 0x28f   :  { %v1532_v19 = vpop.f32.mrf.mxu0  ;;  %v1573_v21 = vpop.f32.mrf.mxu1  ;;  %v1636_v24 = vadd.f32 %v5848_v20, %v1571_v22 }
 0x290   :  { %v2989_v23 = vmul.f32 -1.442695, %v1622_v17  ;;  %v1629_v30 = vadd.f32 %v1532_v19, %v5846_v29  ;;  %v1646_v34 = vadd.f32 %v1573_v21, %v5847_v44  ;;  %v4582_v29 = vld [vmem:[#allocation7 + $0x8] sm:$0xff] }
 0x291   :  { %v1534_v25 = vpop.f32.mrf.mxu0  ;;  %v1575_v26 = vpop.f32.mrf.mxu1  ;;  %5850 = vst [vmem:[#allocation21_spill] sm:$0xff] %v4582_v29  ;;  %vm722_vm4 = vcmp.gt.f32.partialorder %v4582_v29, 0.0  ;;  %v4780_v29 = vld [vmem:[#allocation12 + $0x248] ss:$24 sps:$4 sm:$0xff]  }
 0x292   :  { %3271 = vpow2.f32 %v2989_v23  ;;  %v2990_v32 = vmul.f32 -1.442695, %v1629_v30  ;;  %v2991_v42 = vmul.f32 -1.442695, %v1646_v34  ;;  %v5849_v25 = vld [vmem:[#allocation58_spill] sm:$0xff] }
 0x293   :  { %v1535_v27 = vpop.f32.mrf.mxu0  ;;  %v1576_v28 = vpop.f32.mrf.mxu1 }
 0x294   :  { %3273 = vpow2.f32 %v2990_v32 }
 0x29f   :  { %v3272_v35 = vpop.eup %3271 }
 0x2a0   :  { %v1626_v38 = vadd.f32 1.0, %v3272_v35  ;;  %v5851_v35 = vld [vmem:[#allocation97_spill] sm:$0xff] }
 0x2a1   :  { %v3274_v18 = vpop.eup %3273 }
 0x2a2   :  { %3275 = vrcp.f32 %v1626_v38  ;;  %v1633_v26 = vadd.f32 1.0, %v3274_v18 }
 0x2a3   :  { %3277 = vpow2.f32 %v2991_v42 }
 0x2af   :  { %v3276_v16 = vpop.eup %3275 }
 0x2b0   :  { %v1637_v17 = vmul.f32 %v3276_v16, %v1636_v24  ;;  %v3278_v19 = vpop.eup %3277 }
 0x2b1   :  { %v1650_v27 = vadd.f32 1.0, %v3278_v19 }
 0x2b2   :  { %v1638_v23 = vadd.f32 %v1637_v17, %v5849_v25 }
 0x2b4   :  { %3279 = vtanh.f32 %v1638_v23 }
 0x2b5   :  { %3281 = vrcp.f32 %v1633_v26  ;;  %v5852_v26 = vld [vmem:[#allocation98_spill] sm:$0xff] }
 0x2b6   :  { %3283 = vrcp.f32 %v1650_v27 }
 0x2c1   :  { %v3280_v28 = vpop.eup %3279 }
 0x2c2   :  { %v1640_v30 = vsub.f32 %v4398_v9, %v3280_v28  ;;  %v3282_v21 = vpop.eup %3281 }
 0x2c3   :  { %v3284_v24 = vpop.eup %3283 }
 0x2c4   :  { %v1641_v32 = vmul.f32 %v3282_v21, %v1640_v30  ;;  %v4594_v21 = vsel %vm728_vm1, %v4412_v11, 0.0 }
 0x2c5   :  { %5853 = vst [vmem:[#allocation22_spill] sm:$0xff] %v4594_v21 }
 0x2c6   :  { %v1642_v22 = vadd.f32 %v3280_v28, %v1641_v32  ;;  %v4596_v32 = vld [vmem:[#allocation7 + $0x30] sm:$0xff] }
 0x2c7   :  { %5854 = vst [vmem:[#allocation23_spill] sm:$0xff] %v4596_v32  ;;  %vm727_vm5 = vcmp.gt.f32.partialorder %v4596_v32, 0.0  ;;  %v4783_v32 = vld [vmem:[#allocation12 + $0x21c] ss:$24 sps:$4 sm:$0xff]  }
 0x2c8   :  { %v1667_v16 = vsel %vm722_vm4, %v1642_v22, 0.0 }
 0x2c9   :  { %1668 = vst [vmem:[#allocation13 + $0x8] sm:$0xff] %v1667_v16 }
 0x2cd   :  { %v1612_v18 = vpop.f32.mrf.mxu0 }
 0x2ce   :  { %v1653_v38 = vadd.f32 %v1612_v18, %v5851_v35 }
 0x2cf   :  { %v1614_v44 = vpop.f32.mrf.mxu0 }
 0x2d0   :  { %v2992_v34 = vmul.f32 -1.442695, %v1653_v38  ;;  %v1660_v42 = vadd.f32 %v4405_v61, %v1614_v44  ;;  %v4605_v44 = vsel %vm722_vm4, %v1642_v22, %v4398_v9  ;;  %v4621_v9 = vld [vmem:[#allocation12 + $0x160] ss:$24 sps:$4 sm:$0xff]   ;;  %v4624_v22 = vld [vmem:[#allocation12 + $0x134] ss:$24 sps:$4 sm:$0xff]  }
 0x2d1   :  { %v1616_v17 = vpop.f32.mrf.mxu0 }
 0x2d2   :  { %3285 = vpow2.f32 %v2992_v34  ;;  %v1661_v25 = vmul.f32 %v3284_v24, %v1660_v42  ;;  %v4617_v42 = vpack.c.bf16 %v4605_v44, %v4605_v44  ;;  %v5856_v24 = vld [vmem:[#allocation27_spill] sm:$0xff]  ;;  %v5859_v17 = vld [vmem:[#allocation45_spill] sm:$0xff] }
 0x2d3   :  { %v1617_v23 = vpop.f32.mrf.mxu0  ;;  %5893 = vst [vmem:[#allocation45_spill] sm:$0xff] %v4777_v56 }
 0x2d4   :  { %v1662_v19 = vadd.f32 %v1661_v25, %v5852_v26  ;;  %v5860_v25 = vld [vmem:[#allocation31_spill] sm:$0xff]  ;;  %v5863_v23 = vld [vmem:[#allocation49_spill] sm:$0xff] }
 0x2d5   :  { %v5864_v26 = vld [vmem:[#allocation35_spill] sm:$0xff]  ;;  %5894 = vst [vmem:[#allocation31_spill] sm:$0xff] %v4780_v29 }
 0x2d6   :  { %3287 = vtanh.f32 %v1662_v19  ;;  %v4735_v19 = vld [vmem:[#allocation12 + $0x9c] ss:$24 sps:$4 sm:$0xff]  }
 0x2d7   :  { %5879 = vst [vmem:[#allocation48_spill] sm:$0xff] %v4735_v19 }
 0x2df   :  { %v3286_v27 = vpop.eup %3285 }
 0x2e0   :  { %v1657_v28 = vadd.f32 1.0, %v3286_v27  ;;  %v4738_v27 = vld [vmem:[#allocation12 + $0x98] ss:$24 sps:$4 sm:$0xff]  }
 0x2e1   :  { %5880 = vst [vmem:[#allocation50_spill] sm:$0xff] %v4738_v27 }
 0x2e2   :  { %3289 = vrcp.f32 %v1657_v28  ;;  %v4741_v28 = vld [vmem:[#allocation12 + $0x6c] ss:$24 sps:$4 sm:$0xff]  }
 0x2e3   :  { %v3288_v30 = vpop.eup %3287  ;;  %5881 = vst [vmem:[#allocation52_spill] sm:$0xff] %v4741_v28 }
 0x2e4   :  { %v1664_v16 = vsub.f32 %v4594_v21, %v3288_v30 }
 0x2ef   :  { %v3290_v18 = vpop.eup %3289 }
 0x2f0   :  { %v1665_v35 = vmul.f32 %v3290_v18, %v1664_v16  ;;  %v4747_v16 = vld [vmem:[#allocation12 + $0x3c] ss:$24 sps:$4 sm:$0xff]   ;;  %v4750_v18 = vld [vmem:[#allocation12 + $0x38] ss:$24 sps:$4 sm:$0xff]  }
 0x2f1   :  { %5883 = vst [vmem:[#allocation59_spill] sm:$0xff] %v4747_v16  ;;  %5884 = vst [vmem:[#allocation61_spill] sm:$0xff] %v4750_v18 }
 0x2f2   :  { %v4600_v38 = vadd.f32 %v3288_v30, %v1665_v35  ;;  %v4744_v30 = vld [vmem:[#allocation12 + $0x68] ss:$24 sps:$4 sm:$0xff]   ;;  %v4753_v35 = vld [vmem:[#allocation12 + $0xc] ss:$24 sps:$4 sm:$0xff]  }
 0x2f3   :  { %5882 = vst [vmem:[#allocation54_spill] sm:$0xff] %v4744_v30  ;;  %5885 = vst [vmem:[#allocation81_spill] sm:$0xff] %v4753_v35 }
 0x2f4   :  { %5855 = vst [vmem:[#allocation24_spill] sm:$0xff] %v4600_v38  ;;  %v4611_v11 = vsel %vm727_vm5, %v4600_v38, %v4594_v21  ;;  %v4774_v21 = vld [vmem:[#allocation12 + $0x278] ss:$24 sps:$4 sm:$0xff]  }
 0x2f5   :  { %v1674_v34 = vpack.c.bf16 %v4611_v11, %v4611_v11  ;;  %v4786_v38 = vld [vmem:[#allocation12 + $0x218] ss:$24 sps:$4 sm:$0xff]  }
 0x2f7   :  { %1707 = vmatprep.mubr.bf16.mxu1 %v1674_v34  ;;  %1748 = vmatprep.mubr.bf16.mxu0 %v1674_v34 }
 0x2f8   :  { %1708 = vmatmul.mubr.bf16.vlgmr.msra.gmra.mxu1 %v4617_v42  ;;  %1749 = vmatmul.mubr.bf16.vlgmr.msra.gmra.mxu0 %v4617_v42 }
 0x2f9   :  { %1758 = vmatpush1.bf16.msra.mxu1 %v4621_v9  ;;  %1789 = vmatprep.mubr.bf16.mxu1 %v1674_v34  ;;  %v4756_v34 = vld [vmem:[#allocation12 + $0x8] ss:$24 sps:$4 sm:$0xff]  }
 0x2fa   :  { %1759 = vmatprep.subr.bf16.mxu1 %v4624_v22  ;;  %1855 = vmatpush1.bf16.msra.mxu0 %v4436_v33  ;;  %5886 = vst [vmem:[#allocation99_spill] sm:$0xff] %v4756_v34 }
 0x2fb   :  { %1856 = vmatprep.subr.bf16.mxu0 %v4439_v63 }
 0x2fd   :  { %1760 = vmatpush1.bf16.msra.mxu1 %v5799_v13  ;;  %v5857_v13 = vld [vmem:[#allocation29_spill] sm:$0xff] }
 0x2fe   :  { %1761 = vmatprep.subr.bf16.mxu1 %v5800_v40  ;;  %1857 = vmatpush1.bf16.msra.mxu0 %v4444_v31  ;;  %v5858_v40 = vld [vmem:[#allocation43_spill] sm:$0xff] }
 0x2ff   :  { %1858 = vmatprep.subr.bf16.mxu0 %v4447_v3  ;;  %5892 = vst [vmem:[#allocation43_spill] sm:$0xff] %v4774_v21 }
 0x301   :  { %1762 = vmatpush1.bf16.msra.mxu1 %v5801_v59  ;;  %v5861_v59 = vld [vmem:[#allocation33_spill] sm:$0xff] }
 0x302   :  { %1763 = vmatprep.subr.bf16.mxu1 %v5802_v36  ;;  %1859 = vmatpush1.bf16.msra.mxu0 %v4452_v5  ;;  %v5862_v36 = vld [vmem:[#allocation47_spill] sm:$0xff]  ;;  %5895 = vst [vmem:[#allocation33_spill] sm:$0xff] %v4783_v32 }
 0x303   :  { %1860 = vmatprep.subr.bf16.mxu0 %v4455_v57  ;;  %5896 = vst [vmem:[#allocation47_spill] sm:$0xff] %v4786_v38 }
 0x305   :  { %1764 = vmatpush1.bf16.msra.mxu1 %v5803_v53  ;;  %v5865_v53 = vld [vmem:[#allocation37_spill] sm:$0xff] }
 0x306   :  { %1765 = vmatprep.subr.bf16.mxu1 %v5804_v6  ;;  %1861 = vmatpush1.bf16.msra.mxu0 %v5856_v24  ;;  %v4659_v6 = vld [vmem:[#allocation12 + $0x2d0] ss:$24 sps:$4 sm:$0xff]  }
 0x307   :  { %1862 = vmatprep.subr.bf16.mxu0 %v5857_v13 }
 0x309   :  { %1766 = vmatpush1.bf16.msra.mxu1 %v5858_v40  ;;  %v4762_v40 = vld [vmem:[#allocation12 + $0x2d8] ss:$24 sps:$4 sm:$0xff]  }
 0x30a   :  { %1767 = vmatprep.subr.bf16.mxu1 %v5859_v17  ;;  %1863 = vmatpush1.bf16.msra.mxu0 %v5860_v25  ;;  %5888 = vst [vmem:[#allocation97_spill] sm:$0xff] %v4762_v40  ;;  %v4765_v17 = vld [vmem:[#allocation12 + $0x2ac] ss:$24 sps:$4 sm:$0xff]  }
 0x30b   :  { %1864 = vmatprep.subr.bf16.mxu0 %v5861_v59  ;;  %5889 = vst [vmem:[#allocation98_spill] sm:$0xff] %v4765_v17 }
 0x30d   :  { %1768 = vmatpush1.bf16.msra.mxu1 %v5862_v36  ;;  %v4768_v36 = vld [vmem:[#allocation12 + $0x2a8] ss:$24 sps:$4 sm:$0xff]  }
 0x30e   :  { %1769 = vmatprep.subr.bf16.mxu1 %v5863_v23  ;;  %1865 = vmatpush1.bf16.msra.mxu0 %v5864_v26  ;;  %5890 = vst [vmem:[#allocation27_spill] sm:$0xff] %v4768_v36  ;;  %v4771_v23 = vld [vmem:[#allocation12 + $0x27c] ss:$24 sps:$4 sm:$0xff]  }
 0x30f   :  { %1866 = vmatprep.subr.bf16.mxu0 %v5865_v53  ;;  %5891 = vst [vmem:[#allocation29_spill] sm:$0xff] %v4771_v23 }
 0x311   :  { %1770 = vmatpush1.bf16.msra.mxu1 %v5815_v60  ;;  %v4670_v60 = vld [vmem:[#allocation12 + $0x274] ss:$24 sps:$4 sm:$0xff]  }
 0x312   :  { %1771 = vmatprep.subr.bf16.mxu1 %v5816_v15  ;;  %1867 = vmatpush1.bf16.msra.mxu0 %v4484_v7  ;;  %v4662_v15 = vld [vmem:[#allocation12 + $0x2a4] ss:$24 sps:$4 sm:$0xff]  }
 0x313   :  { %1868 = vmatprep.subr.bf16.mxu0 %v4487_v58 }
 0x315   :  { %1772 = vmatpush1.bf16.msra.mxu1 %v5817_v0  ;;  %v4667_v0 = vld [vmem:[#allocation12 + $0x2a0] ss:$24 sps:$4 sm:$0xff]  }
 0x316   :  { %1773 = vmatprep.subr.bf16.mxu1 %v5818_v1  ;;  %1869 = vmatpush1.bf16.msra.mxu0 %v4492_v49  ;;  %v4732_v1 = vld [vmem:[#allocation12 + $0xc8] ss:$24 sps:$4 sm:$0xff]  }
 0x317   :  { %1870 = vmatprep.subr.bf16.mxu0 %v4495_v45  ;;  %5878 = vst [vmem:[#allocation46_spill] sm:$0xff] %v4732_v1 }
 0x319   :  { %1774 = vmatpush2.bf16.msra.mxu1 %v4106_v54  ;;  %v4678_v54 = vld [vmem:[#allocation12 + $0x244] ss:$24 sps:$4 sm:$0xff]  }
 0x31a   :  { %1775 = vmatprep.subr.bf16.mxu1 %v4109_v51  ;;  %1871 = vmatpush2.bf16.msra.mxu0 %v4659_v6  ;;  %v4675_v51 = vld [vmem:[#allocation12 + $0x270] ss:$24 sps:$4 sm:$0xff]  }
 0x31b   :  { %1872 = vmatprep.subr.bf16.mxu0 %v4662_v15 }
 0x31d   :  { %1776 = vmatpush2.bf16.msra.mxu1 %v4114_v47  ;;  %v4683_v47 = vld [vmem:[#allocation12 + $0x240] ss:$24 sps:$4 sm:$0xff]  }
 0x31e   :  { %1777 = vmatprep.subr.bf16.mxu1 %v4118_v62  ;;  %1873 = vmatpush2.bf16.msra.mxu0 %v4667_v0  ;;  %v4686_v62 = vld [vmem:[#allocation12 + $0x214] ss:$24 sps:$4 sm:$0xff]  }
 0x31f   :  { %1874 = vmatprep.subr.bf16.mxu0 %v4670_v60  ;;  %5866 = vst [vmem:[#allocation25_spill] sm:$0xff] %v4686_v62 }
 0x321   :  { %1778 = vmatpush2.bf16.msra.mxu1 %v4122_v4  ;;  %v4694_v4 = vld [vmem:[#allocation12 + $0x1e4] ss:$24 sps:$4 sm:$0xff]  }
 0x322   :  { %1779 = vmatprep.subr.bf16.mxu1 %v4126_v2  ;;  %1875 = vmatpush2.bf16.msra.mxu0 %v4675_v51  ;;  %v4691_v2 = vld [vmem:[#allocation12 + $0x210] ss:$24 sps:$4 sm:$0xff]   ;;  %5868 = vst [vmem:[#allocation28_spill] sm:$0xff] %v4694_v4 }
 0x323   :  { %1876 = vmatprep.subr.bf16.mxu0 %v4678_v54  ;;  %5867 = vst [vmem:[#allocation26_spill] sm:$0xff] %v4691_v2 }
 0x325   :  { %1780 = vmatpush2.bf16.msra.mxu1 %v4130_v37  ;;  %v4699_v37 = vld [vmem:[#allocation12 + $0x1e0] ss:$24 sps:$4 sm:$0xff]  }
 0x326   :  { %1781 = vmatprep.subr.bf16.mxu1 %v4134_v39  ;;  %1877 = vmatpush2.bf16.msra.mxu0 %v4683_v47  ;;  %5869 = vst [vmem:[#allocation30_spill] sm:$0xff] %v4699_v37  ;;  %v4702_v39 = vld [vmem:[#allocation12 + $0x1b4] ss:$24 sps:$4 sm:$0xff]  }
 0x327   :  { %1878 = vmatprep.subr.bf16.mxu0 %v4686_v62  ;;  %5870 = vst [vmem:[#allocation32_spill] sm:$0xff] %v4702_v39 }
 0x329   :  { %1782 = vmatpush2.bf16.msra.mxu1 %v4138_v41  ;;  %v4707_v41 = vld [vmem:[#allocation12 + $0x1b0] ss:$24 sps:$4 sm:$0xff]  }
 0x32a   :  { %1783 = vmatprep.subr.bf16.mxu1 %v4142_v43  ;;  %1879 = vmatpush2.bf16.msra.mxu0 %v4691_v2  ;;  %5871 = vst [vmem:[#allocation34_spill] sm:$0xff] %v4707_v41  ;;  %v4710_v43 = vld [vmem:[#allocation12 + $0x184] ss:$24 sps:$4 sm:$0xff]  }
 0x32b   :  { %1880 = vmatprep.subr.bf16.mxu0 %v4694_v4  ;;  %5872 = vst [vmem:[#allocation36_spill] sm:$0xff] %v4710_v43 }
 0x32d   :  { %1784 = vmatpush2.bf16.msra.mxu1 %v4146_v46  ;;  %v4715_v46 = vld [vmem:[#allocation12 + $0x180] ss:$24 sps:$4 sm:$0xff]  }
 0x32e   :  { %1785 = vmatprep.subr.bf16.mxu1 %v4150_v48  ;;  %1881 = vmatpush2.bf16.msra.mxu0 %v4699_v37  ;;  %5873 = vst [vmem:[#allocation38_spill] sm:$0xff] %v4715_v46  ;;  %v4718_v48 = vld [vmem:[#allocation12 + $0x164] ss:$24 sps:$4 sm:$0xff]  }
 0x32f   :  { %1882 = vmatprep.subr.bf16.mxu0 %v4702_v39  ;;  %5874 = vst [vmem:[#allocation40_spill] sm:$0xff] %v4718_v48 }
 0x331   :  { %1786 = vmatpush2.bf16.msra.mxu1 %v4154_v50  ;;  %v5875_v50 = vld [vmem:[#allocation55_spill] sm:$0xff] }
 0x332   :  { %1787 = vmatprep.subr.bf16.mxu1 %v4158_v52  ;;  %1883 = vmatpush2.bf16.msra.mxu0 %v4707_v41  ;;  %v4726_v52 = vld [vmem:[#allocation12 + $0xf8] ss:$24 sps:$4 sm:$0xff]  }
 0x333   :  { %1884 = vmatprep.subr.bf16.mxu0 %v4710_v43  ;;  %5876 = vst [vmem:[#allocation42_spill] sm:$0xff] %v4726_v52 }
 0x335   :  { %1788 = vmatpush2.bf16.msra.mxu1 %v4162_v55  ;;  %v4729_v55 = vld [vmem:[#allocation12 + $0xcc] ss:$24 sps:$4 sm:$0xff]  }
 0x336   :  { %1895 = vmatprep.subr.bf16.mxu1 %v4527_v8  ;;  %1885 = vmatpush2.bf16.msra.mxu0 %v4715_v46  ;;  %5877 = vst [vmem:[#allocation44_spill] sm:$0xff] %v4729_v55 }
 0x337   :  { %1936 = vmatprep.subr.bf16.mxu0 %v4718_v48 }
 0x338   :  { %1790 = vmatmul.mubr.bf16.vlgmr.msra.gmra.mxu1 %v4617_v42  ;;  %v4759_v42 = vld [vmem:[#allocation12 + $0x2dc] ss:$24 sps:$4 sm:$0xff]  }
 0x339   :  { %1896 = vmatpush1.bf16.msra.mxu1 %v4535_v10  ;;  %5887 = vst [vmem:[#allocation58_spill] sm:$0xff] %v4759_v42 }
 0x33a   :  { %1897 = vmatprep.subr.bf16.mxu1 %v4538_v12 }
 0x33d   :  { %1898 = vmatpush1.bf16.msra.mxu1 %v4541_v14 }
 0x33e   :  { %1899 = vmatprep.subr.bf16.mxu1 %v5875_v50 }
 0x341   :  { %1900 = vmatpush1.bf16.msra.mxu1 %v4726_v52 }
 0x342   :  { %1901 = vmatprep.subr.bf16.mxu1 %v4729_v55 }
 0x345   :  { %1902 = vmatpush1.bf16.msra.mxu1 %v4732_v1 }
 0x346   :  { %1903 = vmatprep.subr.bf16.mxu1 %v4735_v19 }
 0x349   :  { %1904 = vmatpush1.bf16.msra.mxu1 %v4738_v27 }
 0x34a   :  { %1905 = vmatprep.subr.bf16.mxu1 %v4741_v28 }
 0x34d   :  { %1906 = vmatpush1.bf16.msra.mxu1 %v4744_v30  ;;  %v5905_v30 = vld [vmem:[#allocation64_spill] sm:$0xff] }
 0x34e   :  { %1907 = vmatprep.subr.bf16.mxu1 %v4747_v16 }
 0x351   :  { %1908 = vmatpush1.bf16.msra.mxu1 %v4750_v18 }
 0x352   :  { %1909 = vmatprep.subr.bf16.mxu1 %v4753_v35 }
 0x355   :  { %1910 = vmatpush1.bf16.msra.mxu1 %v4756_v34 }
 0x356   :  { %1911 = vmatprep.subr.bf16.mxu1 %v4759_v42 }
 0x359   :  { %1912 = vmatpush2.bf16.msra.mxu1 %v4762_v40 }
 0x35a   :  { %1913 = vmatprep.subr.bf16.mxu1 %v4765_v17  ;;  %v5904_v17 = vld [vmem:[#allocation62_spill] sm:$0xff] }
 0x35d   :  { %1914 = vmatpush2.bf16.msra.mxu1 %v4768_v36 }
 0x35e   :  { %1915 = vmatprep.subr.bf16.mxu1 %v4771_v23  ;;  %v4789_v23 = vld [vmem:[#allocation12 + $0x1ec] ss:$24 sps:$4 sm:$0xff]  }
 0x35f   :  { %5897 = vst [vmem:[#allocation49_spill] sm:$0xff] %v4789_v23 }
 0x361   :  { %1916 = vmatpush2.bf16.msra.mxu1 %v4774_v21  ;;  %v4792_v21 = vld [vmem:[#allocation12 + $0x1e8] ss:$24 sps:$4 sm:$0xff]  }
 0x362   :  { %1917 = vmatprep.subr.bf16.mxu1 %v4777_v56  ;;  %5898 = vst [vmem:[#allocation35_spill] sm:$0xff] %v4792_v21  ;;  %v4795_v56 = vld [vmem:[#allocation12 + $0x1bc] ss:$24 sps:$4 sm:$0xff]  }
 0x363   :  { %5899 = vst [vmem:[#allocation37_spill] sm:$0xff] %v4795_v56 }
 0x365   :  { %1918 = vmatpush2.bf16.msra.mxu1 %v4780_v29  ;;  %v4798_v29 = vld [vmem:[#allocation12 + $0x1b8] ss:$24 sps:$4 sm:$0xff]  }
 0x366   :  { %1919 = vmatprep.subr.bf16.mxu1 %v4783_v32  ;;  %5900 = vst [vmem:[#allocation102_spill] sm:$0xff] %v4798_v29  ;;  %v4801_v32 = vld [vmem:[#allocation12 + $0x18c] ss:$24 sps:$4 sm:$0xff]  }
 0x367   :  { %5901 = vst [vmem:[#allocation103_spill] sm:$0xff] %v4801_v32 }
 0x369   :  { %1920 = vmatpush2.bf16.msra.mxu1 %v4786_v38  ;;  %v4804_v38 = vld [vmem:[#allocation12 + $0x188] ss:$24 sps:$4 sm:$0xff]  }
 0x36a   :  { %1921 = vmatprep.subr.bf16.mxu1 %v4789_v23  ;;  %5902 = vst [vmem:[#allocation104_spill] sm:$0xff] %v4804_v38  ;;  %v5903_v23 = vld [vmem:[#allocation56_spill] sm:$0xff] }
 0x36d   :  { %1922 = vmatpush2.bf16.msra.mxu1 %v4792_v21 }
 0x36e   :  { %1923 = vmatprep.subr.bf16.mxu1 %v4795_v56 }
 0x371   :  { %1924 = vmatpush2.bf16.msra.mxu1 %v4798_v29 }
 0x372   :  { %1925 = vmatprep.subr.bf16.mxu1 %v4801_v32 }
 0x375   :  { %1926 = vmatpush2.bf16.msra.mxu1 %v4804_v38 }
 0x376   :  { %2033 = vmatprep.subr.bf16.mxu1 %v5903_v23  ;;  %v5906_v23 = vld [vmem:[#allocation77_spill] sm:$0xff] }
 0x3b8   :  { %v1709_v36 = vpop.f32.mrf.mxu1  ;;  %v1750_v21 = vpop.f32.mrf.mxu0 }
 0x3b9   :  { %v1801_v40 = vadd.f32 %v1709_v36, %v5904_v17  ;;  %v1815_v17 = vadd.f32 %v5848_v20, %v1750_v21  ;;  %v5909_v20 = vld [vmem:[#allocation95_spill] sm:$0xff] }
 0x3ba   :  { %v1711_v42 = vpop.f32.mrf.mxu1  ;;  %v1752_v56 = vpop.f32.mrf.mxu0 }
 0x3bb   :  { %v2993_v34 = vmul.f32 -1.442695, %v1801_v40  ;;  %v1808_v32 = vadd.f32 %v1711_v42, %v5905_v30  ;;  %v1825_v38 = vadd.f32 %v1752_v56, %v5906_v23 }
 0x3bc   :  { %v1713_v35 = vpop.f32.mrf.mxu1  ;;  %v1754_v18 = vpop.f32.mrf.mxu0 }
 0x3bd   :  { %3291 = vpow2.f32 %v2993_v34  ;;  %v2994_v28 = vmul.f32 -1.442695, %v1808_v32  ;;  %v2995_v1 = vmul.f32 -1.442695, %v1825_v38  ;;  %v5907_v18 = vld [vmem:[#allocation63_spill] sm:$0xff] }
 0x3be   :  { %v1714_v29 = vpop.f32.mrf.mxu1  ;;  %v1755_v16 = vpop.f32.mrf.mxu0 }
 0x3bf   :  { %3293 = vpow2.f32 %v2994_v28 }
 0x3ca   :  { %v3292_v27 = vpop.eup %3291 }
 0x3cb   :  { %v1805_v19 = vadd.f32 1.0, %v3292_v27 }
 0x3cc   :  { %v3294_v55 = vpop.eup %3293 }
 0x3cd   :  { %3295 = vrcp.f32 %v1805_v19  ;;  %v1812_v29 = vadd.f32 1.0, %v3294_v55 }
 0x3ce   :  { %3297 = vpow2.f32 %v2995_v1 }
 0x3da   :  { %v3296_v36 = vpop.eup %3295 }
 0x3db   :  { %v1816_v40 = vmul.f32 %v3296_v36, %v1815_v17  ;;  %v3298_v30 = vpop.eup %3297 }
 0x3dc   :  { %v1829_v32 = vadd.f32 1.0, %v3298_v30 }
 0x3dd   :  { %v1817_v35 = vadd.f32 %v1816_v40, %v5907_v18  ;;  %v5910_v40 = vld [vmem:[#allocation96_spill] sm:$0xff] }
 0x3df   :  { %3299 = vtanh.f32 %v1817_v35 }
 0x3e0   :  { %3301 = vrcp.f32 %v1812_v29 }
 0x3e1   :  { %3303 = vrcp.f32 %v1829_v32  ;;  %v4819_v32 = vld [vmem:[#allocation7 + $0x10] sm:$0xff] }
 0x3e2   :  { %5911 = vst [vmem:[#allocation64_spill] sm:$0xff] %v4819_v32  ;;  %vm723_vm6 = vcmp.gt.f32.partialorder %v4819_v32, 0.0  ;;  %v4916_v32 = vld [vmem:[#allocation12 + $0x2b0] ss:$24 sps:$4 sm:$0xff]  }
 0x3e3   :  { %5914 = vst [vmem:[#allocation95_spill] sm:$0xff] %v4916_v32 }
 0x3ec   :  { %v3300_v16 = vpop.eup %3299 }
 0x3ed   :  { %v1819_v27 = vsub.f32 %v4605_v44, %v3300_v16  ;;  %v3302_v19 = vpop.eup %3301 }
 0x3ee   :  { %v3304_v55 = vpop.eup %3303 }
 0x3ef   :  { %v1820_v56 = vmul.f32 %v3302_v19, %v1819_v27 }
 0x3f1   :  { %v4814_v38 = vadd.f32 %v3300_v16, %v1820_v56  ;;  %v4821_v16 = vld [vmem:[#allocation7 + $0x28] sm:$0xff] }
 0x3f2   :  { %5912 = vst [vmem:[#allocation77_spill] sm:$0xff] %v4821_v16  ;;  %vm726_vm7 = vcmp.gt.f32.partialorder %v4821_v16, 0.0  ;;  %v4924_v16 = vld [vmem:[#allocation12 + $0x280] ss:$24 sps:$4 sm:$0xff]  }
 0x3f3   :  { %5908 = vst [vmem:[#allocation62_spill] sm:$0xff] %v4814_v38  ;;  %5916 = vst [vmem:[#allocation105_spill] sm:$0xff] %v4924_v16 }
 0x3f8   :  { %v1791_v28 = vpop.f32.mrf.mxu1 }
 0x3f9   :  { %v1832_v21 = vadd.f32 %v1791_v28, %v5909_v20  ;;  %v4832_v20 = vsel %vm723_vm6, %v4814_v38, %v4605_v44  ;;  %v4852_v44 = vld [vmem:[#allocation12 + $0x130] ss:$24 sps:$4 sm:$0xff]   ;;  %v4919_v38 = vld [vmem:[#allocation12 + $0x284] ss:$24 sps:$4 sm:$0xff]  }
 0x3fa   :  { %v1793_v34 = vpop.f32.mrf.mxu1  ;;  %5915 = vst [vmem:[#allocation96_spill] sm:$0xff] %v4919_v38 }
 0x3fb   :  { %v2996_v1 = vmul.f32 -1.442695, %v1832_v21  ;;  %v1839_v42 = vadd.f32 %v4405_v61, %v1793_v34 }
 0x3fc   :  { %v1795_v23 = vpop.f32.mrf.mxu1 }
 0x3fd   :  { %3305 = vpow2.f32 %v2996_v1  ;;  %v1840_v17 = vmul.f32 %v3304_v55, %v1839_v42  ;;  %v4844_v1 = vpack.c.bf16 %v4832_v20, %v4832_v20  ;;  %v4860_v42 = vld [vmem:[#allocation12 + $0x100] ss:$24 sps:$4 sm:$0xff]   ;;  %v4863_v55 = vld [vmem:[#allocation12 + $0xd4] ss:$24 sps:$4 sm:$0xff]   ;;  %v4868_v23 = vld [vmem:[#allocation12 + $0xd0] ss:$24 sps:$4 sm:$0xff]  }
 0x3fe   :  { %v1796_v36 = vpop.f32.mrf.mxu1 }
 0x3ff   :  { %v1841_v18 = vadd.f32 %v1840_v17, %v5910_v40  ;;  %v4871_v17 = vld [vmem:[#allocation12 + $0xa4] ss:$24 sps:$4 sm:$0xff]   ;;  %v4876_v36 = vld [vmem:[#allocation12 + $0xa0] ss:$24 sps:$4 sm:$0xff]   ;;  %v4879_v40 = vld [vmem:[#allocation12 + $0x74] ss:$24 sps:$4 sm:$0xff]  }
 0x401   :  { %3307 = vtanh.f32 %v1841_v18  ;;  %v4884_v18 = vld [vmem:[#allocation12 + $0x70] ss:$24 sps:$4 sm:$0xff]  }
 0x40a   :  { %v3306_v35 = vpop.eup %3305 }
 0x40b   :  { %v1836_v29 = vadd.f32 1.0, %v3306_v35  ;;  %v4887_v35 = vld [vmem:[#allocation12 + $0x44] ss:$24 sps:$4 sm:$0xff]  }
 0x40d   :  { %3309 = vrcp.f32 %v1836_v29  ;;  %v4892_v29 = vld [vmem:[#allocation12 + $0x40] ss:$24 sps:$4 sm:$0xff]  }
 0x40e   :  { %v3308_v30 = vpop.eup %3307 }
 0x40f   :  { %v1843_v27 = vsub.f32 %v4611_v11, %v3308_v30 }
 0x41a   :  { %v3310_v19 = vpop.eup %3309 }
 0x41b   :  { %v1844_v56 = vmul.f32 %v3310_v19, %v1843_v27  ;;  %v4900_v27 = vld [vmem:[#allocation12 + $0x10] ss:$24 sps:$4 sm:$0xff]   ;;  %v4903_v19 = vld [vmem:[#allocation12 + $0x2e4] ss:$24 sps:$4 sm:$0xff]  }
 0x41d   :  { %v4826_v28 = vadd.f32 %v3308_v30, %v1844_v56  ;;  %v4895_v30 = vld [vmem:[#allocation12 + $0x14] ss:$24 sps:$4 sm:$0xff]   ;;  %v4908_v56 = vld [vmem:[#allocation12 + $0x2e0] ss:$24 sps:$4 sm:$0xff]  }
 0x41f   :  { %5913 = vst [vmem:[#allocation63_spill] sm:$0xff] %v4826_v28  ;;  %v4838_v21 = vsel %vm726_vm7, %v4826_v28, %v4611_v11  ;;  %v4855_v11 = vld [vmem:[#allocation12 + $0x104] ss:$24 sps:$4 sm:$0xff]   ;;  %v4927_v28 = vld [vmem:[#allocation12 + $0x254] ss:$24 sps:$4 sm:$0xff]  }
 0x420   :  { %v1853_v34 = vpack.c.bf16 %v4838_v21, %v4838_v21  ;;  %5917 = vst [vmem:[#allocation106_spill] sm:$0xff] %v4927_v28 }
 0x422   :  { %1886 = vmatprep.mubr.bf16.mxu0 %v1853_v34  ;;  %1927 = vmatprep.mubr.bf16.mxu1 %v1853_v34 }
 0x423   :  { %1887 = vmatmul.mubr.bf16.vlgmr.msra.gmra.mxu0 %v4844_v1  ;;  %1928 = vmatmul.mubr.bf16.vlgmr.msra.gmra.mxu1 %v4844_v1 }
 0x424   :  { %1937 = vmatpush1.bf16.msra.mxu0 %v4621_v9  ;;  %1968 = vmatprep.mubr.bf16.mxu0 %v1853_v34  ;;  %v4911_v34 = vld [vmem:[#allocation12 + $0x2b4] ss:$24 sps:$4 sm:$0xff]  }
 0x425   :  { %1938 = vmatprep.subr.bf16.mxu0 %v4624_v22  ;;  %2034 = vmatpush1.bf16.msra.mxu1 %v4436_v33 }
 0x426   :  { %2035 = vmatprep.subr.bf16.mxu1 %v4439_v63 }
 0x428   :  { %1939 = vmatpush1.bf16.msra.mxu0 %v4852_v44 }
 0x429   :  { %1940 = vmatprep.subr.bf16.mxu0 %v4855_v11  ;;  %2036 = vmatpush1.bf16.msra.mxu1 %v4444_v31 }
 0x42a   :  { %2037 = vmatprep.subr.bf16.mxu1 %v4447_v3 }
 0x42c   :  { %1941 = vmatpush1.bf16.msra.mxu0 %v4860_v42 }
 0x42d   :  { %1942 = vmatprep.subr.bf16.mxu0 %v4863_v55  ;;  %2038 = vmatpush1.bf16.msra.mxu1 %v4452_v5 }
 0x42e   :  { %2039 = vmatprep.subr.bf16.mxu1 %v4455_v57 }
 0x430   :  { %1943 = vmatpush1.bf16.msra.mxu0 %v4868_v23 }
 0x431   :  { %1944 = vmatprep.subr.bf16.mxu0 %v4871_v17  ;;  %2040 = vmatpush1.bf16.msra.mxu1 %v5856_v24 }
 0x432   :  { %2041 = vmatprep.subr.bf16.mxu1 %v5857_v13 }
 0x434   :  { %1945 = vmatpush1.bf16.msra.mxu0 %v4876_v36 }
 0x435   :  { %1946 = vmatprep.subr.bf16.mxu0 %v4879_v40  ;;  %2042 = vmatpush1.bf16.msra.mxu1 %v5860_v25 }
 0x436   :  { %2043 = vmatprep.subr.bf16.mxu1 %v5861_v59 }
 0x438   :  { %1947 = vmatpush1.bf16.msra.mxu0 %v4884_v18 }
 0x439   :  { %1948 = vmatprep.subr.bf16.mxu0 %v4887_v35  ;;  %2044 = vmatpush1.bf16.msra.mxu1 %v5864_v26 }
 0x43a   :  { %2045 = vmatprep.subr.bf16.mxu1 %v5865_v53 }
 0x43c   :  { %1949 = vmatpush1.bf16.msra.mxu0 %v4892_v29 }
 0x43d   :  { %1950 = vmatprep.subr.bf16.mxu0 %v4895_v30  ;;  %2046 = vmatpush1.bf16.msra.mxu1 %v4484_v7 }
 0x43e   :  { %2047 = vmatprep.subr.bf16.mxu1 %v4487_v58 }
 0x440   :  { %1951 = vmatpush1.bf16.msra.mxu0 %v4900_v27 }
 0x441   :  { %1952 = vmatprep.subr.bf16.mxu0 %v4903_v19  ;;  %2048 = vmatpush1.bf16.msra.mxu1 %v4492_v49 }
 0x442   :  { %2049 = vmatprep.subr.bf16.mxu1 %v4495_v45 }
 0x444   :  { %1953 = vmatpush2.bf16.msra.mxu0 %v4908_v56 }
 0x445   :  { %1954 = vmatprep.subr.bf16.mxu0 %v4911_v34  ;;  %2050 = vmatpush2.bf16.msra.mxu1 %v4659_v6 }
 0x446   :  { %2051 = vmatprep.subr.bf16.mxu1 %v4662_v15 }
 0x448   :  { %1955 = vmatpush2.bf16.msra.mxu0 %v4916_v32  ;;  %v4932_v32 = vld [vmem:[#allocation12 + $0x250] ss:$24 sps:$4 sm:$0xff]  }
 0x449   :  { %1956 = vmatprep.subr.bf16.mxu0 %v4919_v38  ;;  %2052 = vmatpush2.bf16.msra.mxu1 %v4667_v0  ;;  %5918 = vst [vmem:[#allocation107_spill] sm:$0xff] %v4932_v32  ;;  %v4935_v38 = vld [vmem:[#allocation12 + $0x224] ss:$24 sps:$4 sm:$0xff]  }
 0x44a   :  { %2053 = vmatprep.subr.bf16.mxu1 %v4670_v60  ;;  %5919 = vst [vmem:[#allocation108_spill] sm:$0xff] %v4935_v38 }
 0x44c   :  { %1957 = vmatpush2.bf16.msra.mxu0 %v4924_v16  ;;  %v4940_v16 = vld [vmem:[#allocation12 + $0x220] ss:$24 sps:$4 sm:$0xff]  }
 0x44d   :  { %1958 = vmatprep.subr.bf16.mxu0 %v4927_v28  ;;  %2054 = vmatpush2.bf16.msra.mxu1 %v4675_v51  ;;  %5920 = vst [vmem:[#allocation109_spill] sm:$0xff] %v4940_v16  ;;  %v4943_v28 = vld [vmem:[#allocation12 + $0x1f4] ss:$24 sps:$4 sm:$0xff]  }
 0x44e   :  { %2055 = vmatprep.subr.bf16.mxu1 %v4678_v54  ;;  %5921 = vst [vmem:[#allocation110_spill] sm:$0xff] %v4943_v28 }
 0x450   :  { %1959 = vmatpush2.bf16.msra.mxu0 %v4932_v32  ;;  %v4948_v32 = vld [vmem:[#allocation12 + $0x1f0] ss:$24 sps:$4 sm:$0xff]  }
 0x451   :  { %1960 = vmatprep.subr.bf16.mxu0 %v4935_v38  ;;  %2056 = vmatpush2.bf16.msra.mxu1 %v4683_v47  ;;  %5922 = vst [vmem:[#allocation111_spill] sm:$0xff] %v4948_v32  ;;  %v4951_v38 = vld [vmem:[#allocation12 + $0x1c4] ss:$24 sps:$4 sm:$0xff]  }
 0x452   :  { %2057 = vmatprep.subr.bf16.mxu1 %v4686_v62  ;;  %5923 = vst [vmem:[#allocation112_spill] sm:$0xff] %v4951_v38 }
 0x454   :  { %1961 = vmatpush2.bf16.msra.mxu0 %v4940_v16  ;;  %v4956_v16 = vld [vmem:[#allocation12 + $0x1c0] ss:$24 sps:$4 sm:$0xff]  }
 0x455   :  { %1962 = vmatprep.subr.bf16.mxu0 %v4943_v28  ;;  %2058 = vmatpush2.bf16.msra.mxu1 %v4691_v2  ;;  %5924 = vst [vmem:[#allocation113_spill] sm:$0xff] %v4956_v16  ;;  %v4959_v28 = vld [vmem:[#allocation12 + $0x194] ss:$24 sps:$4 sm:$0xff]  }
 0x456   :  { %2059 = vmatprep.subr.bf16.mxu1 %v4694_v4  ;;  %5925 = vst [vmem:[#allocation114_spill] sm:$0xff] %v4959_v28 }
 0x458   :  { %1963 = vmatpush2.bf16.msra.mxu0 %v4948_v32  ;;  %v4964_v32 = vld [vmem:[#allocation12 + $0x190] ss:$24 sps:$4 sm:$0xff]  }
 0x459   :  { %1964 = vmatprep.subr.bf16.mxu0 %v4951_v38  ;;  %2060 = vmatpush2.bf16.msra.mxu1 %v4699_v37  ;;  %5926 = vst [vmem:[#allocation115_spill] sm:$0xff] %v4964_v32  ;;  %v5955_v37 = vld [vmem:[#allocation68_spill] sm:$0xff] }
 0x45a   :  { %2061 = vmatprep.subr.bf16.mxu1 %v4702_v39 }
 0x45c   :  { %1965 = vmatpush2.bf16.msra.mxu0 %v4956_v16 }
 0x45d   :  { %1966 = vmatprep.subr.bf16.mxu0 %v4959_v28  ;;  %2062 = vmatpush2.bf16.msra.mxu1 %v4707_v41  ;;  %v5954_v41 = vld [vmem:[#allocation66_spill] sm:$0xff] }
 0x45e   :  { %2063 = vmatprep.subr.bf16.mxu1 %v4710_v43  ;;  %v5927_v43 = vld [vmem:[#allocation44_spill] sm:$0xff] }
 0x460   :  { %1967 = vmatpush2.bf16.msra.mxu0 %v4964_v32  ;;  %v5928_v32 = vld [vmem:[#allocation46_spill] sm:$0xff] }
 0x461   :  { %2074 = vmatprep.subr.bf16.mxu0 %v4527_v8  ;;  %2064 = vmatpush2.bf16.msra.mxu1 %v4715_v46  ;;  %v5929_v8 = vld [vmem:[#allocation48_spill] sm:$0xff]  ;;  %v5930_v46 = vld [vmem:[#allocation50_spill] sm:$0xff] }
 0x462   :  { %2115 = vmatprep.subr.bf16.mxu1 %v4718_v48  ;;  %v5931_v48 = vld [vmem:[#allocation52_spill] sm:$0xff] }
 0x463   :  { %1969 = vmatmul.mubr.bf16.vlgmr.msra.gmra.mxu0 %v4844_v1  ;;  %v5932_v1 = vld [vmem:[#allocation54_spill] sm:$0xff] }
 0x464   :  { %2075 = vmatpush1.bf16.msra.mxu0 %v4535_v10  ;;  %v5933_v10 = vld [vmem:[#allocation59_spill] sm:$0xff] }
 0x465   :  { %2076 = vmatprep.subr.bf16.mxu0 %v4538_v12  ;;  %v5934_v12 = vld [vmem:[#allocation61_spill] sm:$0xff] }
 0x468   :  { %2077 = vmatpush1.bf16.msra.mxu0 %v4541_v14  ;;  %v5935_v14 = vld [vmem:[#allocation81_spill] sm:$0xff] }
 0x469   :  { %2078 = vmatprep.subr.bf16.mxu0 %v5875_v50  ;;  %v5936_v50 = vld [vmem:[#allocation99_spill] sm:$0xff] }
 0x46c   :  { %2079 = vmatpush1.bf16.msra.mxu0 %v4726_v52  ;;  %v5937_v52 = vld [vmem:[#allocation58_spill] sm:$0xff] }
 0x46d   :  { %2080 = vmatprep.subr.bf16.mxu0 %v5927_v43  ;;  %v5938_v43 = vld [vmem:[#allocation97_spill] sm:$0xff] }
 0x470   :  { %2081 = vmatpush1.bf16.msra.mxu0 %v5928_v32  ;;  %v5939_v32 = vld [vmem:[#allocation98_spill] sm:$0xff] }
 0x471   :  { %2082 = vmatprep.subr.bf16.mxu0 %v5929_v8  ;;  %v5940_v8 = vld [vmem:[#allocation27_spill] sm:$0xff] }
 0x474   :  { %2083 = vmatpush1.bf16.msra.mxu0 %v5930_v46  ;;  %v5941_v46 = vld [vmem:[#allocation29_spill] sm:$0xff] }
 0x475   :  { %2084 = vmatprep.subr.bf16.mxu0 %v5931_v48  ;;  %v5942_v48 = vld [vmem:[#allocation43_spill] sm:$0xff] }
 0x478   :  { %2085 = vmatpush1.bf16.msra.mxu0 %v5932_v1  ;;  %v5943_v1 = vld [vmem:[#allocation45_spill] sm:$0xff] }
 0x479   :  { %2086 = vmatprep.subr.bf16.mxu0 %v5933_v10  ;;  %v5944_v10 = vld [vmem:[#allocation31_spill] sm:$0xff] }
 0x47c   :  { %2087 = vmatpush1.bf16.msra.mxu0 %v5934_v12  ;;  %v5945_v12 = vld [vmem:[#allocation33_spill] sm:$0xff] }
 0x47d   :  { %2088 = vmatprep.subr.bf16.mxu0 %v5935_v14  ;;  %v5946_v14 = vld [vmem:[#allocation47_spill] sm:$0xff] }
 0x480   :  { %2089 = vmatpush1.bf16.msra.mxu0 %v5936_v50  ;;  %v5947_v50 = vld [vmem:[#allocation49_spill] sm:$0xff] }
 0x481   :  { %2090 = vmatprep.subr.bf16.mxu0 %v5937_v52  ;;  %v5948_v52 = vld [vmem:[#allocation35_spill] sm:$0xff] }
 0x484   :  { %2091 = vmatpush2.bf16.msra.mxu0 %v5938_v43  ;;  %v5949_v43 = vld [vmem:[#allocation37_spill] sm:$0xff] }
 0x485   :  { %2092 = vmatprep.subr.bf16.mxu0 %v5939_v32  ;;  %v5950_v32 = vld [vmem:[#allocation102_spill] sm:$0xff] }
 0x488   :  { %2093 = vmatpush2.bf16.msra.mxu0 %v5940_v8  ;;  %v5951_v8 = vld [vmem:[#allocation103_spill] sm:$0xff] }
 0x489   :  { %2094 = vmatprep.subr.bf16.mxu0 %v5941_v46  ;;  %v5952_v46 = vld [vmem:[#allocation104_spill] sm:$0xff] }
 0x48c   :  { %2095 = vmatpush2.bf16.msra.mxu0 %v5942_v48  ;;  %v5953_v48 = vld [vmem:[#allocation56_spill] sm:$0xff] }
 0x48d   :  { %2096 = vmatprep.subr.bf16.mxu0 %v5943_v1 }
 0x490   :  { %2097 = vmatpush2.bf16.msra.mxu0 %v5944_v10 }
 0x491   :  { %2098 = vmatprep.subr.bf16.mxu0 %v5945_v12 }
 0x494   :  { %2099 = vmatpush2.bf16.msra.mxu0 %v5946_v14 }
 0x495   :  { %2100 = vmatprep.subr.bf16.mxu0 %v5947_v50 }
 0x498   :  { %2101 = vmatpush2.bf16.msra.mxu0 %v5948_v52 }
 0x499   :  { %2102 = vmatprep.subr.bf16.mxu0 %v5949_v43 }
 0x49c   :  { %2103 = vmatpush2.bf16.msra.mxu0 %v5950_v32 }
 0x49d   :  { %2104 = vmatprep.subr.bf16.mxu0 %v5951_v8 }
 0x4a0   :  { %2105 = vmatpush2.bf16.msra.mxu0 %v5952_v46 }
 0x4a1   :  { %2212 = vmatprep.subr.bf16.mxu0 %v5953_v48  ;;  %v5956_v48 = vld [vmem:[#allocation73_spill] sm:$0xff] }
 0x4e3   :  { %v1888_v1 = vpop.f32.mrf.mxu0  ;;  %v1929_v10 = vpop.f32.mrf.mxu1 }
 0x4e4   :  { %v1980_v12 = vadd.f32 %v1888_v1, %v5954_v41 }
 0x4e5   :  { %v1890_v28 = vpop.f32.mrf.mxu0  ;;  %v1931_v14 = vpop.f32.mrf.mxu1 }
 0x4e6   :  { %v2997_v16 = vmul.f32 -1.442695, %v1980_v12  ;;  %v1987_v32 = vadd.f32 %v1890_v28, %v5955_v37  ;;  %v2004_v46 = vadd.f32 %v1931_v14, %v5956_v48  ;;  %v5009_v12 = vld [vmem:[%s5499_s5] ss:$0 sm:$0xff]  ;;  %v5957_v37 = vld [vmem:[#allocation67_spill] sm:$0xff] }
 0x4e7   :  { %v1892_v50 = vpop.f32.mrf.mxu0  ;;  %v1933_v39 = vpop.f32.mrf.mxu1 }
 0x4e8   :  { %3311 = vpow2.f32 %v2997_v16  ;;  %v2998_v38 = vmul.f32 -1.442695, %v1987_v32  ;;  %v2999_v2 = vmul.f32 -1.442695, %v2004_v46  ;;  %v1994_v39 = vadd.f32 %v5009_v12, %v1929_v10  ;;  %v5958_v10 = vld [vmem:[#allocation93_spill] sm:$0xff] }
 0x4e9   :  { %v1893_v52 = vpop.f32.mrf.mxu0  ;;  %v1934_v43 = vpop.f32.mrf.mxu1 }
 0x4ea   :  { %3313 = vpow2.f32 %v2998_v38 }
 0x4f5   :  { %v3312_v8 = vpop.eup %3311 }
 0x4f6   :  { %v1984_v4 = vadd.f32 1.0, %v3312_v8 }
 0x4f7   :  { %v3314_v62 = vpop.eup %3313 }
 0x4f8   :  { %3315 = vrcp.f32 %v1984_v4  ;;  %v1991_v52 = vadd.f32 1.0, %v3314_v62 }
 0x4f9   :  { %3317 = vpow2.f32 %v2999_v2 }
 0x505   :  { %v3316_v41 = vpop.eup %3315 }
 0x506   :  { %v1995_v43 = vmul.f32 %v3316_v41, %v1994_v39  ;;  %v3318_v8 = vpop.eup %3317 }
 0x507   :  { %v2008_v4 = vadd.f32 1.0, %v3318_v8 }
 0x508   :  { %v1996_v50 = vadd.f32 %v1995_v43, %v5957_v37 }
 0x50a   :  { %3319 = vtanh.f32 %v1996_v50  ;;  %v5959_v50 = vld [vmem:[#allocation94_spill] sm:$0xff] }
 0x50b   :  { %3321 = vrcp.f32 %v1991_v52 }
 0x50c   :  { %3323 = vrcp.f32 %v2008_v4 }
 0x517   :  { %v3320_v14 = vpop.eup %3319 }
 0x518   :  { %v1998_v46 = vsub.f32 %v4832_v20, %v3320_v14  ;;  %v3322_v48 = vpop.eup %3321 }
 0x519   :  { %v3324_v62 = vpop.eup %3323 }
 0x51a   :  { %v1999_v38 = vmul.f32 %v3322_v48, %v1998_v46  ;;  %v5019_v46 = vld [vmem:[#allocation7 + $0x18] sm:$0xff]  ;;  %v5021_v48 = vld [vmem:[#allocation7 + $0x20] sm:$0xff] }
 0x51b   :  { %vm724_vm8 = vcmp.gt.f32.partialorder %v5019_v46, 0.0  ;;  %vm725_vm9 = vcmp.gt.f32.partialorder %v5021_v48, 0.0  ;;  %v5193_v46 = vld [vmem:[#allocation12 + $0x124] ss:$24 sps:$4 sm:$0xff]  }
 0x51c   :  { %v5014_v32 = vadd.f32 %v3320_v14, %v1999_v38 }
 0x523   :  { %v1970_v16 = vpop.f32.mrf.mxu0 }
 0x524   :  { %v2011_v28 = vadd.f32 %v1970_v16, %v5958_v10 }
 0x525   :  { %v1972_v1 = vpop.f32.mrf.mxu0 }
 0x526   :  { %v3000_v2 = vmul.f32 -1.442695, %v2011_v28  ;;  %v2018_v39 = vadd.f32 %v4405_v61, %v1972_v1  ;;  %v5032_v28 = vsel %vm724_vm8, %v5014_v32, %v4832_v20  ;;  %v5976_v20 = vld [vmem:[#allocation114_spill] sm:$0xff] }
 0x527   :  { %v1974_v41 = vpop.f32.mrf.mxu0 }
 0x528   :  { %3325 = vpow2.f32 %v3000_v2  ;;  %v2019_v43 = vmul.f32 %v3324_v62, %v2018_v39  ;;  %v5044_v39 = vpack.c.bf16 %v5032_v28, %v5032_v28  ;;  %v5978_v62 = vld [vmem:[#allocation36_spill] sm:$0xff]  ;;  %v5979_v41 = vld [vmem:[#allocation115_spill] sm:$0xff] }
 0x529   :  { %v1975_v37 = vpop.f32.mrf.mxu0 }
 0x52a   :  { %v2020_v52 = vadd.f32 %v2019_v43, %v5959_v50  ;;  %v5980_v43 = vld [vmem:[#allocation39_spill] sm:$0xff]  ;;  %v5981_v37 = vld [vmem:[#allocation38_spill] sm:$0xff]  ;;  %v5982_v50 = vld [vmem:[#allocation40_spill] sm:$0xff] }
 0x52c   :  { %3327 = vtanh.f32 %v2020_v52  ;;  %v5983_v52 = vld [vmem:[#allocation41_spill] sm:$0xff] }
 0x535   :  { %v3326_v8 = vpop.eup %3325 }
 0x536   :  { %v2015_v4 = vadd.f32 1.0, %v3326_v8  ;;  %v5984_v8 = vld [vmem:[#allocation51_spill] sm:$0xff] }
 0x538   :  { %3329 = vrcp.f32 %v2015_v4  ;;  %v5985_v4 = vld [vmem:[#allocation53_spill] sm:$0xff] }
 0x539   :  { %v3328_v14 = vpop.eup %3327 }
 0x53a   :  { %v2022_v38 = vsub.f32 %v4838_v21, %v3328_v14 }
 0x545   :  { %v3330_v16 = vpop.eup %3329 }
 0x546   :  { %v2023_v61 = vmul.f32 %v3330_v16, %v2022_v38  ;;  %v5987_v38 = vld [vmem:[#allocation42_spill] sm:$0xff]  ;;  %v5988_v16 = vld [vmem:[#allocation44_spill] sm:$0xff] }
 0x548   :  { %v5026_v10 = vadd.f32 %v3328_v14, %v2023_v61  ;;  %v5986_v14 = vld [vmem:[#allocation55_spill] sm:$0xff]  ;;  %v5989_v61 = vld [vmem:[#allocation46_spill] sm:$0xff] }
 0x54a   :  { %v5038_v1 = vsel %vm725_vm9, %v5026_v10, %v4838_v21  ;;  %v5977_v21 = vld [vmem:[#allocation34_spill] sm:$0xff] }
 0x54b   :  { %v2032_v2 = vpack.c.bf16 %v5038_v1, %v5038_v1 }
 0x54d   :  { %2065 = vmatprep.mubr.bf16.mxu1 %v2032_v2  ;;  %2106 = vmatprep.mubr.bf16.mxu0 %v2032_v2 }
 0x54e   :  { %2066 = vmatmul.mubr.bf16.vlgmr.msra.gmra.mxu1 %v5044_v39  ;;  %2107 = vmatmul.mubr.bf16.vlgmr.msra.gmra.mxu0 %v5044_v39 }
 0x54f   :  { %2116 = vmatpush1.bf16.msra.mxu1 %v4621_v9  ;;  %2147 = vmatprep.mubr.bf16.mxu1 %v2032_v2  ;;  %v5990_v2 = vld [vmem:[#allocation48_spill] sm:$0xff] }
 0x550   :  { %2117 = vmatprep.subr.bf16.mxu1 %v4624_v22  ;;  %2213 = vmatpush1.bf16.msra.mxu0 %v4436_v33  ;;  %v5960_v33 = vld [vmem:[#allocation95_spill] sm:$0xff] }
 0x551   :  { %2214 = vmatprep.subr.bf16.mxu0 %v4439_v63  ;;  %v5961_v63 = vld [vmem:[#allocation96_spill] sm:$0xff] }
 0x553   :  { %2118 = vmatpush1.bf16.msra.mxu1 %v4852_v44 }
 0x554   :  { %2119 = vmatprep.subr.bf16.mxu1 %v4855_v11  ;;  %2215 = vmatpush1.bf16.msra.mxu0 %v4444_v31  ;;  %v5962_v31 = vld [vmem:[#allocation105_spill] sm:$0xff] }
 0x555   :  { %2216 = vmatprep.subr.bf16.mxu0 %v4447_v3  ;;  %v5963_v3 = vld [vmem:[#allocation106_spill] sm:$0xff] }
 0x557   :  { %2120 = vmatpush1.bf16.msra.mxu1 %v4860_v42 }
 0x558   :  { %2121 = vmatprep.subr.bf16.mxu1 %v4863_v55  ;;  %2217 = vmatpush1.bf16.msra.mxu0 %v4452_v5  ;;  %v5964_v5 = vld [vmem:[#allocation107_spill] sm:$0xff] }
 0x559   :  { %2218 = vmatprep.subr.bf16.mxu0 %v4455_v57  ;;  %v5965_v57 = vld [vmem:[#allocation108_spill] sm:$0xff] }
 0x55b   :  { %2122 = vmatpush1.bf16.msra.mxu1 %v4868_v23 }
 0x55c   :  { %2123 = vmatprep.subr.bf16.mxu1 %v4871_v17  ;;  %2219 = vmatpush1.bf16.msra.mxu0 %v5856_v24  ;;  %v5970_v24 = vld [vmem:[#allocation28_spill] sm:$0xff] }
 0x55d   :  { %2220 = vmatprep.subr.bf16.mxu0 %v5857_v13  ;;  %v5971_v13 = vld [vmem:[#allocation111_spill] sm:$0xff] }
 0x55f   :  { %2124 = vmatpush1.bf16.msra.mxu1 %v4876_v36 }
 0x560   :  { %2125 = vmatprep.subr.bf16.mxu1 %v4879_v40  ;;  %2221 = vmatpush1.bf16.msra.mxu0 %v5860_v25  ;;  %v5972_v25 = vld [vmem:[#allocation112_spill] sm:$0xff] }
 0x561   :  { %2222 = vmatprep.subr.bf16.mxu0 %v5861_v59  ;;  %v5973_v59 = vld [vmem:[#allocation30_spill] sm:$0xff] }
 0x563   :  { %2126 = vmatpush1.bf16.msra.mxu1 %v4884_v18 }
 0x564   :  { %2127 = vmatprep.subr.bf16.mxu1 %v4887_v35  ;;  %2223 = vmatpush1.bf16.msra.mxu0 %v5864_v26  ;;  %v5974_v26 = vld [vmem:[#allocation32_spill] sm:$0xff] }
 0x565   :  { %2224 = vmatprep.subr.bf16.mxu0 %v5865_v53  ;;  %v5975_v53 = vld [vmem:[#allocation113_spill] sm:$0xff] }
 0x567   :  { %2128 = vmatpush1.bf16.msra.mxu1 %v4892_v29 }
 0x568   :  { %2129 = vmatprep.subr.bf16.mxu1 %v4895_v30  ;;  %2225 = vmatpush1.bf16.msra.mxu0 %v4484_v7  ;;  %v5968_v7 = vld [vmem:[#allocation110_spill] sm:$0xff] }
 0x569   :  { %2226 = vmatprep.subr.bf16.mxu0 %v4487_v58  ;;  %v5969_v58 = vld [vmem:[#allocation26_spill] sm:$0xff] }
 0x56b   :  { %2130 = vmatpush1.bf16.msra.mxu1 %v4900_v27 }
 0x56c   :  { %2131 = vmatprep.subr.bf16.mxu1 %v4903_v19  ;;  %2227 = vmatpush1.bf16.msra.mxu0 %v4492_v49  ;;  %v5966_v49 = vld [vmem:[#allocation25_spill] sm:$0xff] }
 0x56d   :  { %2228 = vmatprep.subr.bf16.mxu0 %v4495_v45  ;;  %v5967_v45 = vld [vmem:[#allocation109_spill] sm:$0xff] }
 0x56f   :  { %2132 = vmatpush2.bf16.msra.mxu1 %v4908_v56 }
 0x570   :  { %2133 = vmatprep.subr.bf16.mxu1 %v4911_v34  ;;  %2229 = vmatpush2.bf16.msra.mxu0 %v4659_v6 }
 0x571   :  { %2230 = vmatprep.subr.bf16.mxu0 %v4662_v15 }
 0x573   :  { %2134 = vmatpush2.bf16.msra.mxu1 %v5960_v33 }
 0x574   :  { %2135 = vmatprep.subr.bf16.mxu1 %v5961_v63  ;;  %2231 = vmatpush2.bf16.msra.mxu0 %v4667_v0 }
 0x575   :  { %2232 = vmatprep.subr.bf16.mxu0 %v4670_v60 }
 0x577   :  { %2136 = vmatpush2.bf16.msra.mxu1 %v5962_v31 }
 0x578   :  { %2137 = vmatprep.subr.bf16.mxu1 %v5963_v3  ;;  %2233 = vmatpush2.bf16.msra.mxu0 %v4675_v51 }
 0x579   :  { %2234 = vmatprep.subr.bf16.mxu0 %v4678_v54 }
 0x57b   :  { %2138 = vmatpush2.bf16.msra.mxu1 %v5964_v5 }
 0x57c   :  { %2139 = vmatprep.subr.bf16.mxu1 %v5965_v57  ;;  %2235 = vmatpush2.bf16.msra.mxu0 %v4683_v47 }
 0x57d   :  { %2236 = vmatprep.subr.bf16.mxu0 %v5966_v49 }
 0x57f   :  { %2140 = vmatpush2.bf16.msra.mxu1 %v5967_v45 }
 0x580   :  { %2141 = vmatprep.subr.bf16.mxu1 %v5968_v7  ;;  %2237 = vmatpush2.bf16.msra.mxu0 %v5969_v58 }
 0x581   :  { %2238 = vmatprep.subr.bf16.mxu0 %v5970_v24 }
 0x583   :  { %2142 = vmatpush2.bf16.msra.mxu1 %v5971_v13 }
 0x584   :  { %2143 = vmatprep.subr.bf16.mxu1 %v5972_v25  ;;  %2239 = vmatpush2.bf16.msra.mxu0 %v5973_v59 }
 0x585   :  { %2240 = vmatprep.subr.bf16.mxu0 %v5974_v26 }
 0x587   :  { %2144 = vmatpush2.bf16.msra.mxu1 %v5975_v53 }
 0x588   :  { %2145 = vmatprep.subr.bf16.mxu1 %v5976_v20  ;;  %2241 = vmatpush2.bf16.msra.mxu0 %v5977_v21  ;;  %v6016_v20 = vld [vmem:[#allocation72_spill] sm:$0xff] }
 0x589   :  { %2242 = vmatprep.subr.bf16.mxu0 %v5978_v62 }
 0x58b   :  { %2146 = vmatpush2.bf16.msra.mxu1 %v5979_v41 }
 0x58c   :  { %2253 = vmatprep.subr.bf16.mxu1 %v5980_v43  ;;  %2243 = vmatpush2.bf16.msra.mxu0 %v5981_v37  ;;  %v5991_v43 = vld [vmem:[#allocation50_spill] sm:$0xff] }
 0x58d   :  { %2294 = vmatprep.subr.bf16.mxu0 %v5982_v50  ;;  %v5992_v50 = vld [vmem:[#allocation52_spill] sm:$0xff]  ;;  %v6015_v37 = vld [vmem:[#allocation70_spill] sm:$0xff] }
 0x58e   :  { %2148 = vmatmul.mubr.bf16.vlgmr.msra.gmra.mxu1 %v5044_v39  ;;  %v5993_v39 = vld [vmem:[#allocation54_spill] sm:$0xff] }
 0x58f   :  { %2254 = vmatpush1.bf16.msra.mxu1 %v5983_v52  ;;  %v5994_v52 = vld [vmem:[#allocation59_spill] sm:$0xff] }
 0x590   :  { %2255 = vmatprep.subr.bf16.mxu1 %v5984_v8  ;;  %v5995_v8 = vld [vmem:[#allocation61_spill] sm:$0xff] }
 0x593   :  { %2256 = vmatpush1.bf16.msra.mxu1 %v5985_v4  ;;  %v5996_v4 = vld [vmem:[#allocation81_spill] sm:$0xff] }
 0x594   :  { %2257 = vmatprep.subr.bf16.mxu1 %v5986_v14  ;;  %v5997_v14 = vld [vmem:[#allocation99_spill] sm:$0xff] }
 0x597   :  { %2258 = vmatpush1.bf16.msra.mxu1 %v5987_v38  ;;  %v5998_v38 = vld [vmem:[#allocation58_spill] sm:$0xff] }
 0x598   :  { %2259 = vmatprep.subr.bf16.mxu1 %v5988_v16  ;;  %v5999_v16 = vld [vmem:[#allocation97_spill] sm:$0xff] }
 0x59b   :  { %2260 = vmatpush1.bf16.msra.mxu1 %v5989_v61  ;;  %v6000_v61 = vld [vmem:[#allocation98_spill] sm:$0xff] }
 0x59c   :  { %2261 = vmatprep.subr.bf16.mxu1 %v5990_v2  ;;  %v6001_v2 = vld [vmem:[#allocation27_spill] sm:$0xff] }
 0x59f   :  { %2262 = vmatpush1.bf16.msra.mxu1 %v5991_v43  ;;  %v6002_v43 = vld [vmem:[#allocation29_spill] sm:$0xff] }
 0x5a0   :  { %2263 = vmatprep.subr.bf16.mxu1 %v5992_v50  ;;  %v6003_v50 = vld [vmem:[#allocation43_spill] sm:$0xff] }
 0x5a3   :  { %2264 = vmatpush1.bf16.msra.mxu1 %v5993_v39  ;;  %v6004_v39 = vld [vmem:[#allocation45_spill] sm:$0xff] }
 0x5a4   :  { %2265 = vmatprep.subr.bf16.mxu1 %v5994_v52  ;;  %v6005_v52 = vld [vmem:[#allocation31_spill] sm:$0xff] }
 0x5a7   :  { %2266 = vmatpush1.bf16.msra.mxu1 %v5995_v8  ;;  %v6006_v8 = vld [vmem:[#allocation33_spill] sm:$0xff] }
 0x5a8   :  { %2267 = vmatprep.subr.bf16.mxu1 %v5996_v4  ;;  %v6007_v4 = vld [vmem:[#allocation47_spill] sm:$0xff] }
 0x5ab   :  { %2268 = vmatpush1.bf16.msra.mxu1 %v5997_v14  ;;  %v6008_v14 = vld [vmem:[#allocation49_spill] sm:$0xff] }
 0x5ac   :  { %2269 = vmatprep.subr.bf16.mxu1 %v5998_v38  ;;  %v6009_v38 = vld [vmem:[#allocation35_spill] sm:$0xff] }
 0x5af   :  { %2270 = vmatpush2.bf16.msra.mxu1 %v5999_v16  ;;  %v6010_v16 = vld [vmem:[#allocation37_spill] sm:$0xff] }
 0x5b0   :  { %2271 = vmatprep.subr.bf16.mxu1 %v6000_v61  ;;  %v6011_v61 = vld [vmem:[#allocation102_spill] sm:$0xff] }
 0x5b3   :  { %2272 = vmatpush2.bf16.msra.mxu1 %v6001_v2  ;;  %v6012_v2 = vld [vmem:[#allocation103_spill] sm:$0xff] }
 0x5b4   :  { %2273 = vmatprep.subr.bf16.mxu1 %v6002_v43  ;;  %v6013_v43 = vld [vmem:[#allocation104_spill] sm:$0xff] }
 0x5b7   :  { %2274 = vmatpush2.bf16.msra.mxu1 %v6003_v50  ;;  %v6014_v50 = vld [vmem:[#allocation56_spill] sm:$0xff] }
 0x5b8   :  { %2275 = vmatprep.subr.bf16.mxu1 %v6004_v39 }
 0x5bb   :  { %2276 = vmatpush2.bf16.msra.mxu1 %v6005_v52 }
 0x5bc   :  { %2277 = vmatprep.subr.bf16.mxu1 %v6006_v8 }
 0x5bf   :  { %2278 = vmatpush2.bf16.msra.mxu1 %v6007_v4 }
 0x5c0   :  { %2279 = vmatprep.subr.bf16.mxu1 %v6008_v14 }
 0x5c3   :  { %2280 = vmatpush2.bf16.msra.mxu1 %v6009_v38 }
 0x5c4   :  { %2281 = vmatprep.subr.bf16.mxu1 %v6010_v16 }
 0x5c7   :  { %2282 = vmatpush2.bf16.msra.mxu1 %v6011_v61 }
 0x5c8   :  { %2283 = vmatprep.subr.bf16.mxu1 %v6012_v2 }
 0x5cb   :  { %2284 = vmatpush2.bf16.msra.mxu1 %v6013_v43 }
 0x5cc   :  { %2391 = vmatprep.subr.bf16.mxu1 %v6014_v50  ;;  %v6017_v50 = vld [vmem:[#allocation69_spill] sm:$0xff] }
 0x60e   :  { %v2067_v39 = vpop.f32.mrf.mxu1  ;;  %v2108_v52 = vpop.f32.mrf.mxu0 }
 0x60f   :  { %v2159_v8 = vadd.f32 %v2067_v39, %v6015_v37  ;;  %v2173_v37 = vadd.f32 %v5009_v12, %v2108_v52 }
 0x610   :  { %v2069_v41 = vpop.f32.mrf.mxu1  ;;  %v2110_v4 = vpop.f32.mrf.mxu0 }
 0x611   :  { %v3001_v62 = vmul.f32 -1.442695, %v2159_v8  ;;  %v2166_v61 = vadd.f32 %v2069_v41, %v6016_v20  ;;  %v2183_v43 = vadd.f32 %v2110_v4, %v6017_v50  ;;  %v6019_v4 = vld [vmem:[#allocation91_spill] sm:$0xff] }
 0x612   :  { %v2071_v14 = vpop.f32.mrf.mxu1  ;;  %v2112_v21 = vpop.f32.mrf.mxu0 }
 0x613   :  { %3331 = vpow2.f32 %v3001_v62  ;;  %v3002_v53 = vmul.f32 -1.442695, %v2166_v61  ;;  %v3003_v59 = vmul.f32 -1.442695, %v2183_v43  ;;  %v6018_v21 = vld [vmem:[#allocation71_spill] sm:$0xff]  ;;  %v2027_v43 = vsel %vm725_vm9, %v5026_v10, 0.0 }
 0x614   :  { %v2072_v38 = vpop.f32.mrf.mxu1  ;;  %v2113_v16 = vpop.f32.mrf.mxu0 }
 0x615   :  { %3333 = vpow2.f32 %v3002_v53 }
 0x620   :  { %v3332_v2 = vpop.eup %3331 }
 0x621   :  { %v2163_v26 = vadd.f32 1.0, %v3332_v2 }
 0x622   :  { %v3334_v25 = vpop.eup %3333 }
 0x623   :  { %3335 = vrcp.f32 %v2163_v26  ;;  %v2170_v38 = vadd.f32 1.0, %v3334_v25 }
 0x624   :  { %3337 = vpow2.f32 %v3003_v59 }
 0x630   :  { %v3336_v39 = vpop.eup %3335 }
 0x631   :  { %v2174_v8 = vmul.f32 %v3336_v39, %v2173_v37  ;;  %v3338_v20 = vpop.eup %3337  ;;  %v5160_v39 = vld [vmem:[%s5499_s5 + $0x1] ss:$0 sm:$0xff] }
 0x632   :  { %v2187_v41 = vadd.f32 1.0, %v3338_v20  ;;  %v6020_v20 = vld [vmem:[#allocation92_spill] sm:$0xff] }
 0x633   :  { %v2175_v62 = vadd.f32 %v2174_v8, %v6018_v21 }
 0x635   :  { %3339 = vtanh.f32 %v2175_v62 }
 0x636   :  { %3341 = vrcp.f32 %v2170_v38 }
 0x637   :  { %3343 = vrcp.f32 %v2187_v41 }
 0x642   :  { %v3340_v16 = vpop.eup %3339 }
 0x643   :  { %v2177_v53 = vsub.f32 %v5032_v28, %v3340_v16  ;;  %v3342_v26 = vpop.eup %3341 }
 0x644   :  { %v3344_v21 = vpop.eup %3343 }
 0x645   :  { %v2178_v61 = vmul.f32 %v3342_v26, %v2177_v53 }
 0x647   :  { %v2179_v2 = vadd.f32 %v3340_v16, %v2178_v61 }
 0x649   :  { %v2204_v59 = vsel %vm725_vm9, %v2179_v2, 0.0 }
 0x64a   :  { %v2767_v52 = vadd.f32 %v2204_v59, %v2027_v43 }
 0x64c   :  { %2775 = vst [vmem:[#allocation13 + $0x20] sm:$0xff] %v2767_v52 }
 0x64e   :  { %v2149_v25 = vpop.f32.mrf.mxu1 }
 0x64f   :  { %v2190_v14 = vadd.f32 %v2149_v25, %v6019_v4  ;;  %v5168_v25 = vsel %vm725_vm9, %v2179_v2, %v5032_v28  ;;  %v2025_v4 = vsel %vm724_vm8, %v5014_v32, 0.0  ;;  %v5190_v32 = vld [vmem:[#allocation12 + $0x150] ss:$24 sps:$4 sm:$0xff]   ;;  %v5198_v28 = vld [vmem:[#allocation12 + $0x120] ss:$24 sps:$4 sm:$0xff]  }
 0x650   :  { %v2151_v50 = vpop.f32.mrf.mxu1  ;;  %v5184_v48 = vpack.c.bf16 %v5168_v25, %v5168_v25  ;;  %v5214_v2 = vld [vmem:[#allocation12 + $0xc0] ss:$24 sps:$4 sm:$0xff]  }
 0x651   :  { %v3004_v37 = vmul.f32 -1.442695, %v2190_v14  ;;  %v2197_v8 = vadd.f32 %v5160_v39, %v2151_v50 }
 0x652   :  { %v2153_v62 = vpop.f32.mrf.mxu1 }
 0x653   :  { %3345 = vpow2.f32 %v3004_v37  ;;  %v2198_v10 = vmul.f32 %v3344_v21, %v2197_v8  ;;  %v5217_v21 = vld [vmem:[#allocation12 + $0x94] ss:$24 sps:$4 sm:$0xff]   ;;  %v5222_v62 = vld [vmem:[#allocation12 + $0x90] ss:$24 sps:$4 sm:$0xff]  }
 0x654   :  { %v2154_v38 = vpop.f32.mrf.mxu1 }
 0x655   :  { %v2199_v41 = vadd.f32 %v2198_v10, %v6020_v20  ;;  %v5225_v10 = vld [vmem:[#allocation12 + $0x64] ss:$24 sps:$4 sm:$0xff]   ;;  %v5230_v38 = vld [vmem:[#allocation12 + $0x60] ss:$24 sps:$4 sm:$0xff]   ;;  %v5233_v20 = vld [vmem:[#allocation12 + $0x34] ss:$24 sps:$4 sm:$0xff]  }
 0x657   :  { %3347 = vtanh.f32 %v2199_v41  ;;  %v5238_v41 = vld [vmem:[#allocation12 + $0x30] ss:$24 sps:$4 sm:$0xff]  }
 0x660   :  { %v3346_v16 = vpop.eup %3345 }
 0x661   :  { %v2194_v53 = vadd.f32 1.0, %v3346_v16  ;;  %v5241_v16 = vld [vmem:[#allocation12 + $0x4] ss:$24 sps:$4 sm:$0xff]  }
 0x663   :  { %3349 = vrcp.f32 %v2194_v53  ;;  %v5246_v53 = vld [vmem:[#allocation12] ss:$24 sps:$4 sm:$0xff]  }
 0x664   :  { %v3348_v26 = vpop.eup %3347 }
 0x665   :  { %v2201_v61 = vsub.f32 %v5038_v1, %v3348_v26 }
 0x670   :  { %v3350_v43 = vpop.eup %3349 }
 0x671   :  { %v2202_v59 = vmul.f32 %v3350_v43, %v2201_v61  ;;  %v6031_v61 = vld [vmem:[#allocation40_spill] sm:$0xff]  ;;  %v5287_v43 = vld [vmem:[#allocation12 + $0x158] ss:$24 sps:$4 sm:$0xff]  }
 0x672   :  { %6032 = vst [vmem:[#allocation68_spill] sm:$0xff] %v5287_v43 }
 0x673   :  { %v2203_v52 = vadd.f32 %v3348_v26, %v2202_v59  ;;  %v5249_v26 = vld [vmem:[#allocation12 + $0x2d4] ss:$24 sps:$4 sm:$0xff]  }
 0x674   :  { %v5290_v59 = vld [vmem:[#allocation12 + $0x12c] ss:$24 sps:$4 sm:$0xff]  }
 0x675   :  { %v2206_v14 = vsel %vm724_vm8, %v2203_v52, 0.0  ;;  %v5178_v50 = vsel %vm724_vm8, %v2203_v52, %v5038_v1  ;;  %v5209_v1 = vld [vmem:[#allocation12 + $0xc4] ss:$24 sps:$4 sm:$0xff]   ;;  %6033 = vst [vmem:[#allocation73_spill] sm:$0xff] %v5290_v59  ;;  %v5293_v52 = vld [vmem:[#allocation12 + $0x128] ss:$24 sps:$4 sm:$0xff]  }
 0x676   :  { %v2211_v37 = vpack.c.bf16 %v5178_v50, %v5178_v50  ;;  %v2766_v8 = vadd.f32 %v2206_v14, %v2025_v4  ;;  %6034 = vst [vmem:[#allocation67_spill] sm:$0xff] %v5293_v52  ;;  %v5296_v4 = vld [vmem:[#allocation12 + $0xfc] ss:$24 sps:$4 sm:$0xff]  }
 0x677   :  { %6035 = vst [vmem:[#allocation93_spill] sm:$0xff] %v5296_v4  ;;  %v6036_v14 = vld [vmem:[#allocation42_spill] sm:$0xff] }
 0x678   :  { %2244 = vmatprep.mubr.bf16.mxu0 %v2211_v37  ;;  %2774 = vst [vmem:[#allocation13 + $0x18] sm:$0xff] %v2766_v8  ;;  %2285 = vmatprep.mubr.bf16.mxu1 %v2211_v37  ;;  %v6038_v8 = vld [vmem:[#allocation46_spill] sm:$0xff] }
 0x679   :  { %2245 = vmatmul.mubr.bf16.vlgmr.msra.gmra.mxu0 %v5184_v48  ;;  %2286 = vmatmul.mubr.bf16.vlgmr.msra.gmra.mxu1 %v5184_v48 }
 0x67a   :  { %2295 = vmatpush1.bf16.msra.mxu0 %v4621_v9  ;;  %2326 = vmatprep.mubr.bf16.mxu0 %v2211_v37  ;;  %v5201_v9 = vld [vmem:[#allocation12 + $0xf4] ss:$24 sps:$4 sm:$0xff]  }
 0x67b   :  { %2296 = vmatprep.subr.bf16.mxu0 %v4624_v22  ;;  %2392 = vmatpush1.bf16.msra.mxu1 %v5190_v32  ;;  %v5206_v22 = vld [vmem:[#allocation12 + $0xf0] ss:$24 sps:$4 sm:$0xff]  }
 0x67c   :  { %2393 = vmatprep.subr.bf16.mxu1 %v5193_v46  ;;  %v6037_v37 = vld [vmem:[#allocation44_spill] sm:$0xff] }
 0x67e   :  { %2297 = vmatpush1.bf16.msra.mxu0 %v4852_v44 }
 0x67f   :  { %2298 = vmatprep.subr.bf16.mxu0 %v4855_v11  ;;  %2394 = vmatpush1.bf16.msra.mxu1 %v5198_v28 }
 0x680   :  { %2395 = vmatprep.subr.bf16.mxu1 %v5201_v9 }
 0x682   :  { %2299 = vmatpush1.bf16.msra.mxu0 %v4860_v42 }
 0x683   :  { %2300 = vmatprep.subr.bf16.mxu0 %v4863_v55  ;;  %2396 = vmatpush1.bf16.msra.mxu1 %v5206_v22 }
 0x684   :  { %2397 = vmatprep.subr.bf16.mxu1 %v5209_v1 }
 0x686   :  { %2301 = vmatpush1.bf16.msra.mxu0 %v4868_v23 }
 0x687   :  { %2302 = vmatprep.subr.bf16.mxu0 %v4871_v17  ;;  %2398 = vmatpush1.bf16.msra.mxu1 %v5214_v2 }
 0x688   :  { %2399 = vmatprep.subr.bf16.mxu1 %v5217_v21 }
 0x68a   :  { %2303 = vmatpush1.bf16.msra.mxu0 %v4876_v36 }
 0x68b   :  { %2304 = vmatprep.subr.bf16.mxu0 %v4879_v40  ;;  %2400 = vmatpush1.bf16.msra.mxu1 %v5222_v62 }
 0x68c   :  { %2401 = vmatprep.subr.bf16.mxu1 %v5225_v10 }
 0x68e   :  { %2305 = vmatpush1.bf16.msra.mxu0 %v4884_v18 }
 0x68f   :  { %2306 = vmatprep.subr.bf16.mxu0 %v4887_v35  ;;  %2402 = vmatpush1.bf16.msra.mxu1 %v5230_v38 }
 0x690   :  { %2403 = vmatprep.subr.bf16.mxu1 %v5233_v20 }
 0x692   :  { %2307 = vmatpush1.bf16.msra.mxu0 %v4892_v29 }
 0x693   :  { %2308 = vmatprep.subr.bf16.mxu0 %v4895_v30  ;;  %2404 = vmatpush1.bf16.msra.mxu1 %v5238_v41 }
 0x694   :  { %2405 = vmatprep.subr.bf16.mxu1 %v5241_v16 }
 0x696   :  { %2309 = vmatpush1.bf16.msra.mxu0 %v4900_v27 }
 0x697   :  { %2310 = vmatprep.subr.bf16.mxu0 %v4903_v19  ;;  %2406 = vmatpush1.bf16.msra.mxu1 %v5246_v53 }
 0x698   :  { %2407 = vmatprep.subr.bf16.mxu1 %v5249_v26 }
 0x69a   :  { %2311 = vmatpush2.bf16.msra.mxu0 %v4908_v56 }
 0x69b   :  { %2312 = vmatprep.subr.bf16.mxu0 %v4911_v34  ;;  %2408 = vmatpush2.bf16.msra.mxu1 %v4659_v6  ;;  %v6021_v6 = vld [vmem:[#allocation112_spill] sm:$0xff] }
 0x69c   :  { %2409 = vmatprep.subr.bf16.mxu1 %v4662_v15  ;;  %v6022_v15 = vld [vmem:[#allocation30_spill] sm:$0xff] }
 0x69e   :  { %2313 = vmatpush2.bf16.msra.mxu0 %v5960_v33 }
 0x69f   :  { %2314 = vmatprep.subr.bf16.mxu0 %v5961_v63  ;;  %2410 = vmatpush2.bf16.msra.mxu1 %v4667_v0  ;;  %v6023_v0 = vld [vmem:[#allocation32_spill] sm:$0xff] }
 0x6a0   :  { %2411 = vmatprep.subr.bf16.mxu1 %v4670_v60  ;;  %v6024_v60 = vld [vmem:[#allocation113_spill] sm:$0xff] }
 0x6a2   :  { %2315 = vmatpush2.bf16.msra.mxu0 %v5962_v31 }
 0x6a3   :  { %2316 = vmatprep.subr.bf16.mxu0 %v5963_v3  ;;  %2412 = vmatpush2.bf16.msra.mxu1 %v4675_v51  ;;  %v6025_v51 = vld [vmem:[#allocation114_spill] sm:$0xff] }
 0x6a4   :  { %2413 = vmatprep.subr.bf16.mxu1 %v4678_v54  ;;  %v6026_v54 = vld [vmem:[#allocation34_spill] sm:$0xff] }
 0x6a6   :  { %2317 = vmatpush2.bf16.msra.mxu0 %v5964_v5 }
 0x6a7   :  { %2318 = vmatprep.subr.bf16.mxu0 %v5965_v57  ;;  %2414 = vmatpush2.bf16.msra.mxu1 %v4683_v47  ;;  %v6027_v47 = vld [vmem:[#allocation36_spill] sm:$0xff] }
 0x6a8   :  { %2415 = vmatprep.subr.bf16.mxu1 %v5966_v49  ;;  %v6028_v49 = vld [vmem:[#allocation115_spill] sm:$0xff] }
 0x6aa   :  { %2319 = vmatpush2.bf16.msra.mxu0 %v5967_v45 }
 0x6ab   :  { %2320 = vmatprep.subr.bf16.mxu0 %v5968_v7  ;;  %2416 = vmatpush2.bf16.msra.mxu1 %v5969_v58  ;;  %v5281_v58 = vld [vmem:[#allocation12 + $0x15c] ss:$24 sps:$4 sm:$0xff]  }
 0x6ac   :  { %2417 = vmatprep.subr.bf16.mxu1 %v5970_v24  ;;  %6029 = vst [vmem:[#allocation66_spill] sm:$0xff] %v5281_v58  ;;  %v6030_v24 = vld [vmem:[#allocation38_spill] sm:$0xff] }
 0x6ae   :  { %2321 = vmatpush2.bf16.msra.mxu0 %v5971_v13 }
 0x6af   :  { %2322 = vmatprep.subr.bf16.mxu0 %v6021_v6  ;;  %2418 = vmatpush2.bf16.msra.mxu1 %v6022_v15  ;;  %v6040_v15 = vld [vmem:[#allocation50_spill] sm:$0xff] }
 0x6b0   :  { %2419 = vmatprep.subr.bf16.mxu1 %v6023_v0  ;;  %v6041_v0 = vld [vmem:[#allocation52_spill] sm:$0xff] }
 0x6b2   :  { %2323 = vmatpush2.bf16.msra.mxu0 %v6024_v60 }
 0x6b3   :  { %2324 = vmatprep.subr.bf16.mxu0 %v6025_v51  ;;  %2420 = vmatpush2.bf16.msra.mxu1 %v6026_v54  ;;  %v6042_v54 = vld [vmem:[#allocation54_spill] sm:$0xff] }
 0x6b4   :  { %2421 = vmatprep.subr.bf16.mxu1 %v6027_v47  ;;  %v6043_v47 = vld [vmem:[#allocation59_spill] sm:$0xff] }
 0x6b6   :  { %2325 = vmatpush2.bf16.msra.mxu0 %v6028_v49  ;;  %v6064_v49 = vld [vmem:[#allocation76_spill] sm:$0xff] }
 0x6b7   :  { %2432 = vmatprep.subr.bf16.mxu0 %v5281_v58  ;;  %2422 = vmatpush2.bf16.msra.mxu1 %v6030_v24  ;;  %v6044_v24 = vld [vmem:[#allocation61_spill] sm:$0xff] }
 0x6b8   :  { %2473 = vmatprep.subr.bf16.mxu1 %v6031_v61  ;;  %v6045_v61 = vld [vmem:[#allocation81_spill] sm:$0xff] }
 0x6b9   :  { %2327 = vmatmul.mubr.bf16.vlgmr.msra.gmra.mxu0 %v5184_v48  ;;  %v6039_v48 = vld [vmem:[#allocation48_spill] sm:$0xff] }
 0x6ba   :  { %2433 = vmatpush1.bf16.msra.mxu0 %v5287_v43 }
 0x6bb   :  { %2434 = vmatprep.subr.bf16.mxu0 %v5290_v59 }
 0x6be   :  { %2435 = vmatpush1.bf16.msra.mxu0 %v5293_v52  ;;  %v6063_v52 = vld [vmem:[#allocation74_spill] sm:$0xff] }
 0x6bf   :  { %2436 = vmatprep.subr.bf16.mxu0 %v5296_v4  ;;  %v6046_v4 = vld [vmem:[#allocation99_spill] sm:$0xff] }
 0x6c2   :  { %2437 = vmatpush1.bf16.msra.mxu0 %v6036_v14  ;;  %v6047_v14 = vld [vmem:[#allocation58_spill] sm:$0xff] }
 0x6c3   :  { %2438 = vmatprep.subr.bf16.mxu0 %v6037_v37  ;;  %v6048_v37 = vld [vmem:[#allocation97_spill] sm:$0xff] }
 0x6c6   :  { %2439 = vmatpush1.bf16.msra.mxu0 %v6038_v8  ;;  %v6049_v8 = vld [vmem:[#allocation98_spill] sm:$0xff] }
 0x6c7   :  { %2440 = vmatprep.subr.bf16.mxu0 %v6039_v48  ;;  %v6050_v48 = vld [vmem:[#allocation27_spill] sm:$0xff] }
 0x6ca   :  { %2441 = vmatpush1.bf16.msra.mxu0 %v6040_v15  ;;  %v6051_v15 = vld [vmem:[#allocation29_spill] sm:$0xff] }
 0x6cb   :  { %2442 = vmatprep.subr.bf16.mxu0 %v6041_v0  ;;  %v6052_v0 = vld [vmem:[#allocation43_spill] sm:$0xff] }
 0x6ce   :  { %2443 = vmatpush1.bf16.msra.mxu0 %v6042_v54  ;;  %v6053_v54 = vld [vmem:[#allocation45_spill] sm:$0xff] }
 0x6cf   :  { %2444 = vmatprep.subr.bf16.mxu0 %v6043_v47  ;;  %v6054_v47 = vld [vmem:[#allocation31_spill] sm:$0xff] }
 0x6d2   :  { %2445 = vmatpush1.bf16.msra.mxu0 %v6044_v24  ;;  %v6055_v24 = vld [vmem:[#allocation33_spill] sm:$0xff] }
 0x6d3   :  { %2446 = vmatprep.subr.bf16.mxu0 %v6045_v61  ;;  %v6056_v61 = vld [vmem:[#allocation47_spill] sm:$0xff] }
 0x6d6   :  { %2447 = vmatpush1.bf16.msra.mxu0 %v6046_v4  ;;  %v6057_v4 = vld [vmem:[#allocation49_spill] sm:$0xff] }
 0x6d7   :  { %2448 = vmatprep.subr.bf16.mxu0 %v6047_v14  ;;  %v6058_v14 = vld [vmem:[#allocation35_spill] sm:$0xff] }
 0x6da   :  { %2449 = vmatpush2.bf16.msra.mxu0 %v6048_v37  ;;  %v6059_v37 = vld [vmem:[#allocation37_spill] sm:$0xff] }
 0x6db   :  { %2450 = vmatprep.subr.bf16.mxu0 %v6049_v8  ;;  %v6060_v8 = vld [vmem:[#allocation102_spill] sm:$0xff] }
 0x6de   :  { %2451 = vmatpush2.bf16.msra.mxu0 %v6050_v48  ;;  %v6061_v48 = vld [vmem:[#allocation103_spill] sm:$0xff] }
 0x6df   :  { %2452 = vmatprep.subr.bf16.mxu0 %v6051_v15  ;;  %v6062_v15 = vld [vmem:[#allocation104_spill] sm:$0xff] }
 0x6e2   :  { %2453 = vmatpush2.bf16.msra.mxu0 %v6052_v0  ;;  %v3530_v0 = vld [vmem:[#allocation12 + $0x154] ss:$24 sps:$4 sm:$0xff]  }
 0x6e3   :  { %2454 = vmatprep.subr.bf16.mxu0 %v6053_v54 }
 0x6e6   :  { %2455 = vmatpush2.bf16.msra.mxu0 %v6054_v47 }
 0x6e7   :  { %2456 = vmatprep.subr.bf16.mxu0 %v6055_v24 }
 0x6ea   :  { %2457 = vmatpush2.bf16.msra.mxu0 %v6056_v61 }
 0x6eb   :  { %2458 = vmatprep.subr.bf16.mxu0 %v6057_v4 }
 0x6ee   :  { %2459 = vmatpush2.bf16.msra.mxu0 %v6058_v14 }
 0x6ef   :  { %2460 = vmatprep.subr.bf16.mxu0 %v6059_v37 }
 0x6f2   :  { %2461 = vmatpush2.bf16.msra.mxu0 %v6060_v8 }
 0x6f3   :  { %2462 = vmatprep.subr.bf16.mxu0 %v6061_v48 }
 0x6f6   :  { %2463 = vmatpush2.bf16.msra.mxu0 %v6062_v15  ;;  %v6065_v15 = vld [vmem:[#allocation65_spill] sm:$0xff] }
 0x6f7   :  { %2570 = vmatprep.subr.bf16.mxu0 %v3530_v0 }
 0x739   :  { %v2246_v54 = vpop.f32.mrf.mxu0  ;;  %v2287_v47 = vpop.f32.mrf.mxu1 }
 0x73a   :  { %v2338_v24 = vadd.f32 %v2246_v54, %v6063_v52  ;;  %v2352_v52 = vadd.f32 %v5009_v12, %v2287_v47 }
 0x73b   :  { %v2248_v59 = vpop.f32.mrf.mxu0  ;;  %v2289_v61 = vpop.f32.mrf.mxu1 }
 0x73c   :  { %v3005_v43 = vmul.f32 -1.442695, %v2338_v24  ;;  %v2345_v8 = vadd.f32 %v2248_v59, %v6064_v49  ;;  %v2362_v0 = vadd.f32 %v2289_v61, %v6065_v15 }
 0x73d   :  { %v2250_v4 = vpop.f32.mrf.mxu0  ;;  %v2291_v58 = vpop.f32.mrf.mxu1 }
 0x73e   :  { %3351 = vpow2.f32 %v3005_v43  ;;  %v3006_v51 = vmul.f32 -1.442695, %v2345_v8  ;;  %v3007_v6 = vmul.f32 -1.442695, %v2362_v0  ;;  %v6066_v58 = vld [vmem:[#allocation75_spill] sm:$0xff]  ;;  %v6069_v0 = vld [vmem:[#allocation89_spill] sm:$0xff] }
 0x73f   :  { %v2251_v14 = vpop.f32.mrf.mxu0  ;;  %v2292_v37 = vpop.f32.mrf.mxu1  ;;  %v6067_v8 = vld [vmem:[#allocation63_spill] sm:$0xff] }
 0x740   :  { %3353 = vpow2.f32 %v3006_v51  ;;  %v1848_v47 = vsel %vm726_vm7, %v6067_v8, 0.0 }
 0x74b   :  { %v3352_v48 = vpop.eup %3351 }
 0x74c   :  { %v2342_v60 = vadd.f32 1.0, %v3352_v48  ;;  %v3563_v48 = vld [vmem:[#allocation12 + $0x2a8] ss:$24 sps:$4 sm:$0xff]  }
 0x74d   :  { %v3354_v13 = vpop.eup %3353 }
 0x74e   :  { %3355 = vrcp.f32 %v2342_v60  ;;  %v2349_v4 = vadd.f32 1.0, %v3354_v13 }
 0x74f   :  { %3357 = vpow2.f32 %v3007_v6 }
 0x75b   :  { %v3356_v54 = vpop.eup %3355 }
 0x75c   :  { %v2353_v24 = vmul.f32 %v3356_v54, %v2352_v52  ;;  %v3358_v49 = vpop.eup %3357 }
 0x75d   :  { %v2366_v59 = vadd.f32 1.0, %v3358_v49 }
 0x75e   :  { %v2354_v43 = vadd.f32 %v2353_v24, %v6066_v58 }
 0x760   :  { %3359 = vtanh.f32 %v2354_v43 }
 0x761   :  { %3361 = vrcp.f32 %v2349_v4 }
 0x762   :  { %3363 = vrcp.f32 %v2366_v59 }
 0x76d   :  { %v3360_v14 = vpop.eup %3359 }
 0x76e   :  { %v2356_v51 = vsub.f32 %v5168_v25, %v3360_v14  ;;  %v3362_v60 = vpop.eup %3361 }
 0x76f   :  { %v3364_v43 = vpop.eup %3363 }
 0x770   :  { %v2357_v61 = vmul.f32 %v3362_v60, %v2356_v51 }
 0x772   :  { %v2358_v37 = vadd.f32 %v3360_v14, %v2357_v61  ;;  %v6070_v14 = vld [vmem:[#allocation90_spill] sm:$0xff] }
 0x774   :  { %v2383_v6 = vsel %vm726_vm7, %v2358_v37, 0.0 }
 0x775   :  { %v2768_v15 = vadd.f32 %v2383_v6, %v1848_v47 }
 0x777   :  { %2776 = vst [vmem:[#allocation13 + $0x28] sm:$0xff] %v2768_v15 }
 0x779   :  { %v2328_v13 = vpop.f32.mrf.mxu0 }
 0x77a   :  { %v2369_v52 = vadd.f32 %v2328_v13, %v6069_v0  ;;  %v5344_v0 = vsel %vm726_vm7, %v2358_v37, %v5168_v25  ;;  %v5364_v37 = vld [vmem:[#allocation12 + $0x160] ss:$24 sps:$4 sm:$0xff]  }
 0x77b   :  { %v2330_v54 = vpop.f32.mrf.mxu0  ;;  %v5360_v25 = vpack.c.bf16 %v5344_v0, %v5344_v0 }
 0x77c   :  { %v3008_v24 = vmul.f32 -1.442695, %v2369_v52  ;;  %v2376_v58 = vadd.f32 %v5160_v39, %v2330_v54  ;;  %v6071_v52 = vld [vmem:[#allocation62_spill] sm:$0xff]  ;;  %v3575_v54 = vld [vmem:[#allocation12 + $0x188] ss:$24 sps:$4 sm:$0xff]  }
 0x77d   :  { %v2332_v4 = vpop.f32.mrf.mxu0 }
 0x77e   :  { %3365 = vpow2.f32 %v3008_v24  ;;  %v2377_v49 = vmul.f32 %v3364_v43, %v2376_v58  ;;  %v1846_v24 = vsel %vm723_vm6, %v6071_v52, 0.0  ;;  %v3574_v52 = vld [vmem:[#allocation12 + $0x18c] ss:$24 sps:$4 sm:$0xff]  }
 0x77f   :  { %v2333_v59 = vpop.f32.mrf.mxu0 }
 0x780   :  { %v2378_v51 = vadd.f32 %v2377_v49, %v6070_v14  ;;  %v3564_v59 = vld [vmem:[#allocation12 + $0x27c] ss:$24 sps:$4 sm:$0xff]   ;;  %v3565_v14 = vld [vmem:[#allocation12 + $0x278] ss:$24 sps:$4 sm:$0xff]  }
 0x782   :  { %3367 = vtanh.f32 %v2378_v51  ;;  %v3566_v51 = vld [vmem:[#allocation12 + $0x24c] ss:$24 sps:$4 sm:$0xff]  }
 0x78b   :  { %v3366_v60 = vpop.eup %3365 }
 0x78c   :  { %v2373_v61 = vadd.f32 1.0, %v3366_v60  ;;  %v3567_v60 = vld [vmem:[#allocation12 + $0x248] ss:$24 sps:$4 sm:$0xff]  }
 0x78e   :  { %3369 = vrcp.f32 %v2373_v61  ;;  %v3568_v61 = vld [vmem:[#allocation12 + $0x21c] ss:$24 sps:$4 sm:$0xff]  }
 0x78f   :  { %v3368_v8 = vpop.eup %3367 }
 0x790   :  { %v2380_v47 = vsub.f32 %v5178_v50, %v3368_v8 }
 0x79b   :  { %v3370_v6 = vpop.eup %3369 }
 0x79c   :  { %v2381_v15 = vmul.f32 %v3370_v6, %v2380_v47  ;;  %v3570_v47 = vld [vmem:[#allocation12 + $0x1ec] ss:$24 sps:$4 sm:$0xff]   ;;  %v3571_v6 = vld [vmem:[#allocation12 + $0x1e8] ss:$24 sps:$4 sm:$0xff]  }
 0x79e   :  { %v2382_v13 = vadd.f32 %v3368_v8, %v2381_v15  ;;  %v3569_v8 = vld [vmem:[#allocation12 + $0x218] ss:$24 sps:$4 sm:$0xff]   ;;  %v3572_v15 = vld [vmem:[#allocation12 + $0x1bc] ss:$24 sps:$4 sm:$0xff]  }
 0x7a0   :  { %v2385_v58 = vsel %vm723_vm6, %v2382_v13, 0.0  ;;  %v5354_v43 = vsel %vm723_vm6, %v2382_v13, %v5178_v50  ;;  %v5367_v50 = vld [vmem:[#allocation12 + $0x134] ss:$24 sps:$4 sm:$0xff]   ;;  %v3573_v13 = vld [vmem:[#allocation12 + $0x1b8] ss:$24 sps:$4 sm:$0xff]  }
 0x7a1   :  { %v2390_v4 = vpack.c.bf16 %v5354_v43, %v5354_v43  ;;  %v2765_v49 = vadd.f32 %v2385_v58, %v1846_v24 }
 0x7a3   :  { %2423 = vmatprep.mubr.bf16.mxu1 %v2390_v4  ;;  %2773 = vst [vmem:[#allocation13 + $0x10] sm:$0xff] %v2765_v49  ;;  %2464 = vmatprep.mubr.bf16.mxu0 %v2390_v4 }
 0x7a4   :  { %2424 = vmatmul.mubr.bf16.vlgmr.msra.gmra.mxu1 %v5360_v25  ;;  %2465 = vmatmul.mubr.bf16.vlgmr.msra.gmra.mxu0 %v5360_v25 }
 0x7a5   :  { %2474 = vmatpush1.bf16.msra.mxu1 %v5364_v37  ;;  %2505 = vmatprep.mubr.bf16.mxu1 %v2390_v4  ;;  %v6083_v4 = vld [vmem:[#allocation78_spill] sm:$0xff] }
 0x7a6   :  { %2475 = vmatprep.subr.bf16.mxu1 %v5367_v50  ;;  %2571 = vmatpush1.bf16.msra.mxu0 %v5190_v32  ;;  %v6081_v32 = vld [vmem:[#allocation67_spill] sm:$0xff] }
 0x7a7   :  { %2572 = vmatprep.subr.bf16.mxu0 %v5193_v46  ;;  %v6082_v46 = vld [vmem:[#allocation93_spill] sm:$0xff] }
 0x7a9   :  { %2476 = vmatpush1.bf16.msra.mxu1 %v4852_v44  ;;  %v3533_v44 = vld [vmem:[#allocation12 + $0x2d0] ss:$24 sps:$4 sm:$0xff]  }
 0x7aa   :  { %2477 = vmatprep.subr.bf16.mxu1 %v4855_v11  ;;  %2573 = vmatpush1.bf16.msra.mxu0 %v5198_v28  ;;  %v3534_v11 = vld [vmem:[#allocation12 + $0x2a4] ss:$24 sps:$4 sm:$0xff]   ;;  %v3549_v28 = vld [vmem:[#allocation12 + $0xf8] ss:$24 sps:$4 sm:$0xff]  }
 0x7ab   :  { %2574 = vmatprep.subr.bf16.mxu0 %v5201_v9  ;;  %v3550_v9 = vld [vmem:[#allocation12 + $0xcc] ss:$24 sps:$4 sm:$0xff]  }
 0x7ad   :  { %2478 = vmatpush1.bf16.msra.mxu1 %v4860_v42  ;;  %v3535_v42 = vld [vmem:[#allocation12 + $0x2a0] ss:$24 sps:$4 sm:$0xff]  }
 0x7ae   :  { %2479 = vmatprep.subr.bf16.mxu1 %v4863_v55  ;;  %2575 = vmatpush1.bf16.msra.mxu0 %v5206_v22  ;;  %v3536_v55 = vld [vmem:[#allocation12 + $0x274] ss:$24 sps:$4 sm:$0xff]   ;;  %v3551_v22 = vld [vmem:[#allocation12 + $0xc8] ss:$24 sps:$4 sm:$0xff]  }
 0x7af   :  { %2576 = vmatprep.subr.bf16.mxu0 %v5209_v1  ;;  %v3552_v1 = vld [vmem:[#allocation12 + $0x9c] ss:$24 sps:$4 sm:$0xff]  }
 0x7b1   :  { %2480 = vmatpush1.bf16.msra.mxu1 %v4868_v23  ;;  %v3537_v23 = vld [vmem:[#allocation12 + $0x270] ss:$24 sps:$4 sm:$0xff]  }
 0x7b2   :  { %2481 = vmatprep.subr.bf16.mxu1 %v4871_v17  ;;  %2577 = vmatpush1.bf16.msra.mxu0 %v5214_v2  ;;  %v3538_v17 = vld [vmem:[#allocation12 + $0x244] ss:$24 sps:$4 sm:$0xff]   ;;  %v3553_v2 = vld [vmem:[#allocation12 + $0x98] ss:$24 sps:$4 sm:$0xff]  }
 0x7b3   :  { %2578 = vmatprep.subr.bf16.mxu0 %v5217_v21  ;;  %v3554_v21 = vld [vmem:[#allocation12 + $0x6c] ss:$24 sps:$4 sm:$0xff]  }
 0x7b5   :  { %2482 = vmatpush1.bf16.msra.mxu1 %v4876_v36  ;;  %v3539_v36 = vld [vmem:[#allocation12 + $0x240] ss:$24 sps:$4 sm:$0xff]  }
 0x7b6   :  { %2483 = vmatprep.subr.bf16.mxu1 %v4879_v40  ;;  %2579 = vmatpush1.bf16.msra.mxu0 %v5222_v62  ;;  %v3540_v40 = vld [vmem:[#allocation12 + $0x214] ss:$24 sps:$4 sm:$0xff]   ;;  %v3555_v62 = vld [vmem:[#allocation12 + $0x68] ss:$24 sps:$4 sm:$0xff]  }
 0x7b7   :  { %2580 = vmatprep.subr.bf16.mxu0 %v5225_v10  ;;  %v3556_v10 = vld [vmem:[#allocation12 + $0x3c] ss:$24 sps:$4 sm:$0xff]  }
 0x7b9   :  { %2484 = vmatpush1.bf16.msra.mxu1 %v4884_v18  ;;  %v3541_v18 = vld [vmem:[#allocation12 + $0x210] ss:$24 sps:$4 sm:$0xff]  }
 0x7ba   :  { %2485 = vmatprep.subr.bf16.mxu1 %v4887_v35  ;;  %2581 = vmatpush1.bf16.msra.mxu0 %v5230_v38  ;;  %v3542_v35 = vld [vmem:[#allocation12 + $0x1e4] ss:$24 sps:$4 sm:$0xff]   ;;  %v3557_v38 = vld [vmem:[#allocation12 + $0x38] ss:$24 sps:$4 sm:$0xff]  }
 0x7bb   :  { %2582 = vmatprep.subr.bf16.mxu0 %v5233_v20  ;;  %v3558_v20 = vld [vmem:[#allocation12 + $0xc] ss:$24 sps:$4 sm:$0xff]  }
 0x7bd   :  { %2486 = vmatpush1.bf16.msra.mxu1 %v4892_v29  ;;  %v6073_v29 = vld [vmem:[#allocation111_spill] sm:$0xff] }
 0x7be   :  { %2487 = vmatprep.subr.bf16.mxu1 %v4895_v30  ;;  %2583 = vmatpush1.bf16.msra.mxu0 %v5238_v41  ;;  %v6074_v30 = vld [vmem:[#allocation112_spill] sm:$0xff] }
 0x7bf   :  { %2584 = vmatprep.subr.bf16.mxu0 %v5241_v16  ;;  %v3559_v41 = vld [vmem:[#allocation12 + $0x8] ss:$24 sps:$4 sm:$0xff]   ;;  %v3560_v16 = vld [vmem:[#allocation12 + $0x2dc] ss:$24 sps:$4 sm:$0xff]  }
 0x7c1   :  { %2488 = vmatpush1.bf16.msra.mxu1 %v4900_v27  ;;  %v3543_v27 = vld [vmem:[#allocation12 + $0x1e0] ss:$24 sps:$4 sm:$0xff]  }
 0x7c2   :  { %2489 = vmatprep.subr.bf16.mxu1 %v4903_v19  ;;  %2585 = vmatpush1.bf16.msra.mxu0 %v5246_v53  ;;  %v3544_v19 = vld [vmem:[#allocation12 + $0x1b4] ss:$24 sps:$4 sm:$0xff]   ;;  %v3561_v53 = vld [vmem:[#allocation12 + $0x2d8] ss:$24 sps:$4 sm:$0xff]  }
 0x7c3   :  { %2586 = vmatprep.subr.bf16.mxu0 %v5249_v26  ;;  %v3562_v26 = vld [vmem:[#allocation12 + $0x2ac] ss:$24 sps:$4 sm:$0xff]  }
 0x7c5   :  { %2490 = vmatpush2.bf16.msra.mxu1 %v4908_v56  ;;  %v6075_v56 = vld [vmem:[#allocation113_spill] sm:$0xff] }
 0x7c6   :  { %2491 = vmatprep.subr.bf16.mxu1 %v4911_v34  ;;  %2587 = vmatpush2.bf16.msra.mxu0 %v3533_v44  ;;  %v6076_v34 = vld [vmem:[#allocation114_spill] sm:$0xff] }
 0x7c7   :  { %2588 = vmatprep.subr.bf16.mxu0 %v3534_v11 }
 0x7c9   :  { %2492 = vmatpush2.bf16.msra.mxu1 %v5960_v33  ;;  %v3545_v33 = vld [vmem:[#allocation12 + $0x1b0] ss:$24 sps:$4 sm:$0xff]  }
 0x7ca   :  { %2493 = vmatprep.subr.bf16.mxu1 %v5961_v63  ;;  %2589 = vmatpush2.bf16.msra.mxu0 %v3535_v42  ;;  %v3546_v63 = vld [vmem:[#allocation12 + $0x184] ss:$24 sps:$4 sm:$0xff]  }
 0x7cb   :  { %2590 = vmatprep.subr.bf16.mxu0 %v3536_v55 }
 0x7cd   :  { %2494 = vmatpush2.bf16.msra.mxu1 %v5962_v31  ;;  %v6077_v31 = vld [vmem:[#allocation115_spill] sm:$0xff] }
 0x7ce   :  { %2495 = vmatprep.subr.bf16.mxu1 %v5963_v3  ;;  %2591 = vmatpush2.bf16.msra.mxu0 %v3537_v23  ;;  %v6078_v3 = vld [vmem:[#allocation66_spill] sm:$0xff] }
 0x7cf   :  { %2592 = vmatprep.subr.bf16.mxu0 %v3538_v17 }
 0x7d1   :  { %2496 = vmatpush2.bf16.msra.mxu1 %v5964_v5  ;;  %v3547_v5 = vld [vmem:[#allocation12 + $0x180] ss:$24 sps:$4 sm:$0xff]  }
 0x7d2   :  { %2497 = vmatprep.subr.bf16.mxu1 %v5965_v57  ;;  %2593 = vmatpush2.bf16.msra.mxu0 %v3539_v36  ;;  %v3548_v57 = vld [vmem:[#allocation12 + $0x164] ss:$24 sps:$4 sm:$0xff]   ;;  %v6084_v36 = vld [vmem:[#allocation80_spill] sm:$0xff] }
 0x7d3   :  { %2594 = vmatprep.subr.bf16.mxu0 %v3540_v40 }
 0x7d5   :  { %2498 = vmatpush2.bf16.msra.mxu1 %v5967_v45  ;;  %v6079_v45 = vld [vmem:[#allocation68_spill] sm:$0xff] }
 0x7d6   :  { %2499 = vmatprep.subr.bf16.mxu1 %v5968_v7  ;;  %2595 = vmatpush2.bf16.msra.mxu0 %v3541_v18  ;;  %v6080_v7 = vld [vmem:[#allocation73_spill] sm:$0xff] }
 0x7d7   :  { %2596 = vmatprep.subr.bf16.mxu0 %v3542_v35 }
 0x7d9   :  { %2500 = vmatpush2.bf16.msra.mxu1 %v6073_v29 }
 0x7da   :  { %2501 = vmatprep.subr.bf16.mxu1 %v6074_v30  ;;  %2597 = vmatpush2.bf16.msra.mxu0 %v3543_v27  ;;  %v6085_v30 = vld [vmem:[#allocation60_spill] sm:$0xff] }
 0x7db   :  { %2598 = vmatprep.subr.bf16.mxu0 %v3544_v19 }
 0x7dd   :  { %2502 = vmatpush2.bf16.msra.mxu1 %v6075_v56 }
 0x7de   :  { %2503 = vmatprep.subr.bf16.mxu1 %v6076_v34  ;;  %2599 = vmatpush2.bf16.msra.mxu0 %v3545_v33 }
 0x7df   :  { %2600 = vmatprep.subr.bf16.mxu0 %v3546_v63 }
 0x7e1   :  { %2504 = vmatpush2.bf16.msra.mxu1 %v6077_v31  ;;  %v6086_v31 = vld [vmem:[#allocation79_spill] sm:$0xff] }
 0x7e2   :  { %2611 = vmatprep.subr.bf16.mxu1 %v6078_v3  ;;  %2601 = vmatpush2.bf16.msra.mxu0 %v3547_v5 }
 0x7e3   :  { %2652 = vmatprep.subr.bf16.mxu0 %v3548_v57 }
 0x7e4   :  { %2506 = vmatmul.mubr.bf16.vlgmr.msra.gmra.mxu1 %v5360_v25 }
 0x7e5   :  { %2612 = vmatpush1.bf16.msra.mxu1 %v6079_v45 }
 0x7e6   :  { %2613 = vmatprep.subr.bf16.mxu1 %v6080_v7 }
 0x7e9   :  { %2614 = vmatpush1.bf16.msra.mxu1 %v6081_v32 }
 0x7ea   :  { %2615 = vmatprep.subr.bf16.mxu1 %v6082_v46 }
 0x7ed   :  { %2616 = vmatpush1.bf16.msra.mxu1 %v3549_v28 }
 0x7ee   :  { %2617 = vmatprep.subr.bf16.mxu1 %v3550_v9 }
 0x7f1   :  { %2618 = vmatpush1.bf16.msra.mxu1 %v3551_v22  ;;  %v6087_v22 = vld [vmem:[#allocation24_spill] sm:$0xff] }
 0x7f2   :  { %2619 = vmatprep.subr.bf16.mxu1 %v3552_v1 }
 0x7f5   :  { %2620 = vmatpush1.bf16.msra.mxu1 %v3553_v2 }
 0x7f6   :  { %2621 = vmatprep.subr.bf16.mxu1 %v3554_v21 }
 0x7f9   :  { %2622 = vmatpush1.bf16.msra.mxu1 %v3555_v62 }
 0x7fa   :  { %2623 = vmatprep.subr.bf16.mxu1 %v3556_v10  ;;  %v6089_v10 = vld [vmem:[#allocation87_spill] sm:$0xff] }
 0x7fd   :  { %2624 = vmatpush1.bf16.msra.mxu1 %v3557_v38 }
 0x7fe   :  { %2625 = vmatprep.subr.bf16.mxu1 %v3558_v20 }
 0x801   :  { %2626 = vmatpush1.bf16.msra.mxu1 %v3559_v41 }
 0x802   :  { %2627 = vmatprep.subr.bf16.mxu1 %v3560_v16 }
 0x805   :  { %2628 = vmatpush2.bf16.msra.mxu1 %v3561_v53 }
 0x806   :  { %2629 = vmatprep.subr.bf16.mxu1 %v3562_v26 }
 0x809   :  { %2630 = vmatpush2.bf16.msra.mxu1 %v3563_v48 }
 0x80a   :  { %2631 = vmatprep.subr.bf16.mxu1 %v3564_v59 }
 0x80d   :  { %2632 = vmatpush2.bf16.msra.mxu1 %v3565_v14  ;;  %v6090_v14 = vld [vmem:[#allocation88_spill] sm:$0xff] }
 0x80e   :  { %2633 = vmatprep.subr.bf16.mxu1 %v3566_v51 }
 0x811   :  { %2634 = vmatpush2.bf16.msra.mxu1 %v3567_v60 }
 0x812   :  { %2635 = vmatprep.subr.bf16.mxu1 %v3568_v61 }
 0x815   :  { %2636 = vmatpush2.bf16.msra.mxu1 %v3569_v8 }
 0x816   :  { %2637 = vmatprep.subr.bf16.mxu1 %v3570_v47 }
 0x819   :  { %2638 = vmatpush2.bf16.msra.mxu1 %v3571_v6 }
 0x81a   :  { %2639 = vmatprep.subr.bf16.mxu1 %v3572_v15 }
 0x81d   :  { %2640 = vmatpush2.bf16.msra.mxu1 %v3573_v13 }
 0x81e   :  { %2641 = vmatprep.subr.bf16.mxu1 %v3574_v52 }
 0x821   :  { %2642 = vmatpush2.bf16.msra.mxu1 %v3575_v54 }
 0x864   :  { %v2425_v24 = vpop.f32.mrf.mxu1  ;;  %v2466_v58 = vpop.f32.mrf.mxu0 }
 0x865   :  { %v2517_v49 = vadd.f32 %v2425_v24, %v6083_v4  ;;  %v2531_v34 = vadd.f32 %v5009_v12, %v2466_v58  ;;  %v1669_v12 = vsel %vm727_vm5, %v6087_v22, 0.0  ;;  %v2748_v4 = vld [vmem:[#allocation13 + $0x8] sm:$0xff]  ;;  %v6092_v22 = vld [vmem:[#allocation82_spill] sm:$0xff] }
 0x866   :  { %v2427_v25 = vpop.f32.mrf.mxu1  ;;  %v2468_v44 = vpop.f32.mrf.mxu0 }
 0x867   :  { %v3009_v11 = vmul.f32 -1.442695, %v2517_v49  ;;  %v2524_v40 = vadd.f32 %v2427_v25, %v6084_v36  ;;  %v2541_v27 = vadd.f32 %v2468_v44, %v6085_v30  ;;  %v3583_v36 = vld [vmem:[#allocation12 + $0x74] ss:$24 sps:$4 sm:$0xff]   ;;  %v3590_v30 = vld [vmem:[#allocation12 + $0x2e0] ss:$24 sps:$4 sm:$0xff]  }
 0x868   :  { %v2429_v42 = vpop.f32.mrf.mxu1  ;;  %v2470_v55 = vpop.f32.mrf.mxu0 }
 0x869   :  { %3371 = vpow2.f32 %v3009_v11  ;;  %v3010_v18 = vmul.f32 -1.442695, %v2524_v40  ;;  %v3011_v19 = vmul.f32 -1.442695, %v2541_v27  ;;  %v3578_v11 = vld [vmem:[#allocation12 + $0x100] ss:$24 sps:$4 sm:$0xff]  }
 0x86a   :  { %v2430_v23 = vpop.f32.mrf.mxu1  ;;  %v2471_v17 = vpop.f32.mrf.mxu0  ;;  %v3579_v42 = vld [vmem:[#allocation12 + $0xd4] ss:$24 sps:$4 sm:$0xff]   ;;  %v3580_v55 = vld [vmem:[#allocation12 + $0xd0] ss:$24 sps:$4 sm:$0xff]   ;;  %v3585_v40 = vld [vmem:[#allocation12 + $0x44] ss:$24 sps:$4 sm:$0xff]  }
 0x86b   :  { %3373 = vpow2.f32 %v3010_v18  ;;  %v3581_v23 = vld [vmem:[#allocation12 + $0xa4] ss:$24 sps:$4 sm:$0xff]   ;;  %v3582_v17 = vld [vmem:[#allocation12 + $0xa0] ss:$24 sps:$4 sm:$0xff]   ;;  %v3587_v18 = vld [vmem:[#allocation12 + $0x14] ss:$24 sps:$4 sm:$0xff]  }
 0x86c   :  { %v3591_v27 = vld [vmem:[#allocation12 + $0x2b4] ss:$24 sps:$4 sm:$0xff]  }
 0x876   :  { %v3372_v35 = vpop.eup %3371 }
 0x877   :  { %v2521_v29 = vadd.f32 1.0, %v3372_v35  ;;  %v3588_v35 = vld [vmem:[#allocation12 + $0x10] ss:$24 sps:$4 sm:$0xff]  }
 0x878   :  { %v3374_v56 = vpop.eup %3373 }
 0x879   :  { %3375 = vrcp.f32 %v2521_v29  ;;  %v2528_v5 = vadd.f32 1.0, %v3374_v56  ;;  %v3589_v29 = vld [vmem:[#allocation12 + $0x2e4] ss:$24 sps:$4 sm:$0xff]  }
 0x87a   :  { %3377 = vpow2.f32 %v3011_v19  ;;  %v3592_v19 = vld [vmem:[#allocation12 + $0x2b0] ss:$24 sps:$4 sm:$0xff]   ;;  %v3593_v56 = vld [vmem:[#allocation12 + $0x284] ss:$24 sps:$4 sm:$0xff]  }
 0x886   :  { %v3376_v33 = vpop.eup %3375 }
 0x887   :  { %v2532_v63 = vmul.f32 %v3376_v33, %v2531_v34  ;;  %v3378_v57 = vpop.eup %3377  ;;  %v3594_v34 = vld [vmem:[#allocation12 + $0x280] ss:$24 sps:$4 sm:$0xff]   ;;  %v3595_v33 = vld [vmem:[#allocation12 + $0x254] ss:$24 sps:$4 sm:$0xff]  }
 0x888   :  { %v2545_v45 = vadd.f32 1.0, %v3378_v57  ;;  %v3600_v57 = vld [vmem:[#allocation12 + $0x1f0] ss:$24 sps:$4 sm:$0xff]  }
 0x889   :  { %v2533_v3 = vadd.f32 %v2532_v63, %v6086_v31  ;;  %v3596_v63 = vld [vmem:[#allocation12 + $0x250] ss:$24 sps:$4 sm:$0xff]   ;;  %v3597_v31 = vld [vmem:[#allocation12 + $0x224] ss:$24 sps:$4 sm:$0xff]  }
 0x88b   :  { %3379 = vtanh.f32 %v2533_v3  ;;  %v3598_v3 = vld [vmem:[#allocation12 + $0x220] ss:$24 sps:$4 sm:$0xff]  }
 0x88c   :  { %3381 = vrcp.f32 %v2528_v5  ;;  %v3599_v5 = vld [vmem:[#allocation12 + $0x1f4] ss:$24 sps:$4 sm:$0xff]  }
 0x88d   :  { %3383 = vrcp.f32 %v2545_v45  ;;  %v3601_v45 = vld [vmem:[#allocation12 + $0x1c4] ss:$24 sps:$4 sm:$0xff]  }
 0x898   :  { %v3380_v7 = vpop.eup %3379 }
 0x899   :  { %v2535_v32 = vsub.f32 %v5344_v0, %v3380_v7  ;;  %v3382_v46 = vpop.eup %3381 }
 0x89a   :  { %v3384_v53 = vpop.eup %3383 }
 0x89b   :  { %v2536_v28 = vmul.f32 %v3382_v46, %v2535_v32  ;;  %v3603_v32 = vld [vmem:[#allocation12 + $0x194] ss:$24 sps:$4 sm:$0xff]   ;;  %v3604_v46 = vld [vmem:[#allocation12 + $0x190] ss:$24 sps:$4 sm:$0xff]  }
 0x89d   :  { %v2537_v9 = vadd.f32 %v3380_v7, %v2536_v28  ;;  %v3602_v7 = vld [vmem:[#allocation12 + $0x1c0] ss:$24 sps:$4 sm:$0xff]  }
 0x89f   :  { %v2562_v2 = vsel %vm727_vm5, %v2537_v9, 0.0  ;;  %v5439_v52 = vsel %vm727_vm5, %v2537_v9, %v5344_v0  ;;  %v3576_v0 = vld [vmem:[#allocation12 + $0x130] ss:$24 sps:$4 sm:$0xff]  }
 0x8a0   :  { %v2769_v21 = vadd.f32 %v2562_v2, %v1669_v12  ;;  %v5452_v44 = vpack.c.bf16 %v5439_v52, %v5439_v52 }
 0x8a2   :  { %2777 = vst [vmem:[#allocation13 + $0x30] sm:$0xff] %v2769_v21 }
 0x8a4   :  { %v2507_v62 = vpop.f32.mrf.mxu1 }
 0x8a5   :  { %v2548_v38 = vadd.f32 %v2507_v62, %v6089_v10 }
 0x8a6   :  { %v2509_v20 = vpop.f32.mrf.mxu1 }
 0x8a7   :  { %v3012_v41 = vmul.f32 -1.442695, %v2548_v38  ;;  %v2555_v16 = vadd.f32 %v5160_v39, %v2509_v20 }
 0x8a8   :  { %v2511_v26 = vpop.f32.mrf.mxu1 }
 0x8a9   :  { %3385 = vpow2.f32 %v3012_v41  ;;  %v2556_v48 = vmul.f32 %v3384_v53, %v2555_v16  ;;  %v6093_v41 = vld [vmem:[#allocation84_spill] sm:$0xff] }
 0x8aa   :  { %v2512_v59 = vpop.f32.mrf.mxu1 }
 0x8ab   :  { %v2557_v51 = vadd.f32 %v2556_v48, %v6090_v14  ;;  %v6094_v59 = vld [vmem:[#allocation57_spill] sm:$0xff] }
 0x8ad   :  { %3387 = vtanh.f32 %v2557_v51 }
 0x8b6   :  { %v3386_v60 = vpop.eup %3385 }
 0x8b7   :  { %v2552_v61 = vadd.f32 1.0, %v3386_v60 }
 0x8b9   :  { %3389 = vrcp.f32 %v2552_v61  ;;  %v3605_v61 = vld [vmem:[%s5499_s5] ss:$0 sm:$0xff]  ;;  %s3768_s5 = smov [#allocation14]  }
 0x8ba   :  { %v3388_v8 = vpop.eup %3387  ;;  %s2799_s1 = sshll.u32 %s3768_s5, 4  ;;  %s2800_s1 = int_to_ptr.vmem [resolvable:$true] %s2799_s1 }
 0x8bb   :  { %v2559_v47 = vsub.f32 %v5354_v43, %v3388_v8  ;;  %s3706_s18 = scalar_lea.vmem %s2800_s1, 256  ;;  %p3711_p12 = scmp.lt.s32.totalorder %s2800_s1, %s2800_s1 }
 0x8bc   :  { %p3707_p11 = scmp.ne.s32.totalorder %s2800_s1, %s3706_s18  ;;  %p3712_p13 = scmp.lt.s32.totalorder %s3706_s18, %s3706_s18 }
 0x8be   :  { %p3713_p0 = por %p3712_p13, %p3711_p12 }
 0x8c0   :  { %p3714_p1 = pnand %p3713_p0, %p3707_p11 }
 0x8c6   :  { %v3390_v6 = vpop.eup %3389 }
 0x8c7   :  { %v2560_v15 = vmul.f32 %v3390_v6, %v2559_v47 }
 0x8c9   :  { %v2561_v13 = vadd.f32 %v3388_v8, %v2560_v15  ;;  %v6095_v15 = vld [vmem:[#allocation83_spill] sm:$0xff] }
 0x8cb   :  { %v2564_v24 = vsel %vm722_vm4, %v2561_v13, 0.0  ;;  %v5446_v58 = vsel %vm722_vm4, %v2561_v13, %v5354_v43  ;;  %v3577_v43 = vld [vmem:[#allocation12 + $0x104] ss:$24 sps:$4 sm:$0xff]  }
 0x8cc   :  { %v2569_v49 = vpack.c.bf16 %v5446_v58, %v5446_v58  ;;  %v2764_v25 = vadd.f32 %v2748_v4, %v2564_v24 }
 0x8ce   :  { %2602 = vmatprep.mubr.bf16.mxu0 %v2569_v49  ;;  %2772 = vst [vmem:[#allocation13 + $0x8] sm:$0xff] %v2764_v25  ;;  %2643 = vmatprep.mubr.bf16.mxu1 %v2569_v49 }
 0x8cf   :  { %2603 = vmatmul.mubr.bf16.vlgmr.msra.gmra.mxu0 %v5452_v44  ;;  %2644 = vmatmul.mubr.bf16.vlgmr.msra.gmra.mxu1 %v5452_v44 }
 0x8d0   :  { %2653 = vmatpush1.bf16.msra.mxu0 %v5364_v37  ;;  %2684 = vmatprep.mubr.bf16.mxu0 %v2569_v49  ;;  %v3584_v37 = vld [vmem:[#allocation12 + $0x70] ss:$24 sps:$4 sm:$0xff]  }
 0x8d1   :  { %2654 = vmatprep.subr.bf16.mxu0 %v5367_v50  ;;  %v3586_v50 = vld [vmem:[#allocation12 + $0x40] ss:$24 sps:$4 sm:$0xff]  }
 0x8d4   :  { %2655 = vmatpush1.bf16.msra.mxu0 %v3576_v0 }
 0x8d5   :  { %2656 = vmatprep.subr.bf16.mxu0 %v3577_v43 }
 0x8d8   :  { %2657 = vmatpush1.bf16.msra.mxu0 %v3578_v11 }
 0x8d9   :  { %2658 = vmatprep.subr.bf16.mxu0 %v3579_v42 }
 0x8dc   :  { %2659 = vmatpush1.bf16.msra.mxu0 %v3580_v55 }
 0x8dd   :  { %2660 = vmatprep.subr.bf16.mxu0 %v3581_v23  ;;  %v6097_v23 = vld [vmem:[#allocation22_spill] sm:$0xff] }
 0x8e0   :  { %2661 = vmatpush1.bf16.msra.mxu0 %v3582_v17 }
 0x8e1   :  { %2662 = vmatprep.subr.bf16.mxu0 %v3583_v36 }
 0x8e4   :  { %2663 = vmatpush1.bf16.msra.mxu0 %v3584_v37  ;;  %v6098_v37 = vld [vmem:[#allocation85_spill] sm:$0xff] }
 0x8e5   :  { %2664 = vmatprep.subr.bf16.mxu0 %v3585_v40 }
 0x8e8   :  { %2665 = vmatpush1.bf16.msra.mxu0 %v3586_v50 }
 0x8e9   :  { %2666 = vmatprep.subr.bf16.mxu0 %v3587_v18 }
 0x8ec   :  { %2667 = vmatpush1.bf16.msra.mxu0 %v3588_v35 }
 0x8ed   :  { %2668 = vmatprep.subr.bf16.mxu0 %v3589_v29 }
 0x8f0   :  { %2669 = vmatpush2.bf16.msra.mxu0 %v3590_v30 }
 0x8f1   :  { %2670 = vmatprep.subr.bf16.mxu0 %v3591_v27 }
 0x8f4   :  { %2671 = vmatpush2.bf16.msra.mxu0 %v3592_v19 }
 0x8f5   :  { %2672 = vmatprep.subr.bf16.mxu0 %v3593_v56  ;;  %v6099_v56 = vld [vmem:[#allocation86_spill] sm:$0xff] }
 0x8f8   :  { %2673 = vmatpush2.bf16.msra.mxu0 %v3594_v34 }
 0x8f9   :  { %2674 = vmatprep.subr.bf16.mxu0 %v3595_v33 }
 0x8fc   :  { %2675 = vmatpush2.bf16.msra.mxu0 %v3596_v63 }
 0x8fd   :  { %2676 = vmatprep.subr.bf16.mxu0 %v3597_v31 }
 0x900   :  { %2677 = vmatpush2.bf16.msra.mxu0 %v3598_v3 }
 0x901   :  { %2678 = vmatprep.subr.bf16.mxu0 %v3599_v5 }
 0x904   :  { %2679 = vmatpush2.bf16.msra.mxu0 %v3600_v57 }
 0x905   :  { %2680 = vmatprep.subr.bf16.mxu0 %v3601_v45 }
 0x908   :  { %2681 = vmatpush2.bf16.msra.mxu0 %v3602_v7  ;;  %v2747_v7 = vld [vmem:[#allocation13] sm:$0xff] }
 0x909   :  { %2682 = vmatprep.subr.bf16.mxu0 %v3603_v32 }
 0x90c   :  { %2683 = vmatpush2.bf16.msra.mxu0 %v3604_v46 }
 0x90f   :  { %2685 = vmatmul.mubr.bf16.vlgmr.msra.gmra.mxu0 %v5452_v44 }
 0x98f   :  { %v2604_v28 = vpop.f32.mrf.mxu0  ;;  %v2645_v9 = vpop.f32.mrf.mxu1 }
 0x990   :  { %v2696_v1 = vadd.f32 %v2604_v28, %v6092_v22  ;;  %v2710_v8 = vadd.f32 %v3605_v61, %v2645_v9 }
 0x991   :  { %v2606_v12 = vpop.f32.mrf.mxu0  ;;  %v2647_v2 = vpop.f32.mrf.mxu1 }
 0x992   :  { %v3013_v21 = vmul.f32 -1.442695, %v2696_v1  ;;  %v2703_v16 = vadd.f32 %v2606_v12, %v6093_v41  ;;  %v2720_v14 = vadd.f32 %v2647_v2, %v6094_v59 }
 0x993   :  { %v2608_v62 = vpop.f32.mrf.mxu0  ;;  %v2649_v10 = vpop.f32.mrf.mxu1 }
 0x994   :  { %3391 = vpow2.f32 %v3013_v21  ;;  %v3014_v53 = vmul.f32 -1.442695, %v2703_v16  ;;  %v3015_v51 = vmul.f32 -1.442695, %v2720_v14 }
 0x995   :  { %v2609_v38 = vpop.f32.mrf.mxu0  ;;  %v2650_v20 = vpop.f32.mrf.mxu1 }
 0x996   :  { %3393 = vpow2.f32 %v3014_v53 }
 0x9a1   :  { %v3392_v26 = vpop.eup %3391 }
 0x9a2   :  { %v2700_v48 = vadd.f32 1.0, %v3392_v26 }
 0x9a3   :  { %v3394_v60 = vpop.eup %3393 }
 0x9a4   :  { %3395 = vrcp.f32 %v2700_v48  ;;  %v2707_v54 = vadd.f32 1.0, %v3394_v60 }
 0x9a5   :  { %3397 = vpow2.f32 %v3015_v51 }
 0x9b1   :  { %v3396_v47 = vpop.eup %3395 }
 0x9b2   :  { %v2711_v6 = vmul.f32 %v3396_v47, %v2710_v8  ;;  %v3398_v24 = vpop.eup %3397 }
 0x9b3   :  { %v2724_v4 = vadd.f32 1.0, %v3398_v24 }
 0x9b4   :  { %v2712_v13 = vadd.f32 %v2711_v6, %v6095_v15 }
 0x9b6   :  { %3399 = vtanh.f32 %v2712_v13 }
 0x9b7   :  { %3401 = vrcp.f32 %v2707_v54 }
 0x9b8   :  { %3403 = vrcp.f32 %v2724_v4 }
 0x9c3   :  { %v3400_v49 = vpop.eup %3399 }
 0x9c4   :  { %v2714_v25 = vsub.f32 %v5439_v52, %v3400_v49  ;;  %v3402_v44 = vpop.eup %3401 }
 0x9c5   :  { %v3404_v29 = vpop.eup %3403 }
 0x9c6   :  { %v2715_v0 = vmul.f32 %v3402_v44, %v2714_v25 }
 0x9c8   :  { %v2716_v43 = vadd.f32 %v3400_v49, %v2715_v0 }
 0x9ca   :  { %v2741_v42 = vsel %vm728_vm1, %v2716_v43, 0.0  ;;  %v2745_v55 = vsel %vm728_vm1, %v2716_v43, %v5439_v52 }
 0x9cb   :  { %v2770_v17 = vadd.f32 %v2741_v42, %v6097_v23  ;;  %2779 = vst [vmem:[#allocation14] sm:$0xff] %v2745_v55 }
 0x9cd   :  { %2778 = vst [vmem:[#allocation13 + $0x38] sm:$0xff] %v2770_v17 }
 0x9cf   :  { %v2686_v36 = vpop.f32.mrf.mxu0 }
 0x9d0   :  { %v2727_v40 = vadd.f32 %v2686_v36, %v6098_v37 }
 0x9d1   :  { %v2688_v50 = vpop.f32.mrf.mxu0 }
 0x9d2   :  { %v3016_v18 = vmul.f32 -1.442695, %v2727_v40  ;;  %v2734_v35 = vadd.f32 %v5160_v39, %v2688_v50 }
 0x9d3   :  { %v2690_v30 = vpop.f32.mrf.mxu0 }
 0x9d4   :  { %3405 = vpow2.f32 %v3016_v18  ;;  %v2735_v27 = vmul.f32 %v3404_v29, %v2734_v35 }
 0x9d5   :  { %v2691_v19 = vpop.f32.mrf.mxu0 }
 0x9d6   :  { %v2736_v34 = vadd.f32 %v2735_v27, %v6099_v56 }
 0x9d8   :  { %3407 = vtanh.f32 %v2736_v34 }
 0x9e1   :  { %v3406_v52 = vpop.eup %3405 }
 0x9e2   :  { %v2731_v33 = vadd.f32 1.0, %v3406_v52 }
 0x9e4   :  { %3409 = vrcp.f32 %v2731_v33 }
 0x9e5   :  { %v3408_v63 = vpop.eup %3407 }
 0x9e6   :  { %v2738_v31 = vsub.f32 %v5446_v58, %v3408_v63 }
 0x9f1   :  { %v3410_v3 = vpop.eup %3409 }
 0x9f2   :  { %v2739_v5 = vmul.f32 %v3410_v3, %v2738_v31 }
 0x9f4   :  { %v2740_v57 = vadd.f32 %v3408_v63, %v2739_v5 }
 0x9f6   :  { %v2743_v45 = vsel %vm721_vm0, %v2740_v57, 0.0  ;;  %v2746_v32 = vsel %vm721_vm0, %v2740_v57, %v5446_v58 }
 0x9f7   :  { %v2763_v46 = vadd.f32 %v2747_v7, %v2743_v45  ;;  %2781 = vst [vmem:[#allocation14 + $0x8] sm:$0xff] %v2746_v32 }
 0x9f8   :  { %3717 = shalt.err (!%p3714_p1)
}
 0x9f9   :  { %2805 = dma.vmem_to_hbm [thread:$0]  %s2800_s1, 256, %s5501_s7, [#allocation15], %s3757_s27, %s3757_s27, %s3758_s28   ;;  %2771 = vst [vmem:[#allocation13] sm:$0xff] %v2763_v46 }
 0x9fa   :  { %s3726_s21 = scalar_lea.vmem %s2788_s17, 1024  ;;  %p3731_p3 = scmp.lt.s32.totalorder %s2788_s17, %s2788_s17 }
 0x9fb   :  { %p3727_p2 = scmp.ne.s32.totalorder %s2788_s17, %s3726_s21  ;;  %p3732_p4 = scmp.lt.s32.totalorder %s3726_s21, %s3726_s21 }
 0x9fd   :  { %p3733_p5 = por %p3732_p4, %p3731_p3 }
 0x9ff   :  { %p3734_p6 = pnand %p3733_p5, %p3727_p2 }
 0xa01   :  { %3737 = shalt.err (!%p3734_p6)
}
 0xa02   :  { %2793 = dma.vmem_to_hbm [thread:$0]  %s2788_s17, 1024, %s5500_s6, [#allocation6], %s3757_s27, %s3757_s27, %s3758_s28  }
 0xa03   :  { %3752 = dma.done.wait [#allocation6], 1024  }
 0xa04   :  { %3753 = vsyncadd [#allocation6], 4294966272 }
 0xa05   :  { %3754 = dma.done.wait [#allocation15], 256  }
 0xa06   :  { %3755 = vsyncadd [#allocation15], 4294967040 }
 0xa07   :  { %2812 = vsyncpa [#allocation5], 1 }
 0xa08   :  { %2813 = vsyncpa [#allocation8], 1 }
 0xa09   :  { %2814 = vsyncpa [#allocation11], 1 }
 0xa0a   :  { %2815 = vsyncpa [#allocation6], 1 }
 0xa0b   :  { %2816 = vsyncpa [#allocation15], 1 }

</bundles_post_ra>
